<compile_context>
chip_gen: v7x
topology: tpu7x:2x2x1
jax: 0.10.0
libtpu: 0.0.40
codegen_flags: <defaults>
</compile_context>

<pallas_src>
import functools

import jax
import jax.numpy as jnp
from jax.experimental import pallas as pl
from jax.experimental.pallas import tpu as pltpu


# ----------------------------------------------------------------------------
# Fused kernel: one batch sample per grid step, everything resident in VMEM.
# Layout: rows = channels, cols = flattened spatial position r = h*W + w.
# ----------------------------------------------------------------------------
def fused_mobilevit_kernel(x_ref, msp_ref, mps_ref, tap_ref,
                           w_adj_ref, w_dw_ref, dw_s_ref, dw_b_ref, w_pw_ref,
                           w_qkv_ref, b_qkv_ref, w_o_ref, b_o_ref,
                           w1_ref, b1_ref, w2_ref, b2_ref,
                           w_proj_ref, b_proj_ref,
                           o_ref,
                           *, n_blocks, H, W, Dp, shortcut, has_adjust, eps):
    f32 = jnp.float32
    bf16 = jnp.bfloat16
    HW = H * W
    D = w_pw_ref.shape[0]
    inv_n = 1.0 / float(HW * D)

    # ---- channel adjust (1x1 conv, bias-free), channel-major ---------------
    x_chw = x_ref[0]                                          # (C1, HW)
    if has_adjust:
        xa = jnp.dot(w_adj_ref[...], x_chw.astype(bf16),
                     preferred_element_type=f32)              # (C2, HW)
    else:
        xa = x_chw                                            # identity, C1 == C2

    # ---- local rep 1/2: depthwise 3x3 (pad 1) + folded BN + SiLU -----------
    # Lane rolls (XLU) replace the padded scratch; host-precomputed border
    # masks zero the taps that would wrap around the image edge.
    acc = xa * w_dw_ref[:, 4:5]                               # center tap (mask==1)
    for dy in (-1, 0, 1):
        for dx in (-1, 0, 1):
            if dy == 0 and dx == 0:
                continue
            t = (dy + 1) * 3 + (dx + 1)
            shift = (-(dy * W + dx)) % HW
            tap = pltpu.roll(xa, shift=shift, axis=1)         # (C2, HW)
            acc = acc + tap * tap_ref[t:t + 1, :] * w_dw_ref[:, t:t + 1]
    y = acc * dw_s_ref[...] + dw_b_ref[...]                   # folded BatchNorm
    y = y * jax.nn.sigmoid(y)                                 # SiLU

    # ---- local rep 2/2: 1x1 conv C2 -> D (no norm / act / bias) ------------
    xg = jnp.dot(w_pw_ref[...], y.astype(bf16),
                 preferred_element_type=f32)                  # (D, HW)

    masks_sp = msp_ref[...]                                   # (4, HW) slot x pos
    masks_ps = mps_ref[...]                                   # (HW, 4) pos x slot

    def group_norm(t):
        # GroupNorm(num_groups=1), single-pass stats; affine folded into the
        # matmul that follows each call.
        mu = jnp.sum(t) * inv_n
        ex2 = jnp.sum(t * t) * inv_n
        return (t - mu) * jax.lax.rsqrt(ex2 - mu * mu + eps)

    # ---- global rep: n x (pre-norm linear attention + pre-norm FFN) --------
    for i in range(n_blocks):
        # pre-norm linear self-attention (MobileViTv2); q/k/v fused & tile-padded
        h = group_norm(xg).astype(bf16)
        qkv = jnp.dot(w_qkv_ref[i], h,
                      preferred_element_type=f32) + b_qkv_ref[i]   # (3Dp, HW)
        kp = qkv[0:Dp, :]                                     # tile-aligned slices
        vp = qkv[Dp:2 * Dp, :]
        q = qkv[2 * Dp:2 * Dp + 1, :]                         # (1, HW)

        # softmax over the patch axis within each 2x2 pixel slot (single pass)
        m_slot = jnp.max(jnp.where(masks_sp > 0.5, q, -jnp.inf),
                         axis=1, keepdims=True)               # (4, 1)
        m_full = jnp.sum(masks_sp * m_slot, axis=0, keepdims=True)   # (1, HW)
        e = jnp.exp(q - m_full)                               # (1, HW)
        den_slot = jnp.sum(masks_sp * e, axis=1, keepdims=True)      # (4, 1)
        den_full = jnp.sum(masks_sp * den_slot, axis=0, keepdims=True)
        scores = e * pl.reciprocal(den_full, approx=True)     # (1, HW)

        # per-slot context on the MXU, broadcast back via a K=4 matmul
        ctx = jnp.dot(kp * scores, masks_ps,
                      preferred_element_type=f32)             # (Dp, 4)
        ctx_full = jnp.dot(ctx, masks_sp,
                           preferred_element_type=f32)        # (Dp, HW)
        attn = jnp.maximum(vp, 0.0) * ctx_full                # ReLU(value) * ctx
        attn = jnp.dot(w_o_ref[i], attn.astype(bf16),
                       preferred_element_type=f32) + b_o_ref[i]     # (D, HW)
        xg = xg + attn

        # pre-norm FFN: 1x1 -> SiLU -> 1x1 (norm affine folded into w1/b1)
        h = group_norm(xg).astype(bf16)
        h1 = jnp.dot(w1_ref[i], h,
                     preferred_element_type=f32) + b1_ref[i]  # (F, HW)
        h1 = h1 * jax.nn.sigmoid(h1)
        h2 = jnp.dot(w2_ref[i], h1.astype(bf16),
                     preferred_element_type=f32) + b2_ref[i]  # (D, HW)
        xg = xg + h2

    xg = group_norm(xg)   # final GroupNorm (affine folded into w_proj/b_proj)

    # ---- conv_proj 1x1 D -> C2 (folded BN, no act) + optional residual ------
    out = jnp.dot(w_proj_ref[...], xg.astype(bf16),
                  preferred_element_type=f32) + b_proj_ref[...]     # (C2, HW)
    if shortcut:
        out = out + xa
    o_ref[0] = out                                            # lane-dense store


# ----------------------------------------------------------------------------
# Host wrapper: single pallas_call, NCHW in / NCHW out (only free reshapes).
# ----------------------------------------------------------------------------
def mobilevit_block_forward(x_nchw, p):
    B, C1, H, W = x_nchw.shape
    C2 = p["c2"]
    HW = H * W
    D, Dp, F, n = p["D"], p["Dp"], p["F"], p["n_blocks"]
    # TODO(synk): resize_input_if_needed (bilinear interpolate) for H or W not
    #             divisible by the 2x2 patch size is not implemented.
    assert H % 2 == 0 and W % 2 == 0

    # ---- host-precomputed constant masks (DMA'd once: constant index maps) --
    r = jnp.arange(HW, dtype=jnp.int32)
    hi, wi = r // W, r % W
    slot = (hi % 2) * 2 + (wi % 2)
    masks_ps = (slot[:, None] == jnp.arange(4, dtype=jnp.int32)[None, :]
                ).astype(jnp.float32)                          # (HW, 4)
    masks_sp = masks_ps.T                                      # (4, HW)
    taps = []
    for dy in (-1, 0, 1):
        for dx in (-1, 0, 1):
            ok = ((hi + dy >= 0) & (hi + dy < H) &
                  (wi + dx >= 0) & (wi + dx < W))
            taps.append(ok.astype(jnp.float32))
    tap_mask = jnp.stack(taps, axis=0)                         # (9, HW)

    kernel = functools.partial(
        fused_mobilevit_kernel, n_blocks=n, H=H, W=W, Dp=Dp,
        shortcut=p["shortcut"], has_adjust=p["has_adjust"], eps=1e-5)

    def rep(shape):
        nd = len(shape)
        return pl.BlockSpec(shape, lambda b, _n=nd: (0,) * _n)

    weight_args = (p["w_adj"], p["w_dw"], p["dw_scale"], p["dw_bias"], p["w_pw"],
                   p["w_qkv"], p["b_qkv"], p["w_o"], p["b_o"],
                   p["w1"], p["b1"], p["w2"], p["b2"],
                   p["w_proj"], p["b_proj"])
    const_args = (masks_sp, masks_ps, tap_mask)
    flops = B * (2 * HW * (C1 * C2 + C2 * D
                           + n * (3 * Dp * D + D * Dp + 2 * F * D)
                           + D * C2)
                 + 2 * 9 * HW * C2)
    transcendentals = B * HW * (C2 + n * (1 + F))
    bytes_accessed = (int(x_nchw.size) * 4 + B * C2 * HW * 4
                      + sum(int(a.size) * a.dtype.itemsize
                            for a in weight_args + const_args))
    cost = pl.CostEstimate(flops=int(flops),
                           transcendentals=int(transcendentals),
                           bytes_accessed=int(bytes_accessed))

    out = pl.pallas_call(
        kernel,
        out_shape=jax.ShapeDtypeStruct((B, C2, HW), jnp.float32),
        grid=(B,),
        in_specs=[
            pl.BlockSpec((1, C1, HW), lambda b: (b, 0, 0)),
            rep((4, HW)), rep((HW, 4)), rep((9, HW)),
            rep((C2, C1)),
            rep((C2, 9)), rep((C2, 1)), rep((C2, 1)),
            rep((D, C2)),
            rep((n, 3 * Dp, D)), rep((n, 3 * Dp, 1)),
            rep((n, D, Dp)), rep((n, D, 1)),
            rep((n, F, D)), rep((n, F, 1)),
            rep((n, D, F)), rep((n, D, 1)),
            rep((C2, D)), rep((C2, 1)),
        ],
        out_specs=pl.BlockSpec((1, C2, HW), lambda b: (b, 0, 0)),
        compiler_params=pltpu.CompilerParams(
            dimension_semantics=("parallel",)),   # megacore on v7x
        cost_estimate=cost,
    )(x_nchw.reshape(B, C1, HW),
      masks_sp, masks_ps, tap_mask,
      p["w_adj"], p["w_dw"], p["dw_scale"], p["dw_bias"], p["w_pw"],
      p["w_qkv"], p["b_qkv"], p["w_o"], p["b_o"],
      p["w1"], p["b1"], p["w2"], p["b2"],
      p["w_proj"], p["b_proj"])
    return out.reshape(B, C2, H, W)


# ----------------------------------------------------------------------------
# Deterministic parameter init (synthetic; mirrors module __init__ shapes).
# BatchNorms and GroupNorm affines are folded (eval mode); weights are stored
# pre-transposed for channel-major matmuls and q/k/v are padded to lane tiles.
# ----------------------------------------------------------------------------
def init_params(key, c1, c2, n_blocks, shortcut):
    D = max(64, c2 // 4)                 # attn_unit_dim
    F = int((2 * D // 16) * 16)          # ffn_multiplier=2, snapped to /16
    Dp = ((D + 127) // 128) * 128        # lane-tile padded head width
    n = n_blocks
    ks = iter(jax.random.split(key, 64))

    def nrm(shape, s=0.05):
        return (s * jax.random.normal(next(ks), shape)).astype(jnp.float32)

    p = {"c2": c2, "n_blocks": n, "D": D, "Dp": Dp, "F": F,
         "has_adjust": c1 != c2,
         "shortcut": bool(shortcut and c1 == c2)}

    # channel_adjust 1x1 conv, stored (c2, c1); identity placeholder when unused
    if c1 != c2:
        p["w_adj"] = nrm((c2, c1), 0.1).astype(jnp.bfloat16)
    else:
        p["w_adj"] = jnp.eye(c2, c1, dtype=jnp.bfloat16)

    # depthwise 3x3 conv + folded BatchNorm (channel-major columns)
    p["w_dw"] = nrm((c2, 9), 0.2)
    g, b = 1.0 + nrm((c2,), 0.1), nrm((c2,), 0.1)
    m, v = nrm((c2,), 0.1), 1.0 + jnp.abs(nrm((c2,), 0.1))
    sc = g / jnp.sqrt(v + 1e-5)
    p["dw_scale"] = sc.reshape(c2, 1)
    p["dw_bias"] = (b - m * sc).reshape(c2, 1)

    # local 1x1 conv c2 -> D (bias-free, no norm/act), stored (D, c2)
    p["w_pw"] = nrm((D, c2), 0.1).astype(jnp.bfloat16)

    # GroupNorm affines (folded into the following matmuls below)
    g1, be1 = 1.0 + nrm((n, 1, D), 0.1), nrm((n, 1, D), 0.1)
    g2, be2 = 1.0 + nrm((n, 1, D), 0.1), nrm((n, 1, D), 0.1)
    gf, bef = 1.0 + nrm((1, D), 0.1), nrm((1, D), 0.1)

    def fold(w, bias, gamma, beta):
        # (x*gamma + beta) @ w + bias == x @ (gamma^T * w) + (beta @ w + bias)
        return w * jnp.swapaxes(gamma, -1, -2), bias + jnp.matmul(beta, w)

    # fused q/k/v projection: fold pre-norm affine, then store transposed and
    # zero-padded so k / v / q each occupy a full 128-row tile: (n, 3*Dp, D)
    wk, wv, wq = nrm((n, D, D)), nrm((n, D, D)), nrm((n, D, 1))
    bk, bv = nrm((n, 1, D), 0.02), nrm((n, 1, D), 0.02)
    bq = nrm((n, 1, 1), 0.02)
    w_qkv, b_qkv = fold(jnp.concatenate([wk, wv, wq], -1),
                        jnp.concatenate([bk, bv, bq], -1), g1, be1)

    def t_pad(a):     # (n, D, m) -> (n, Dp, D-or-1) transposed, zero-padded rows
        a_t = jnp.swapaxes(a, 1, 2)
        return jnp.pad(a_t, ((0, 0), (0, Dp - a_t.shape[1]), (0, 0)))

    p["w_qkv"] = jnp.concatenate(
        [t_pad(w_qkv[..., :D]), t_pad(w_qkv[..., D:2 * D]),
         t_pad(w_qkv[..., 2 * D:])], axis=1).astype(jnp.bfloat16)   # (n, 3Dp, D)
    p["b_qkv"] = jnp.concatenate(
        [t_pad(b_qkv[..., :D]), t_pad(b_qkv[..., D:2 * D]),
         t_pad(b_qkv[..., 2 * D:])], axis=1)                        # (n, 3Dp, 1)

    # attention output projection: transposed, input dim padded to Dp (zeros)
    w_o = jnp.swapaxes(nrm((n, D, D)), 1, 2)
    p["w_o"] = jnp.pad(w_o, ((0, 0), (0, 0), (0, Dp - D))).astype(jnp.bfloat16)
    p["b_o"] = nrm((n, D, 1), 0.02)

    # FFN: fold pre-norm affine into w1/b1, store transposed
    w1, b1 = fold(nrm((n, D, F)), nrm((n, 1, F), 0.02), g2, be2)
    p["w1"] = jnp.swapaxes(w1, 1, 2).astype(jnp.bfloat16)           # (n, F, D)
    p["b1"] = jnp.swapaxes(b1, 1, 2)                                # (n, F, 1)
    p["w2"] = jnp.swapaxes(nrm((n, F, D)), 1, 2).astype(jnp.bfloat16)  # (n, D, F)
    p["b2"] = nrm((n, D, 1), 0.02)

    # conv_proj 1x1 D -> c2: fold output BatchNorm and the final GroupNorm affine
    w_proj = nrm((D, c2), 0.1)
    gp, bp = 1.0 + nrm((c2,), 0.1), nrm((c2,), 0.1)
    mp, vp = nrm((c2,), 0.1), 1.0 + jnp.abs(nrm((c2,), 0.1))
    scp = gp / jnp.sqrt(vp + 1e-5)
    w_bn = w_proj * scp[None, :]
    b_bn = (bp - mp * scp)[None, :]
    w_all, b_all = fold(w_bn, b_bn, gf, bef)                        # (D,c2),(1,c2)
    p["w_proj"] = w_all.T.astype(jnp.bfloat16)                      # (c2, D)
    p["b_proj"] = b_all.reshape(c2, 1)
    return p


if __name__ == "__main__":
    key = jax.random.PRNGKey(0)
    k_param, k_x = jax.random.split(key)
    # c1 == c2 -> shortcut path active; H, W divisible by the 2x2 patch size
    B, C1, C2, H, W, n = 2, 8, 8, 16, 16, 1
    x = jax.random.normal(k_x, (B, C1, H, W), jnp.float32)
    params = init_params(k_param, C1, C2, n_blocks=max(1, n), shortcut=True)
    out = jax.block_until_ready(mobilevit_block_forward(x, params))
    assert out.shape == (B, C2, H, W) and out.dtype == jnp.float32
    assert bool(jnp.all(jnp.isfinite(out)))
    print("KERNEL_OK")
</pallas_src>

<mosaic_0001>
module attributes {stable_mosaic.version = 11 : i64} {
  func.func @fused_mobilevit_kernel(%arg0: i32, %arg1: memref<1x8x256xf32, #tpu.memory_space<vmem>>, %arg2: memref<4x256xf32, #tpu.memory_space<vmem>>, %arg3: memref<256x4xf32, #tpu.memory_space<vmem>>, %arg4: memref<9x256xf32, #tpu.memory_space<vmem>>, %arg5: memref<8x8xbf16, #tpu.memory_space<vmem>>, %arg6: memref<8x9xf32, #tpu.memory_space<vmem>>, %arg7: memref<8x1xf32, #tpu.memory_space<vmem>>, %arg8: memref<8x1xf32, #tpu.memory_space<vmem>>, %arg9: memref<64x8xbf16, #tpu.memory_space<vmem>>, %arg10: memref<1x384x64xbf16, #tpu.memory_space<vmem>>, %arg11: memref<1x384x1xf32, #tpu.memory_space<vmem>>, %arg12: memref<1x64x128xbf16, #tpu.memory_space<vmem>>, %arg13: memref<1x64x1xf32, #tpu.memory_space<vmem>>, %arg14: memref<1x128x64xbf16, #tpu.memory_space<vmem>>, %arg15: memref<1x128x1xf32, #tpu.memory_space<vmem>>, %arg16: memref<1x64x128xbf16, #tpu.memory_space<vmem>>, %arg17: memref<1x64x1xf32, #tpu.memory_space<vmem>>, %arg18: memref<8x64xbf16, #tpu.memory_space<vmem>>, %arg19: memref<8x1xf32, #tpu.memory_space<vmem>>, %arg20: memref<1x8x256xf32, #tpu.memory_space<vmem>>) attributes {dimension_semantics = [#tpu.dimension_semantics<parallel>], iteration_bounds = array<i64: 2>, scalar_prefetch = 0 : i64, scratch_operands = 0 : i64, tpu.core_type = #tpu.core_type<tc>, window_params = [{transform_indices = @transform_0, window_bounds = array<i64: 1, 8, 256>}, {pipeline_mode = #tpu.pipeline_mode<synchronous>, transform_indices = @transform_1, window_bounds = array<i64: 4, 256>}, {pipeline_mode = #tpu.pipeline_mode<synchronous>, transform_indices = @transform_2, window_bounds = array<i64: 256, 4>}, {pipeline_mode = #tpu.pipeline_mode<synchronous>, transform_indices = @transform_3, window_bounds = array<i64: 9, 256>}, {pipeline_mode = #tpu.pipeline_mode<synchronous>, transform_indices = @transform_4, window_bounds = array<i64: 8, 8>}, {pipeline_mode = #tpu.pipeline_mode<synchronous>, transform_indices = @transform_5, window_bounds = array<i64: 8, 9>}, {pipeline_mode = #tpu.pipeline_mode<synchronous>, transform_indices = @transform_6, window_bounds = array<i64: 8, 1>}, {pipeline_mode = #tpu.pipeline_mode<synchronous>, transform_indices = @transform_7, window_bounds = array<i64: 8, 1>}, {pipeline_mode = #tpu.pipeline_mode<synchronous>, transform_indices = @transform_8, window_bounds = array<i64: 64, 8>}, {pipeline_mode = #tpu.pipeline_mode<synchronous>, transform_indices = @transform_9, window_bounds = array<i64: 1, 384, 64>}, {pipeline_mode = #tpu.pipeline_mode<synchronous>, transform_indices = @transform_10, window_bounds = array<i64: 1, 384, 1>}, {pipeline_mode = #tpu.pipeline_mode<synchronous>, transform_indices = @transform_11, window_bounds = array<i64: 1, 64, 128>}, {pipeline_mode = #tpu.pipeline_mode<synchronous>, transform_indices = @transform_12, window_bounds = array<i64: 1, 64, 1>}, {pipeline_mode = #tpu.pipeline_mode<synchronous>, transform_indices = @transform_13, window_bounds = array<i64: 1, 128, 64>}, {pipeline_mode = #tpu.pipeline_mode<synchronous>, transform_indices = @transform_14, window_bounds = array<i64: 1, 128, 1>}, {pipeline_mode = #tpu.pipeline_mode<synchronous>, transform_indices = @transform_15, window_bounds = array<i64: 1, 64, 128>}, {pipeline_mode = #tpu.pipeline_mode<synchronous>, transform_indices = @transform_16, window_bounds = array<i64: 1, 64, 1>}, {pipeline_mode = #tpu.pipeline_mode<synchronous>, transform_indices = @transform_17, window_bounds = array<i64: 8, 64>}, {pipeline_mode = #tpu.pipeline_mode<synchronous>, transform_indices = @transform_18, window_bounds = array<i64: 8, 1>}, {transform_indices = @transform_19, window_bounds = array<i64: 1, 8, 256>}]} {
    %c0 = arith.constant 0 : index
    %c0_0 = arith.constant 0 : index
    %c0_1 = arith.constant 0 : index
    %0 = vector.load %arg1[%c0, %c0_0, %c0_1] : memref<1x8x256xf32, #tpu.memory_space<vmem>>, vector<1x8x256xf32>
    %1 = vector.shape_cast %0 : vector<1x8x256xf32> to vector<8x256xf32>
    %c0_2 = arith.constant 0 : index
    %c4 = arith.constant 4 : index
    %2 = vector.load %arg6[%c0_2, %c4] : memref<8x9xf32, #tpu.memory_space<vmem>>, vector<8x1xf32>
    %3 = vector.broadcast %2 : vector<8x1xf32> to vector<8x256xf32>
    %4 = arith.mulf %1, %3 : vector<8x256xf32>
    %c17_i32 = arith.constant 17 : i32
    %5 = tpu.dynamic_rotate %1 by %c17_i32 dim 1 : vector<8x256xf32>, i32 -> vector<8x256xf32>
    %c0_3 = arith.constant 0 : index
    %c0_4 = arith.constant 0 : index
    %6 = vector.load %arg4[%c0_3, %c0_4] : memref<9x256xf32, #tpu.memory_space<vmem>>, vector<1x256xf32>
    %7 = vector.broadcast %6 : vector<1x256xf32> to vector<8x256xf32>
    %8 = arith.mulf %5, %7 : vector<8x256xf32>
    %c0_5 = arith.constant 0 : index
    %c0_6 = arith.constant 0 : index
    %9 = vector.load %arg6[%c0_5, %c0_6] : memref<8x9xf32, #tpu.memory_space<vmem>>, vector<8x1xf32>
    %10 = vector.broadcast %9 : vector<8x1xf32> to vector<8x256xf32>
    %11 = arith.mulf %8, %10 : vector<8x256xf32>
    %12 = arith.addf %4, %11 : vector<8x256xf32>
    %c16_i32 = arith.constant 16 : i32
    %13 = tpu.dynamic_rotate %1 by %c16_i32 dim 1 : vector<8x256xf32>, i32 -> vector<8x256xf32>
    %c1 = arith.constant 1 : index
    %c0_7 = arith.constant 0 : index
    %14 = vector.load %arg4[%c1, %c0_7] : memref<9x256xf32, #tpu.memory_space<vmem>>, vector<1x256xf32>
    %15 = vector.broadcast %14 : vector<1x256xf32> to vector<8x256xf32>
    %16 = arith.mulf %13, %15 : vector<8x256xf32>
    %c0_8 = arith.constant 0 : index
    %c1_9 = arith.constant 1 : index
    %17 = vector.load %arg6[%c0_8, %c1_9] : memref<8x9xf32, #tpu.memory_space<vmem>>, vector<8x1xf32>
    %18 = vector.broadcast %17 : vector<8x1xf32> to vector<8x256xf32>
    %19 = arith.mulf %16, %18 : vector<8x256xf32>
    %20 = arith.addf %12, %19 : vector<8x256xf32>
    %c15_i32 = arith.constant 15 : i32
    %21 = tpu.dynamic_rotate %1 by %c15_i32 dim 1 : vector<8x256xf32>, i32 -> vector<8x256xf32>
    %c2 = arith.constant 2 : index
    %c0_10 = arith.constant 0 : index
    %22 = vector.load %arg4[%c2, %c0_10] : memref<9x256xf32, #tpu.memory_space<vmem>>, vector<1x256xf32>
    %23 = vector.broadcast %22 : vector<1x256xf32> to vector<8x256xf32>
    %24 = arith.mulf %21, %23 : vector<8x256xf32>
    %c0_11 = arith.constant 0 : index
    %c2_12 = arith.constant 2 : index
    %25 = vector.load %arg6[%c0_11, %c2_12] : memref<8x9xf32, #tpu.memory_space<vmem>>, vector<8x1xf32>
    %26 = vector.broadcast %25 : vector<8x1xf32> to vector<8x256xf32>
    %27 = arith.mulf %24, %26 : vector<8x256xf32>
    %28 = arith.addf %20, %27 : vector<8x256xf32>
    %c1_i32 = arith.constant 1 : i32
    %29 = tpu.dynamic_rotate %1 by %c1_i32 dim 1 : vector<8x256xf32>, i32 -> vector<8x256xf32>
    %c3 = arith.constant 3 : index
    %c0_13 = arith.constant 0 : index
    %30 = vector.load %arg4[%c3, %c0_13] : memref<9x256xf32, #tpu.memory_space<vmem>>, vector<1x256xf32>
    %31 = vector.broadcast %30 : vector<1x256xf32> to vector<8x256xf32>
    %32 = arith.mulf %29, %31 : vector<8x256xf32>
    %c0_14 = arith.constant 0 : index
    %c3_15 = arith.constant 3 : index
    %33 = vector.load %arg6[%c0_14, %c3_15] : memref<8x9xf32, #tpu.memory_space<vmem>>, vector<8x1xf32>
    %34 = vector.broadcast %33 : vector<8x1xf32> to vector<8x256xf32>
    %35 = arith.mulf %32, %34 : vector<8x256xf32>
    %36 = arith.addf %28, %35 : vector<8x256xf32>
    %c255_i32 = arith.constant 255 : i32
    %37 = tpu.dynamic_rotate %1 by %c255_i32 dim 1 : vector<8x256xf32>, i32 -> vector<8x256xf32>
    %c5 = arith.constant 5 : index
    %c0_16 = arith.constant 0 : index
    %38 = vector.load %arg4[%c5, %c0_16] : memref<9x256xf32, #tpu.memory_space<vmem>>, vector<1x256xf32>
    %39 = vector.broadcast %38 : vector<1x256xf32> to vector<8x256xf32>
    %40 = arith.mulf %37, %39 : vector<8x256xf32>
    %c0_17 = arith.constant 0 : index
    %c5_18 = arith.constant 5 : index
    %41 = vector.load %arg6[%c0_17, %c5_18] : memref<8x9xf32, #tpu.memory_space<vmem>>, vector<8x1xf32>
    %42 = vector.broadcast %41 : vector<8x1xf32> to vector<8x256xf32>
    %43 = arith.mulf %40, %42 : vector<8x256xf32>
    %44 = arith.addf %36, %43 : vector<8x256xf32>
    %c241_i32 = arith.constant 241 : i32
    %45 = tpu.dynamic_rotate %1 by %c241_i32 dim 1 : vector<8x256xf32>, i32 -> vector<8x256xf32>
    %c6 = arith.constant 6 : index
    %c0_19 = arith.constant 0 : index
    %46 = vector.load %arg4[%c6, %c0_19] : memref<9x256xf32, #tpu.memory_space<vmem>>, vector<1x256xf32>
    %47 = vector.broadcast %46 : vector<1x256xf32> to vector<8x256xf32>
    %48 = arith.mulf %45, %47 : vector<8x256xf32>
    %c0_20 = arith.constant 0 : index
    %c6_21 = arith.constant 6 : index
    %49 = vector.load %arg6[%c0_20, %c6_21] : memref<8x9xf32, #tpu.memory_space<vmem>>, vector<8x1xf32>
    %50 = vector.broadcast %49 : vector<8x1xf32> to vector<8x256xf32>
    %51 = arith.mulf %48, %50 : vector<8x256xf32>
    %52 = arith.addf %44, %51 : vector<8x256xf32>
    %c240_i32 = arith.constant 240 : i32
    %53 = tpu.dynamic_rotate %1 by %c240_i32 dim 1 : vector<8x256xf32>, i32 -> vector<8x256xf32>
    %c7 = arith.constant 7 : index
    %c0_22 = arith.constant 0 : index
    %54 = vector.load %arg4[%c7, %c0_22] : memref<9x256xf32, #tpu.memory_space<vmem>>, vector<1x256xf32>
    %55 = vector.broadcast %54 : vector<1x256xf32> to vector<8x256xf32>
    %56 = arith.mulf %53, %55 : vector<8x256xf32>
    %c0_23 = arith.constant 0 : index
    %c7_24 = arith.constant 7 : index
    %57 = vector.load %arg6[%c0_23, %c7_24] : memref<8x9xf32, #tpu.memory_space<vmem>>, vector<8x1xf32>
    %58 = vector.broadcast %57 : vector<8x1xf32> to vector<8x256xf32>
    %59 = arith.mulf %56, %58 : vector<8x256xf32>
    %60 = arith.addf %52, %59 : vector<8x256xf32>
    %c239_i32 = arith.constant 239 : i32
    %61 = tpu.dynamic_rotate %1 by %c239_i32 dim 1 : vector<8x256xf32>, i32 -> vector<8x256xf32>
    %c8 = arith.constant 8 : index
    %c0_25 = arith.constant 0 : index
    %62 = vector.load %arg4[%c8, %c0_25] : memref<9x256xf32, #tpu.memory_space<vmem>>, vector<1x256xf32>
    %63 = vector.broadcast %62 : vector<1x256xf32> to vector<8x256xf32>
    %64 = arith.mulf %61, %63 : vector<8x256xf32>
    %c0_26 = arith.constant 0 : index
    %c8_27 = arith.constant 8 : index
    %65 = vector.load %arg6[%c0_26, %c8_27] : memref<8x9xf32, #tpu.memory_space<vmem>>, vector<8x1xf32>
    %66 = vector.broadcast %65 : vector<8x1xf32> to vector<8x256xf32>
    %67 = arith.mulf %64, %66 : vector<8x256xf32>
    %68 = arith.addf %60, %67 : vector<8x256xf32>
    %c0_28 = arith.constant 0 : index
    %c0_29 = arith.constant 0 : index
    %69 = vector.load %arg7[%c0_28, %c0_29] : memref<8x1xf32, #tpu.memory_space<vmem>>, vector<8x1xf32>
    %70 = vector.broadcast %69 : vector<8x1xf32> to vector<8x256xf32>
    %71 = arith.mulf %68, %70 : vector<8x256xf32>
    %c0_30 = arith.constant 0 : index
    %c0_31 = arith.constant 0 : index
    %72 = vector.load %arg8[%c0_30, %c0_31] : memref<8x1xf32, #tpu.memory_space<vmem>>, vector<8x1xf32>
    %73 = vector.broadcast %72 : vector<8x1xf32> to vector<8x256xf32>
    %74 = arith.addf %71, %73 : vector<8x256xf32>
    %75 = arith.negf %74 : vector<8x256xf32>
    %76 = math.exp %75 : vector<8x256xf32>
    %cst = arith.constant 1.000000e+00 : f32
    %77 = vector.broadcast %cst : f32 to vector<8x256xf32>
    %78 = arith.addf %77, %76 : vector<8x256xf32>
    %79 = arith.divf %77, %78 : vector<8x256xf32>
    %80 = arith.mulf %74, %79 : vector<8x256xf32>
    %c0_32 = arith.constant 0 : index
    %c0_33 = arith.constant 0 : index
    %81 = vector.load %arg9[%c0_32, %c0_33] : memref<64x8xbf16, #tpu.memory_space<vmem>>, vector<64x8xbf16>
    %82 = arith.truncf %80 : vector<8x256xf32> to vector<8x256xbf16>
    %cst_34 = arith.constant dense<0.000000e+00> : vector<64x256xf32>
    %83 = tpu.matmul %81, %82, %cst_34 {dimension_numbers = #tpu.dot_dimension_numbers<[1], [0], [0], [1], [0, 0, 1, 1], [], []>} : vector<64x8xbf16>, vector<8x256xbf16>, vector<64x256xf32> -> vector<64x256xf32>
    %c0_35 = arith.constant 0 : index
    %c0_36 = arith.constant 0 : index
    %84 = vector.load %arg2[%c0_35, %c0_36] : memref<4x256xf32, #tpu.memory_space<vmem>>, vector<4x256xf32>
    %c0_37 = arith.constant 0 : index
    %c0_38 = arith.constant 0 : index
    %85 = vector.load %arg3[%c0_37, %c0_38] : memref<256x4xf32, #tpu.memory_space<vmem>>, vector<256x4xf32>
    %86 = vector.shape_cast %83 : vector<64x256xf32> to vector<1x64x256xf32>
    %cst_39 = arith.constant dense<0.000000e+00> : vector<1xf32>
    %87 = vector.multi_reduction <add>, %86, %cst_39 [1, 2] : vector<1x64x256xf32> to vector<1xf32>
    %88 = vector.shape_cast %87 : vector<1xf32> to vector<1x1x1xf32>
    %89 = vector.extract %88[0, 0, 0] : f32 from vector<1x1x1xf32>
    %cst_40 = arith.constant 6.10351563E-5 : f32
    %90 = arith.mulf %89, %cst_40 : f32
    %91 = arith.mulf %83, %83 : vector<64x256xf32>
    %92 = vector.shape_cast %91 : vector<64x256xf32> to vector<1x64x256xf32>
    %cst_41 = arith.constant dense<0.000000e+00> : vector<1xf32>
    %93 = vector.multi_reduction <add>, %92, %cst_41 [1, 2] : vector<1x64x256xf32> to vector<1xf32>
    %94 = vector.shape_cast %93 : vector<1xf32> to vector<1x1x1xf32>
    %95 = vector.extract %94[0, 0, 0] : f32 from vector<1x1x1xf32>
    %cst_42 = arith.constant 6.10351563E-5 : f32
    %96 = arith.mulf %95, %cst_42 : f32
    %97 = vector.broadcast %90 : f32 to vector<64x256xf32>
    %98 = arith.subf %83, %97 : vector<64x256xf32>
    %99 = arith.mulf %90, %90 : f32
    %100 = arith.subf %96, %99 : f32
    %cst_43 = arith.constant 9.99999974E-6 : f32
    %101 = arith.addf %100, %cst_43 : f32
    %102 = math.rsqrt %101 : f32
    %103 = vector.broadcast %102 : f32 to vector<64x256xf32>
    %104 = arith.mulf %98, %103 : vector<64x256xf32>
    %105 = arith.truncf %104 : vector<64x256xf32> to vector<64x256xbf16>
    %c0_44 = arith.constant 0 : index
    %c0_45 = arith.constant 0 : index
    %c0_46 = arith.constant 0 : index
    %106 = vector.load %arg10[%c0_44, %c0_45, %c0_46] : memref<1x384x64xbf16, #tpu.memory_space<vmem>>, vector<1x384x64xbf16>
    %107 = vector.shape_cast %106 : vector<1x384x64xbf16> to vector<384x64xbf16>
    %cst_47 = arith.constant dense<0.000000e+00> : vector<384x256xf32>
    %108 = tpu.matmul %107, %105, %cst_47 {dimension_numbers = #tpu.dot_dimension_numbers<[1], [0], [0], [1], [0, 0, 1, 1], [], []>} : vector<384x64xbf16>, vector<64x256xbf16>, vector<384x256xf32> -> vector<384x256xf32>
    %c0_48 = arith.constant 0 : index
    %c0_49 = arith.constant 0 : index
    %c0_50 = arith.constant 0 : index
    %109 = vector.load %arg11[%c0_48, %c0_49, %c0_50] : memref<1x384x1xf32, #tpu.memory_space<vmem>>, vector<1x384x1xf32>
    %110 = vector.shape_cast %109 : vector<1x384x1xf32> to vector<384x1xf32>
    %111 = vector.broadcast %110 : vector<384x1xf32> to vector<384x256xf32>
    %112 = arith.addf %108, %111 : vector<384x256xf32>
    %113 = vector.extract_strided_slice %112 {offsets = [0, 0], sizes = [128, 256], strides = [1, 1]} : vector<384x256xf32> to vector<128x256xf32>
    %114 = vector.extract_strided_slice %112 {offsets = [128, 0], sizes = [128, 256], strides = [1, 1]} : vector<384x256xf32> to vector<128x256xf32>
    %115 = vector.extract_strided_slice %112 {offsets = [256, 0], sizes = [1, 256], strides = [1, 1]} : vector<384x256xf32> to vector<1x256xf32>
    %cst_51 = arith.constant 5.000000e-01 : f32
    %116 = vector.broadcast %cst_51 : f32 to vector<4x256xf32>
    %117 = arith.cmpf ogt, %84, %116 : vector<4x256xf32>
    %cst_52 = arith.constant 0xFF800000 : f32
    %118 = vector.shape_cast %115 : vector<1x256xf32> to vector<1x256xf32>
    %119 = vector.broadcast %118 : vector<1x256xf32> to vector<4x256xf32>
    %120 = vector.broadcast %cst_52 : f32 to vector<4x256xf32>
    %121 = arith.select %117, %119, %120 : vector<4x256xi1>, vector<4x256xf32>
    %cst_53 = arith.constant dense<0xFF800000> : vector<4xf32>
    %122 = vector.multi_reduction <maximumf>, %121, %cst_53 [1] : vector<4x256xf32> to vector<4xf32>
    %123 = vector.shape_cast %122 : vector<4xf32> to vector<4x1xf32>
    %124 = vector.broadcast %123 : vector<4x1xf32> to vector<4x256xf32>
    %125 = arith.mulf %84, %124 : vector<4x256xf32>
    %cst_54 = arith.constant dense<0.000000e+00> : vector<256xf32>
    %126 = vector.multi_reduction <add>, %125, %cst_54 [0] : vector<4x256xf32> to vector<256xf32>
    %127 = vector.shape_cast %126 : vector<256xf32> to vector<1x256xf32>
    %128 = arith.subf %115, %127 : vector<1x256xf32>
    %129 = math.exp %128 : vector<1x256xf32>
    %130 = vector.broadcast %129 : vector<1x256xf32> to vector<4x256xf32>
    %131 = arith.mulf %84, %130 : vector<4x256xf32>
    %cst_55 = arith.constant dense<0.000000e+00> : vector<4xf32>
    %132 = vector.multi_reduction <add>, %131, %cst_55 [1] : vector<4x256xf32> to vector<4xf32>
    %133 = vector.shape_cast %132 : vector<4xf32> to vector<4x1xf32>
    %134 = vector.broadcast %133 : vector<4x1xf32> to vector<4x256xf32>
    %135 = arith.mulf %84, %134 : vector<4x256xf32>
    %cst_56 = arith.constant dense<0.000000e+00> : vector<256xf32>
    %136 = vector.multi_reduction <add>, %135, %cst_56 [0] : vector<4x256xf32> to vector<256xf32>
    %137 = vector.shape_cast %136 : vector<256xf32> to vector<1x256xf32>
    %138 = tpu.reciprocal %137 {approx = true} : vector<1x256xf32> -> vector<1x256xf32>
    %139 = arith.mulf %129, %138 : vector<1x256xf32>
    %140 = vector.broadcast %139 : vector<1x256xf32> to vector<128x256xf32>
    %141 = arith.mulf %113, %140 : vector<128x256xf32>
    %cst_57 = arith.constant dense<0.000000e+00> : vector<128x4xf32>
    %142 = tpu.matmul %141, %85, %cst_57 {dimension_numbers = #tpu.dot_dimension_numbers<[1], [0], [0], [1], [0, 0, 1, 1], [], []>} : vector<128x256xf32>, vector<256x4xf32>, vector<128x4xf32> -> vector<128x4xf32>
    %cst_58 = arith.constant dense<0.000000e+00> : vector<128x256xf32>
    %143 = tpu.matmul %142, %84, %cst_58 {dimension_numbers = #tpu.dot_dimension_numbers<[1], [0], [0], [1], [0, 0, 1, 1], [], []>} : vector<128x4xf32>, vector<4x256xf32>, vector<128x256xf32> -> vector<128x256xf32>
    %cst_59 = arith.constant 0.000000e+00 : f32
    %144 = vector.broadcast %cst_59 : f32 to vector<128x256xf32>
    %145 = arith.maximumf %114, %144 : vector<128x256xf32>
    %146 = arith.mulf %145, %143 : vector<128x256xf32>
    %c0_60 = arith.constant 0 : index
    %c0_61 = arith.constant 0 : index
    %c0_62 = arith.constant 0 : index
    %147 = vector.load %arg12[%c0_60, %c0_61, %c0_62] : memref<1x64x128xbf16, #tpu.memory_space<vmem>>, vector<1x64x128xbf16>
    %148 = vector.shape_cast %147 : vector<1x64x128xbf16> to vector<64x128xbf16>
    %149 = arith.truncf %146 : vector<128x256xf32> to vector<128x256xbf16>
    %cst_63 = arith.constant dense<0.000000e+00> : vector<64x256xf32>
    %150 = tpu.matmul %148, %149, %cst_63 {dimension_numbers = #tpu.dot_dimension_numbers<[1], [0], [0], [1], [0, 0, 1, 1], [], []>} : vector<64x128xbf16>, vector<128x256xbf16>, vector<64x256xf32> -> vector<64x256xf32>
    %c0_64 = arith.constant 0 : index
    %c0_65 = arith.constant 0 : index
    %c0_66 = arith.constant 0 : index
    %151 = vector.load %arg13[%c0_64, %c0_65, %c0_66] : memref<1x64x1xf32, #tpu.memory_space<vmem>>, vector<1x64x1xf32>
    %152 = vector.shape_cast %151 : vector<1x64x1xf32> to vector<64x1xf32>
    %153 = vector.broadcast %152 : vector<64x1xf32> to vector<64x256xf32>
    %154 = arith.addf %150, %153 : vector<64x256xf32>
    %155 = arith.addf %83, %154 : vector<64x256xf32>
    %156 = vector.shape_cast %155 : vector<64x256xf32> to vector<1x64x256xf32>
    %cst_67 = arith.constant dense<0.000000e+00> : vector<1xf32>
    %157 = vector.multi_reduction <add>, %156, %cst_67 [1, 2] : vector<1x64x256xf32> to vector<1xf32>
    %158 = vector.shape_cast %157 : vector<1xf32> to vector<1x1x1xf32>
    %159 = vector.extract %158[0, 0, 0] : f32 from vector<1x1x1xf32>
    %cst_68 = arith.constant 6.10351563E-5 : f32
    %160 = arith.mulf %159, %cst_68 : f32
    %161 = arith.mulf %155, %155 : vector<64x256xf32>
    %162 = vector.shape_cast %161 : vector<64x256xf32> to vector<1x64x256xf32>
    %cst_69 = arith.constant dense<0.000000e+00> : vector<1xf32>
    %163 = vector.multi_reduction <add>, %162, %cst_69 [1, 2] : vector<1x64x256xf32> to vector<1xf32>
    %164 = vector.shape_cast %163 : vector<1xf32> to vector<1x1x1xf32>
    %165 = vector.extract %164[0, 0, 0] : f32 from vector<1x1x1xf32>
    %cst_70 = arith.constant 6.10351563E-5 : f32
    %166 = arith.mulf %165, %cst_70 : f32
    %167 = vector.broadcast %160 : f32 to vector<64x256xf32>
    %168 = arith.subf %155, %167 : vector<64x256xf32>
    %169 = arith.mulf %160, %160 : f32
    %170 = arith.subf %166, %169 : f32
    %cst_71 = arith.constant 9.99999974E-6 : f32
    %171 = arith.addf %170, %cst_71 : f32
    %172 = math.rsqrt %171 : f32
    %173 = vector.broadcast %172 : f32 to vector<64x256xf32>
    %174 = arith.mulf %168, %173 : vector<64x256xf32>
    %175 = arith.truncf %174 : vector<64x256xf32> to vector<64x256xbf16>
    %c0_72 = arith.constant 0 : index
    %c0_73 = arith.constant 0 : index
    %c0_74 = arith.constant 0 : index
    %176 = vector.load %arg14[%c0_72, %c0_73, %c0_74] : memref<1x128x64xbf16, #tpu.memory_space<vmem>>, vector<1x128x64xbf16>
    %177 = vector.shape_cast %176 : vector<1x128x64xbf16> to vector<128x64xbf16>
    %cst_75 = arith.constant dense<0.000000e+00> : vector<128x256xf32>
    %178 = tpu.matmul %177, %175, %cst_75 {dimension_numbers = #tpu.dot_dimension_numbers<[1], [0], [0], [1], [0, 0, 1, 1], [], []>} : vector<128x64xbf16>, vector<64x256xbf16>, vector<128x256xf32> -> vector<128x256xf32>
    %c0_76 = arith.constant 0 : index
    %c0_77 = arith.constant 0 : index
    %c0_78 = arith.constant 0 : index
    %179 = vector.load %arg15[%c0_76, %c0_77, %c0_78] : memref<1x128x1xf32, #tpu.memory_space<vmem>>, vector<1x128x1xf32>
    %180 = vector.shape_cast %179 : vector<1x128x1xf32> to vector<128x1xf32>
    %181 = vector.broadcast %180 : vector<128x1xf32> to vector<128x256xf32>
    %182 = arith.addf %178, %181 : vector<128x256xf32>
    %183 = arith.negf %182 : vector<128x256xf32>
    %184 = math.exp %183 : vector<128x256xf32>
    %cst_79 = arith.constant 1.000000e+00 : f32
    %185 = vector.broadcast %cst_79 : f32 to vector<128x256xf32>
    %186 = arith.addf %185, %184 : vector<128x256xf32>
    %187 = arith.divf %185, %186 : vector<128x256xf32>
    %188 = arith.mulf %182, %187 : vector<128x256xf32>
    %c0_80 = arith.constant 0 : index
    %c0_81 = arith.constant 0 : index
    %c0_82 = arith.constant 0 : index
    %189 = vector.load %arg16[%c0_80, %c0_81, %c0_82] : memref<1x64x128xbf16, #tpu.memory_space<vmem>>, vector<1x64x128xbf16>
    %190 = vector.shape_cast %189 : vector<1x64x128xbf16> to vector<64x128xbf16>
    %191 = arith.truncf %188 : vector<128x256xf32> to vector<128x256xbf16>
    %cst_83 = arith.constant dense<0.000000e+00> : vector<64x256xf32>
    %192 = tpu.matmul %190, %191, %cst_83 {dimension_numbers = #tpu.dot_dimension_numbers<[1], [0], [0], [1], [0, 0, 1, 1], [], []>} : vector<64x128xbf16>, vector<128x256xbf16>, vector<64x256xf32> -> vector<64x256xf32>
    %c0_84 = arith.constant 0 : index
    %c0_85 = arith.constant 0 : index
    %c0_86 = arith.constant 0 : index
    %193 = vector.load %arg17[%c0_84, %c0_85, %c0_86] : memref<1x64x1xf32, #tpu.memory_space<vmem>>, vector<1x64x1xf32>
    %194 = vector.shape_cast %193 : vector<1x64x1xf32> to vector<64x1xf32>
    %195 = vector.broadcast %194 : vector<64x1xf32> to vector<64x256xf32>
    %196 = arith.addf %192, %195 : vector<64x256xf32>
    %197 = arith.addf %155, %196 : vector<64x256xf32>
    %198 = vector.shape_cast %197 : vector<64x256xf32> to vector<1x64x256xf32>
    %cst_87 = arith.constant dense<0.000000e+00> : vector<1xf32>
    %199 = vector.multi_reduction <add>, %198, %cst_87 [1, 2] : vector<1x64x256xf32> to vector<1xf32>
    %200 = vector.shape_cast %199 : vector<1xf32> to vector<1x1x1xf32>
    %201 = vector.extract %200[0, 0, 0] : f32 from vector<1x1x1xf32>
    %cst_88 = arith.constant 6.10351563E-5 : f32
    %202 = arith.mulf %201, %cst_88 : f32
    %203 = arith.mulf %197, %197 : vector<64x256xf32>
    %204 = vector.shape_cast %203 : vector<64x256xf32> to vector<1x64x256xf32>
    %cst_89 = arith.constant dense<0.000000e+00> : vector<1xf32>
    %205 = vector.multi_reduction <add>, %204, %cst_89 [1, 2] : vector<1x64x256xf32> to vector<1xf32>
    %206 = vector.shape_cast %205 : vector<1xf32> to vector<1x1x1xf32>
    %207 = vector.extract %206[0, 0, 0] : f32 from vector<1x1x1xf32>
    %cst_90 = arith.constant 6.10351563E-5 : f32
    %208 = arith.mulf %207, %cst_90 : f32
    %209 = vector.broadcast %202 : f32 to vector<64x256xf32>
    %210 = arith.subf %197, %209 : vector<64x256xf32>
    %211 = arith.mulf %202, %202 : f32
    %212 = arith.subf %208, %211 : f32
    %cst_91 = arith.constant 9.99999974E-6 : f32
    %213 = arith.addf %212, %cst_91 : f32
    %214 = math.rsqrt %213 : f32
    %215 = vector.broadcast %214 : f32 to vector<64x256xf32>
    %216 = arith.mulf %210, %215 : vector<64x256xf32>
    %c0_92 = arith.constant 0 : index
    %c0_93 = arith.constant 0 : index
    %217 = vector.load %arg18[%c0_92, %c0_93] : memref<8x64xbf16, #tpu.memory_space<vmem>>, vector<8x64xbf16>
    %218 = arith.truncf %216 : vector<64x256xf32> to vector<64x256xbf16>
    %cst_94 = arith.constant dense<0.000000e+00> : vector<8x256xf32>
    %219 = tpu.matmul %217, %218, %cst_94 {dimension_numbers = #tpu.dot_dimension_numbers<[1], [0], [0], [1], [0, 0, 1, 1], [], []>} : vector<8x64xbf16>, vector<64x256xbf16>, vector<8x256xf32> -> vector<8x256xf32>
    %c0_95 = arith.constant 0 : index
    %c0_96 = arith.constant 0 : index
    %220 = vector.load %arg19[%c0_95, %c0_96] : memref<8x1xf32, #tpu.memory_space<vmem>>, vector<8x1xf32>
    %221 = vector.broadcast %220 : vector<8x1xf32> to vector<8x256xf32>
    %222 = arith.addf %219, %221 : vector<8x256xf32>
    %223 = arith.addf %222, %1 : vector<8x256xf32>
    %c0_97 = arith.constant 0 : index
    %c0_98 = arith.constant 0 : index
    %c0_99 = arith.constant 0 : index
    %224 = vector.load %arg20[%c0_97, %c0_98, %c0_99] : memref<1x8x256xf32, #tpu.memory_space<vmem>>, vector<1x8x256xf32>
    %225 = vector.shape_cast %224 : vector<1x8x256xf32> to vector<8x256xf32>
    %226 = vector.shape_cast %223 : vector<8x256xf32> to vector<1x8x256xf32>
    tpu.vector_store %arg20[%c0_97, %c0_98, %c0_99], %226 {strides = array<i32>} : memref<1x8x256xf32, #tpu.memory_space<vmem>>, vector<1x8x256xf32>,
    return
  }
  func.func @transform_0(%arg0: i32) -> (i32, i32, i32) {
    %c0_i32 = arith.constant 0 : i32
    %c0_i32_0 = arith.constant 0 : i32
    %c0_i32_1 = arith.constant 0 : i32
    return %arg0, %c0_i32, %c0_i32_0 : i32, i32, i32
  }
  func.func @transform_1(%arg0: i32) -> (i32, i32) {
    %c0_i32 = arith.constant 0 : i32
    %c0_i32_0 = arith.constant 0 : i32
    %c0_i32_1 = arith.constant 0 : i32
    return %c0_i32, %c0_i32_0 : i32, i32
  }
  func.func @transform_2(%arg0: i32) -> (i32, i32) {
    %c0_i32 = arith.constant 0 : i32
    %c0_i32_0 = arith.constant 0 : i32
    %c0_i32_1 = arith.constant 0 : i32
    return %c0_i32, %c0_i32_0 : i32, i32
  }
  func.func @transform_3(%arg0: i32) -> (i32, i32) {
    %c0_i32 = arith.constant 0 : i32
    %c0_i32_0 = arith.constant 0 : i32
    %c0_i32_1 = arith.constant 0 : i32
    return %c0_i32, %c0_i32_0 : i32, i32
  }
  func.func @transform_4(%arg0: i32) -> (i32, i32) {
    %c0_i32 = arith.constant 0 : i32
    %c0_i32_0 = arith.constant 0 : i32
    %c0_i32_1 = arith.constant 0 : i32
    return %c0_i32, %c0_i32_0 : i32, i32
  }
  func.func @transform_5(%arg0: i32) -> (i32, i32) {
    %c0_i32 = arith.constant 0 : i32
    %c0_i32_0 = arith.constant 0 : i32
    %c0_i32_1 = arith.constant 0 : i32
    return %c0_i32, %c0_i32_0 : i32, i32
  }
  func.func @transform_6(%arg0: i32) -> (i32, i32) {
    %c0_i32 = arith.constant 0 : i32
    %c0_i32_0 = arith.constant 0 : i32
    %c0_i32_1 = arith.constant 0 : i32
    return %c0_i32, %c0_i32_0 : i32, i32
  }
  func.func @transform_7(%arg0: i32) -> (i32, i32) {
    %c0_i32 = arith.constant 0 : i32
    %c0_i32_0 = arith.constant 0 : i32
    %c0_i32_1 = arith.constant 0 : i32
    return %c0_i32, %c0_i32_0 : i32, i32
  }
  func.func @transform_8(%arg0: i32) -> (i32, i32) {
    %c0_i32 = arith.constant 0 : i32
    %c0_i32_0 = arith.constant 0 : i32
    %c0_i32_1 = arith.constant 0 : i32
    return %c0_i32, %c0_i32_0 : i32, i32
  }
  func.func @transform_9(%arg0: i32) -> (i32, i32, i32) {
    %c0_i32 = arith.constant 0 : i32
    %c0_i32_0 = arith.constant 0 : i32
    %c0_i32_1 = arith.constant 0 : i32
    %c0_i32_2 = arith.constant 0 : i32
    return %c0_i32, %c0_i32_0, %c0_i32_1 : i32, i32, i32
  }
  func.func @transform_10(%arg0: i32) -> (i32, i32, i32) {
    %c0_i32 = arith.constant 0 : i32
    %c0_i32_0 = arith.constant 0 : i32
    %c0_i32_1 = arith.constant 0 : i32
    %c0_i32_2 = arith.constant 0 : i32
    return %c0_i32, %c0_i32_0, %c0_i32_1 : i32, i32, i32
  }
  func.func @transform_11(%arg0: i32) -> (i32, i32, i32) {
    %c0_i32 = arith.constant 0 : i32
    %c0_i32_0 = arith.constant 0 : i32
    %c0_i32_1 = arith.constant 0 : i32
    %c0_i32_2 = arith.constant 0 : i32
    return %c0_i32, %c0_i32_0, %c0_i32_1 : i32, i32, i32
  }
  func.func @transform_12(%arg0: i32) -> (i32, i32, i32) {
    %c0_i32 = arith.constant 0 : i32
    %c0_i32_0 = arith.constant 0 : i32
    %c0_i32_1 = arith.constant 0 : i32
    %c0_i32_2 = arith.constant 0 : i32
    return %c0_i32, %c0_i32_0, %c0_i32_1 : i32, i32, i32
  }
  func.func @transform_13(%arg0: i32) -> (i32, i32, i32) {
    %c0_i32 = arith.constant 0 : i32
    %c0_i32_0 = arith.constant 0 : i32
    %c0_i32_1 = arith.constant 0 : i32
    %c0_i32_2 = arith.constant 0 : i32
    return %c0_i32, %c0_i32_0, %c0_i32_1 : i32, i32, i32
  }
  func.func @transform_14(%arg0: i32) -> (i32, i32, i32) {
    %c0_i32 = arith.constant 0 : i32
    %c0_i32_0 = arith.constant 0 : i32
    %c0_i32_1 = arith.constant 0 : i32
    %c0_i32_2 = arith.constant 0 : i32
    return %c0_i32, %c0_i32_0, %c0_i32_1 : i32, i32, i32
  }
  func.func @transform_15(%arg0: i32) -> (i32, i32, i32) {
    %c0_i32 = arith.constant 0 : i32
    %c0_i32_0 = arith.constant 0 : i32
    %c0_i32_1 = arith.constant 0 : i32
    %c0_i32_2 = arith.constant 0 : i32
    return %c0_i32, %c0_i32_0, %c0_i32_1 : i32, i32, i32
  }
  func.func @transform_16(%arg0: i32) -> (i32, i32, i32) {
    %c0_i32 = arith.constant 0 : i32
    %c0_i32_0 = arith.constant 0 : i32
    %c0_i32_1 = arith.constant 0 : i32
    %c0_i32_2 = arith.constant 0 : i32
    return %c0_i32, %c0_i32_0, %c0_i32_1 : i32, i32, i32
  }
  func.func @transform_17(%arg0: i32) -> (i32, i32) {
    %c0_i32 = arith.constant 0 : i32
    %c0_i32_0 = arith.constant 0 : i32
    %c0_i32_1 = arith.constant 0 : i32
    return %c0_i32, %c0_i32_0 : i32, i32
  }
  func.func @transform_18(%arg0: i32) -> (i32, i32) {
    %c0_i32 = arith.constant 0 : i32
    %c0_i32_0 = arith.constant 0 : i32
    %c0_i32_1 = arith.constant 0 : i32
    return %c0_i32, %c0_i32_0 : i32, i32
  }
  func.func @transform_19(%arg0: i32) -> (i32, i32, i32) {
    %c0_i32 = arith.constant 0 : i32
    %c0_i32_0 = arith.constant 0 : i32
    %c0_i32_1 = arith.constant 0 : i32
    return %arg0, %c0_i32, %c0_i32_0 : i32, i32, i32
  }
}

</mosaic_0001>

<bundles_post_ra>
// kernel: tpu_custom_call.1
= control target key start
LH: loop header
LB: loop body
LE: loop exit
PB: predicated region body
PF: predicated region fallthrough
CT: control target
= control target key end

     0   :  { %s5941_s0 = inlined_call_operand.vmem [shape: f32[2,8,256], index: 0, kind: input, shape index: {}]   ;;  %s5942_s1 = inlined_call_operand.vmem [shape: f32[4,256], index: 1, kind: input, shape index: {}]   ;;  %s5943_s2 = inlined_call_operand.vmem [shape: f32[256,4], index: 2, kind: input, shape index: {}]   ;;  %s5944_s3 = inlined_call_operand.vmem [shape: f32[9,256], index: 3, kind: input, shape index: {}]   ;;  %s5945_s4 = inlined_call_operand.vmem [shape: bf16[8,8], index: 4, kind: input, shape index: {}]   ;;  %s5946_s5 = inlined_call_operand.vmem [shape: f32[8,9], index: 5, kind: input, shape index: {}]   ;;  %s5947_s6 = inlined_call_operand.vmem [shape: f32[8,1], index: 6, kind: input, shape index: {}]   ;;  %s5948_s7 = inlined_call_operand.vmem [shape: f32[8,1], index: 7, kind: input, shape index: {}]   ;;  %s5949_s8 = inlined_call_operand.vmem [shape: bf16[64,8], index: 8, kind: input, shape index: {}]   ;;  %s5950_s9 = inlined_call_operand.vmem [shape: bf16[1,384,64], index: 9, kind: input, shape index: {}]   ;;  %s5951_s10 = inlined_call_operand.vmem [shape: f32[1,384,1], index: 10, kind: input, shape index: {}]   ;;  %s5952_s11 = inlined_call_operand.vmem [shape: bf16[1,64,128], index: 11, kind: input, shape index: {}]   ;;  %s5953_s12 = inlined_call_operand.vmem [shape: f32[1,64,1], index: 12, kind: input, shape index: {}]   ;;  %s5954_s13 = inlined_call_operand.vmem [shape: bf16[1,128,64], index: 13, kind: input, shape index: {}]   ;;  %s5955_s14 = inlined_call_operand.vmem [shape: f32[1,128,1], index: 14, kind: input, shape index: {}]   ;;  %s5956_s15 = inlined_call_operand.vmem [shape: bf16[1,64,128], index: 15, kind: input, shape index: {}]   ;;  %s5957_s16 = inlined_call_operand.vmem [shape: f32[1,64,1], index: 16, kind: input, shape index: {}]   ;;  %s5958_s17 = inlined_call_operand.vmem [shape: bf16[8,64], index: 17, kind: input, shape index: {}]   ;;  %s5959_s18 = inlined_call_operand.vmem [shape: f32[8,1], index: 18, kind: input, shape index: {}]   ;;  %s5960_s19 = inlined_call_operand.hbm [shape: f32[2,8,256], index: 19, kind: output, shape index: {}]  }
   0x1   :  { %5982 = sst [smem:[#allocation47_spill]] %s5941_s0 }
   0x2   :  { %5983 = sst [smem:[#allocation48_spill]] %s5942_s1 }
   0x3   :  { %5984 = sst [smem:[#allocation49_spill]] %s5943_s2 }
   0x4   :  { %5985 = sst [smem:[#allocation50_spill]] %s5944_s3 }
   0x5   :  { %5986 = sst [smem:[#allocation51_spill]] %s5946_s5 }
   0x6   :  { %5987 = sst [smem:[#allocation52_spill]] %s5947_s6 }
   0x7   :  { %5988 = sst [smem:[#allocation53_spill]] %s5948_s7 }
   0x8   :  { %5989 = sst [smem:[#allocation54_spill]] %s5949_s8 }
   0x9   :  { %24 = vsyncpa [#allocation3], 0 }
   0xa   :  { %26 = vsyncpa [#allocation3 + $0x1], 0  ;;  %s4457_s28 = smov 0   ;;  %s4459_s0 = smov 0  }
   0xb   :  { %s4461_s29 = smov 0   ;;  %s4463_s30 = smov 0  }
   0xc LB: > { %s4478_s20 = sadd.s32 4294967295, %s4335_s30   ;;  %s3722_s1 = sadd.s32 4294967294, %s4335_s30   ;;  %s4335_s30 = sphi %s4463_s30, %s6088_s30   ;;  %s4331_s29 = sphi %s4461_s29, %s6087_s29   ;;  %s4327_s0 = sphi %s4459_s0, %s6086_s0   ;;  %s4323_s28 = sphi %s4457_s28, %s6085_s28  }
   0xd   : > { %s4482_s21 = sadd.s32 1, %s4335_s30   ;;  %s443_s2 = sadd.s32 1, %s4331_s29 }
   0xe   : > { %s440_s22 = ssub.s32 %s4335_s30, %s4482_s21  ;;  %p453_p0 = scmp.ne.s32.totalorder %s4331_s29, %s4327_s0 }
   0xf   : > { %p441_p1 = scmp.eq.s32.totalorder %s440_s22, 0  ;;  %p454_p2 = scmp.eq.s32.totalorder %s4478_s20, 1 }
  0x10   : > { %p459_p3 = scmp.ne.s32.totalorder %s4327_s0, %s4323_s28  ;;  %p460_p4 = scmp.eq.s32.totalorder %s3722_s1, 1 }
  0x11   : > { %s4493_s23 = scalar_select %p441_p1, %s4331_s29, %s443_s2  }
  0x12   : > { %p4495_p5 = por %p454_p2, %p453_p0  ;;  %p4499_p6 = por %p460_p4, %p459_p3 }
  0x13   : > { %5990 = sst [smem:[#allocation5_spill]] %s4493_s23  ;;  %p3725_p7 = scmp.ge.s32.totalorder %s4335_s30, 1 }
  0x14   : > { %p540_p8 = scmp.lt.s32.totalorder %s4335_s30, 3 }
  0x16   : > { %p541_p9 = pnand %p3725_p7, %p540_p8 }
  0x18   : > { %544 = sbr.rel (%p541_p9) target bundleno = 3656 (0xe48), region = 96 }
  0x1f   : > { %s5993_s5 = sld [smem:[#allocation51_spill]]  ;;  %p596_p10 = scmp.lt.s32.totalorder %s4478_s20, 1  ;;  %v4337_v1 = vmov 1   ;;  %v4338_v2 = vmov 4   ;;  %v5964_v3 = vmov 0   ;;  %v4341_v6 = vmov 2  }
  0x20   : > { %4067 = vset.pattern.permute.xlu1 %v4337_v1  ;;  %4065 = vset.pattern.permute.xlu0 %v4338_v2  ;;  %s5994_s22 = sld [smem:[#allocation47_spill]]  ;;  %s4340_s26 = smov 17   ;;  %v4343_v7 = vmov 3   ;;  %v4344_v8 = vmov 5   ;;  %v4346_v9 = vmov 6   ;;  %v4348_v10 = vmov 7  }
  0x21   : > { %s597_s27 = scalar_select %p596_p10, %s4478_s20, 1  ;;  %965 = vmatprep.mubr.bf16.mxu0 %v5964_v3  ;;  %1699 = vmatprep.mubr.bf16.mxu1 %v5964_v3  ;;  %v4349_v11 = vmov 8   ;;  %v616_v24 = vlaneseq  ;;  %vm926_vm8 = vcmask 1043456   ;;  %vm913_vm9 = vcmask 64512  }
  0x22   : > { %s4347_s1 = smov 1   ;;  %s4350_s2 = smov 127   ;;  %vm1594_vm10 = vcmask 523264   ;;  %vm2204_vm12 = vcmask 31744  }
  0x23   : > { %s3875_s4 = sshll.u32 %s597_s27, 4  ;;  %s4342_s27 = smov 16   ;;  %v4550_v26 = vshrl.u32 %v616_v24, 7  ;;  %v4554_v28 = vand.u32 127, %v616_v24 }
  0x24   : > { %s5995_s6 = sld [smem:[#allocation52_spill]]  ;;  %s5996_s7 = sld [smem:[#allocation53_spill]] }
  0x25   : > { %v604_v0 = vld [vmem:[%s5993_s5] sm:$0xff]  ;;  %v4557_v30 = vsub.s32 0, %v4550_v26  ;;  %v4560_v31 = vsub.s32 1, %v4550_v26  ;;  %vm618_vm0 = vcmp.lt.s32.totalorder %v4554_v28, 17  ;;  %vm647_vm1 = vcmp.lt.s32.totalorder %v4554_v28, 16  ;;  %s5998_s8 = sld [smem:[#allocation54_spill]] }
  0x26   : > { %666 = vperm.xlu1 %4067, %v604_v0   ;;  %607 = vperm.xlu0 %4065, %v604_v0   ;;  %s4515_s25 = scalar_lea.vmem %s5994_s22, %s3875_s4  ;;  %s4345_s4 = smov 15   ;;  %vm677_vm2 = vcmp.lt.s32.totalorder %v4554_v28, 15  ;;  %vm707_vm3 = vcmp.lt.s32.totalorder %v4554_v28, 1  ;;  %vm737_vm4 = vcmp.lt.s32.totalorder %v4554_v28, 127  ;;  %vm767_vm5 = vcmp.lt.s32.totalorder %v4554_v28, 113 }
  0x27   : > { %v4518_v4 = vld [vmem:[%s4515_s25] sm:$0xff]  ;;  %v4524_v5 = vld [vmem:[%s4515_s25 + $0x8] sm:$0xff]  ;;  %s4351_s22 = smov 111   ;;  %vm797_vm6 = vcmp.lt.s32.totalorder %v4554_v28, 112  ;;  %vm827_vm7 = vcmp.lt.s32.totalorder %v4554_v28, 111 }
  0x2a   : > { %4066 = vset.pattern.permute.xlu0 %v5964_v3  ;;  %4075 = vset.pattern.permute.xlu1 %v5964_v3  ;;  %v853_v12 = vld [vmem:[%s5995_s6] sm:$0xff] }
  0x2b   : > { %612 = vrot.lane.b32.xlu1 %v4518_v4, %s4340_s26  ;;  %636 = vperm.xlu0 %4066, %v604_v0   ;;  %v861_v13 = vld [vmem:[%s5996_s7] sm:$0xff] }
  0x2f   : > { %614 = vrot.lane.b32.xlu1 %v4524_v5, %s4340_s26  ;;  %4068 = vset.pattern.permute.xlu0 %v4341_v6 }
  0x30   : > { %696 = vperm.xlu0 %4068, %v604_v0  }
  0x33   : > { %643 = vrot.lane.b32.xlu1 %v4518_v4, %s4342_s27 }
  0x34   : > { %4069 = vset.pattern.permute.xlu0 %v4343_v7 }
  0x35   : > { %726 = vperm.xlu0 %4069, %v604_v0  }
  0x37   : > { %645 = vrot.lane.b32.xlu1 %v4524_v5, %s4342_s27 }
  0x39   : > { %4070 = vset.pattern.permute.xlu0 %v4344_v8 }
  0x3a   : > { %756 = vperm.xlu0 %4070, %v604_v0  }
  0x3b   : > { %673 = vrot.lane.b32.xlu1 %v4518_v4, %s4345_s4 }
  0x3e   : > { %4071 = vset.pattern.permute.xlu0 %v4346_v9 }
  0x3f   : > { %675 = vrot.lane.b32.xlu1 %v4524_v5, %s4345_s4  ;;  %786 = vperm.xlu0 %4071, %v604_v0   ;;  %s4352_s4 = smov 113  }
  0x43   : > { %703 = vrot.lane.b32.xlu1 %v4518_v4, %s4347_s1  ;;  %4072 = vset.pattern.permute.xlu0 %v4348_v10 }
  0x44   : > { %816 = vperm.xlu0 %4072, %v604_v0  }
  0x47   : > { %705 = vrot.lane.b32.xlu1 %v4524_v5, %s4347_s1  ;;  %s4353_s1 = smov 112  }
  0x48   : > { %4073 = vset.pattern.permute.xlu0 %v4349_v11 }
  0x49   : > { %846 = vperm.xlu0 %4073, %v604_v0  }
  0x4b   : > { %733 = vrot.lane.b32.xlu1 %v4518_v4, %s4350_s2 }
  0x4d   : > { %823 = vrot.lane.b32.xlu0 %v4518_v4, %s4351_s22 }
  0x4e   : > { %4074 = vset.pattern.permute.xlu0 %v5964_v3 }
  0x4f   : > { %735 = vrot.lane.b32.xlu1 %v4524_v5, %s4350_s2  ;;  %s5997_s2 = sld [smem:[#allocation50_spill]] }
  0x51   : > { %856 = vperm.xlu0 %4074, %v853_v12  }
  0x53   : > { %763 = vrot.lane.b32.xlu1 %v4518_v4, %s4352_s4 }
  0x55   : > { %v621_v32 = vld [vmem:[%s5997_s2] ss:$8 sm:$0x3]  ;;  %v3729_v35 = vld [vmem:[%s5997_s2 + $0x1] ss:$8 sm:$0x3] }
  0x56   : > { %v626_v36 = vrot.slane %v621_v32, %v4557_v30  ;;  %v630_v37 = vrot.slane %v621_v32, %v4560_v31  ;;  %v656_v40 = vrot.slane %v3729_v35, %v4557_v30  ;;  %v660_v41 = vrot.slane %v3729_v35, %v4560_v31  ;;  %v3730_v42 = vld [vmem:[%s5997_s2 + $0x2] ss:$8 sm:$0x3]  ;;  %v3731_v43 = vld [vmem:[%s5997_s2 + $0x3] ss:$8 sm:$0x3] }
  0x57   : > { %765 = vrot.lane.b32.xlu1 %v4524_v5, %s4352_s4  ;;  %v686_v50 = vrot.slane %v3730_v42, %v4557_v30  ;;  %v690_v51 = vrot.slane %v3730_v42, %v4560_v31  ;;  %v716_v52 = vrot.slane %v3731_v43, %v4557_v30  ;;  %v3732_v57 = vld [vmem:[%s5997_s2 + $0x5] ss:$8 sm:$0x3]  ;;  %v720_v61 = vrot.slane %v3731_v43, %v4560_v31  ;;  %v3733_v8 = vld [vmem:[%s5997_s2 + $0x6] ss:$8 sm:$0x3] }
  0x58   : > { %v746_v7 = vrot.slane %v3732_v57, %v4557_v30 }
  0x5b   : > { %793 = vrot.lane.b32.xlu1 %v4518_v4, %s4353_s1 }
  0x5f   : > { %795 = vrot.lane.b32.xlu1 %v4524_v5, %s4353_s1 }
  0x63   : > { %825 = vrot.lane.b32.xlu1 %v4524_v5, %s4351_s22 }
  0x67   : > { %864 = vperm.xlu1 %4075, %v861_v13  }
  0xa5   : > { %v667_v14 = vpop.permute.xlu1 %666  ;;  %v608_v18 = vpop.permute.xlu0 %607 }
  0xa6   : > { %v610_v59 = vmul.f32 %v608_v18, %v4518_v4  ;;  %v611_v60 = vmul.f32 %v608_v18, %v4524_v5  ;;  %v750_v5 = vrot.slane %v3732_v57, %v4560_v31 }
  0xa9   : > { %v613_v15 = vpop.permute.xlu1 %612 }
  0xaa   : > { %v637_v20 = vpop.permute.xlu0 %636 }
  0xad   : > { %v615_v16 = vpop.permute.xlu1 %614 }
  0xae   : > { %v619_v38 = vsel %vm618_vm0, %v613_v15, %v615_v16  ;;  %v620_v39 = vsel %vm618_vm0, %v615_v16, %v613_v15 }
  0xaf   : > { %v4548_v23 = vpop.permute.xlu0 %696  ;;  %v633_v47 = vmul.f32 %v626_v36, %v620_v39  ;;  %v634_v48 = vmul.f32 %v630_v37, %v619_v38 }
  0xb1   : > { %v644_v17 = vpop.permute.xlu1 %643  ;;  %v639_v62 = vmul.f32 %v637_v20, %v633_v47  ;;  %v640_v63 = vmul.f32 %v637_v20, %v634_v48 }
  0xb3   : > { %v642_v18 = vadd.f32 %v640_v63, %v611_v60 }
  0xb4   : > { %v4552_v27 = vpop.permute.xlu0 %726 }
  0xb5   : > { %v646_v19 = vpop.permute.xlu1 %645 }
  0xb6   : > { %v648_v45 = vsel %vm647_vm1, %v644_v17, %v646_v19  ;;  %v649_v46 = vsel %vm647_vm1, %v646_v19, %v644_v17  ;;  %v641_v17 = vadd.f32 %v639_v62, %v610_v59  ;;  %v776_v19 = vrot.slane %v3733_v8, %v4557_v30 }
  0xb7   : > { %v663_v53 = vmul.f32 %v656_v40, %v649_v46  ;;  %v664_v54 = vmul.f32 %v660_v41, %v648_v45 }
  0xb9   : > { %v674_v21 = vpop.permute.xlu1 %673  ;;  %v4566_v33 = vpop.permute.xlu0 %756  ;;  %v669_v9 = vmul.f32 %v667_v14, %v663_v53  ;;  %v670_v4 = vmul.f32 %v667_v14, %v664_v54  ;;  %v780_v14 = vrot.slane %v3733_v8, %v4560_v31 }
  0xbb   : > { %v672_v36 = vadd.f32 %v670_v4, %v642_v18 }
  0xbd   : > { %v676_v22 = vpop.permute.xlu1 %675 }
  0xbe   : > { %v4583_v49 = vpop.permute.xlu0 %786  ;;  %v678_v55 = vsel %vm677_vm2, %v674_v21, %v676_v22  ;;  %v679_v56 = vsel %vm677_vm2, %v676_v22, %v674_v21 }
  0xbf   : > { %v693_v2 = vmul.f32 %v686_v50, %v679_v56  ;;  %v694_v6 = vmul.f32 %v690_v51, %v678_v55 }
  0xc1   : > { %v704_v25 = vpop.permute.xlu1 %703  ;;  %v699_v20 = vmul.f32 %v4548_v23, %v693_v2  ;;  %v700_v21 = vmul.f32 %v4548_v23, %v694_v6  ;;  %v3735_v23 = vld [vmem:[%s5997_s2 + $0x10] ss:$8 sm:$0x3] }
  0xc2   : > { %v836_v48 = vrot.slane %v3735_v23, %v4557_v30  ;;  %v840_v50 = vrot.slane %v3735_v23, %v4560_v31  ;;  %v4079_v23 = vld [vmem:[%s5998_s8 + $0x18] sm:$0xff]  }
  0xc3   : > { %v817_v10 = vpop.permute.xlu0 %816  ;;  %v702_v45 = vadd.f32 %v700_v21, %v672_v36  ;;  %v4076_v36 = vld [vmem:[%s5998_s8] sm:$0xff]  }
  0xc5   : > { %v706_v29 = vpop.permute.xlu1 %705 }
  0xc6   : > { %v708_v0 = vsel %vm707_vm3, %v704_v25, %v706_v29  ;;  %v709_v1 = vsel %vm707_vm3, %v706_v29, %v704_v25  ;;  %v3734_v25 = vld [vmem:[%s5997_s2 + $0x7] ss:$8 sm:$0x3] }
  0xc7   : > { %v723_v12 = vmul.f32 %v716_v52, %v709_v1  ;;  %v724_v13 = vmul.f32 %v720_v61, %v708_v0  ;;  %v806_v42 = vrot.slane %v3734_v25, %v4557_v30  ;;  %v810_v43 = vrot.slane %v3734_v25, %v4560_v31 }
  0xc8   : > { %v847_v39 = vpop.permute.xlu0 %846 }
  0xc9   : > { %v734_v34 = vpop.permute.xlu1 %733  ;;  %v729_v37 = vmul.f32 %v4552_v27, %v723_v12  ;;  %v730_v38 = vmul.f32 %v4552_v27, %v724_v13 }
  0xcb   : > { %v732_v52 = vadd.f32 %v730_v38, %v702_v45  ;;  %v4078_v38 = vld [vmem:[%s5998_s8 + $0x10] sm:$0xff]  }
  0xcc   : > { %v824_v60 = vpop.permute.xlu0 %823 }
  0xcd   : > { %v736_v44 = vpop.permute.xlu1 %735 }
  0xce   : > { %v738_v15 = vsel %vm737_vm4, %v734_v34, %v736_v44  ;;  %v739_v16 = vsel %vm737_vm4, %v736_v44, %v734_v34  ;;  %v671_v34 = vadd.f32 %v669_v9, %v641_v17 }
  0xcf   : > { %v753_v29 = vmul.f32 %v746_v7, %v738_v15  ;;  %v754_v32 = vmul.f32 %v750_v5, %v739_v16 }
  0xd0   : > { %v701_v44 = vadd.f32 %v699_v20, %v671_v34  ;;  %v857_v5 = vpop.permute.xlu0 %856 }
  0xd1   : > { %v764_v58 = vpop.permute.xlu1 %763  ;;  %v759_v46 = vmul.f32 %v4566_v33, %v753_v29  ;;  %v760_v47 = vmul.f32 %v4566_v33, %v754_v32 }
  0xd2   : > { %v731_v51 = vadd.f32 %v729_v37, %v701_v44  ;;  %v4077_v37 = vld [vmem:[%s5998_s8 + $0x8] sm:$0xff]  }
  0xd3   : > { %v762_v59 = vadd.f32 %v760_v47, %v732_v52 }
  0xd4   : > { %v761_v33 = vadd.f32 %v759_v46, %v731_v51 }
  0xd5   : > { %v766_v11 = vpop.permute.xlu1 %765 }
  0xd6   : > { %v768_v22 = vsel %vm767_vm5, %v764_v58, %v766_v11  ;;  %v769_v24 = vsel %vm767_vm5, %v766_v11, %v764_v58 }
  0xd7   : > { %v783_v40 = vmul.f32 %v776_v19, %v768_v22  ;;  %v784_v41 = vmul.f32 %v780_v14, %v769_v24 }
  0xd9   : > { %v794_v35 = vpop.permute.xlu1 %793  ;;  %v789_v55 = vmul.f32 %v4583_v49, %v783_v40  ;;  %v790_v56 = vmul.f32 %v4583_v49, %v784_v41 }
  0xdb   : > { %v791_v1 = vadd.f32 %v789_v55, %v761_v33  ;;  %v792_v2 = vadd.f32 %v790_v56, %v762_v59 }
  0xdd   : > { %v796_v27 = vpop.permute.xlu1 %795 }
  0xde   : > { %v798_v53 = vsel %vm797_vm6, %v794_v35, %v796_v27  ;;  %v799_v54 = vsel %vm797_vm6, %v796_v27, %v794_v35 }
  0xdf   : > { %v813_v57 = vmul.f32 %v806_v42, %v798_v53  ;;  %v814_v58 = vmul.f32 %v810_v43, %v799_v54 }
  0xe1   : > { %v819_v61 = vmul.f32 %v817_v10, %v813_v57  ;;  %v820_v62 = vmul.f32 %v817_v10, %v814_v58  ;;  %v826_v31 = vpop.permute.xlu1 %825 }
  0xe2   : > { %v828_v63 = vsel %vm827_vm7, %v824_v60, %v826_v31  ;;  %v829_v0 = vsel %vm827_vm7, %v826_v31, %v824_v60 }
  0xe3   : > { %v843_v6 = vmul.f32 %v836_v48, %v828_v63  ;;  %v844_v7 = vmul.f32 %v840_v50, %v829_v0  ;;  %v821_v9 = vadd.f32 %v819_v61, %v791_v1  ;;  %v822_v4 = vadd.f32 %v820_v62, %v792_v2 }
  0xe5   : > { %v849_v8 = vmul.f32 %v847_v39, %v843_v6  ;;  %v850_v49 = vmul.f32 %v847_v39, %v844_v7 }
  0xe6   : > { %v865_v13 = vpop.permute.xlu1 %864 }
  0xe7   : > { %v851_v11 = vadd.f32 %v849_v8, %v821_v9  ;;  %v852_v12 = vadd.f32 %v850_v49, %v822_v4 }
  0xe9   : > { %v859_v10 = vmul.f32 %v857_v5, %v851_v11  ;;  %v860_v15 = vmul.f32 %v857_v5, %v852_v12 }
  0xeb   : > { %v867_v16 = vadd.f32 %v865_v13, %v859_v10  ;;  %v868_v17 = vadd.f32 %v865_v13, %v860_v15 }
  0xed   : > { %v3736_v18 = vmul.f32 -1.442695, %v867_v16  ;;  %v3737_v19 = vmul.f32 -1.442695, %v868_v17 }
  0xef   : > { %4121 = vpow2.f32 %v3736_v18 }
  0xf0   : > { %4123 = vpow2.f32 %v3737_v19 }
  0xf9   : > { %v4122_v28 = vpop.eup %4121 }
  0xfa   : > { %v4124_v14 = vpop.eup %4123  ;;  %v875_v20 = vadd.f32 1.0, %v4122_v28 }
  0xfb   : > { %v876_v21 = vadd.f32 1.0, %v4124_v14 }
  0xfc   : > { %4125 = vrcp.f32 %v875_v20 }
  0xfd   : > { %4127 = vrcp.f32 %v876_v21 }
 0x106   : > { %v4126_v22 = vpop.eup %4125 }
 0x107   : > { %v4128_v24 = vpop.eup %4127  ;;  %v881_v25 = vmul.f32 %v4126_v22, %v867_v16 }
 0x108   : > { %v882_v29 = vmul.f32 %v4128_v24, %v868_v17 }
 0x109   : > { %v891_v32 = vpack.c.bf16 %v881_v25, %v881_v25 }
 0x10a   : > { %v892_v35 = vpack.c.bf16 %v882_v29, %v882_v29 }
 0x10b   : > { %v928_v34 = vsel %vm926_vm8, %v891_v32, 0 }
 0x10c   : > { %3742 = vmatprep.subr.msk.bf16.mxu0 %vm926_vm8, %v892_v35 }
 0x10d   : > { %934 = vmatpush1.bf16.msra.mxu0 %v928_v34 }
 0x110   : > { %3743 = vmatmul.mubr.msk.bf16.vlgmr.msra.gmra.mrb[0].mxu0 %vm913_vm9, %v4076_v36 }
 0x111   : > { %975 = vmatprep.mubr.bf16.mxu0 %v5964_v3 }
 0x118   : > { %3744 = vmatmul.mubr.msk.bf16.gmra.mrb[4].mxu0 %vm913_vm9, %v4077_v37 }
 0x119   : > { %985 = vmatprep.mubr.bf16.mxu0 %v5964_v3 }
 0x120   : > { %3745 = vmatmul.mubr.msk.bf16.gmra.mrb[8].mxu0 %vm913_vm9, %v4078_v38 }
 0x121   : > { %995 = vmatprep.mubr.bf16.mxu0 %v5964_v3 }
 0x128   : > { %3746 = vmatmul.mubr.msk.bf16.gmra.mrb[12].mxu0 %vm913_vm9, %v4079_v23 }
 0x1e3   : > { %v4653_v39 = vpop.f32.mrb[0].mxu0 }
 0x1e4   : > { %5999 = vst [vmem:[#allocation6_spill] sm:$0xff] %v4653_v39  ;;  %v1064_v40 = vmul.f32 %v4653_v39, %v4653_v39  ;;  %v4657_v41 = vpop.f32.mrb[1].mxu0 }
 0x1e5   : > { %6000 = vst [vmem:[#allocation7_spill] sm:$0xff] %v4657_v41  ;;  %v1039_v42 = vadd.f32 %v4657_v41, %v4653_v39  ;;  %v1065_v43 = vmul.f32 %v4657_v41, %v4657_v41  ;;  %v4663_v44 = vpop.f32.mrb[2].mxu0 }
 0x1e6   : > { %6001 = vst [vmem:[#allocation8_spill] sm:$0xff] %v4663_v44  ;;  %v1066_v45 = vmul.f32 %v4663_v44, %v4663_v44  ;;  %v4667_v46 = vpop.f32.mrb[3].mxu0 }
 0x1e7   : > { %6002 = vst [vmem:[#allocation9_spill] sm:$0xff] %v4667_v46  ;;  %v1080_v47 = vadd.f32 %v1065_v43, %v1064_v40  ;;  %v1040_v27 = vadd.f32 %v1039_v42, %v4663_v44  ;;  %v1067_v51 = vmul.f32 %v4667_v46, %v4667_v46  ;;  %v1233_v42 = vld [vmem:[%s5951_s10 + $0x100] sm:$0xff]  ;;  %v1202_v43 = vld [vmem:[%s5951_s10 + $0x8] sm:$0xff] }
 0x1e9   : > { %v1081_v48 = vadd.f32 %v1080_v47, %v1066_v45  ;;  %v1041_v50 = vadd.f32 %v1040_v27, %v4667_v46  ;;  %v1203_v45 = vld [vmem:[%s5951_s10 + $0x10] sm:$0xff]  ;;  %v1205_v47 = vld [vmem:[%s5951_s10 + $0x20] sm:$0xff] }
 0x1ea   : > { %v1207_v27 = vld [vmem:[%s5951_s10 + $0x30] sm:$0xff] }
 0x1eb   : > { %v1082_v52 = vadd.f32 %v1081_v48, %v1067_v51  ;;  %v4673_v53 = vpop.f32.mrb[4].mxu0  ;;  %v1209_v48 = vld [vmem:[%s5951_s10 + $0x40] sm:$0xff] }
 0x1ec   : > { %6003 = vst [vmem:[#allocation10_spill] sm:$0xff] %v4673_v53  ;;  %v1042_v54 = vadd.f32 %v1041_v50, %v4673_v53  ;;  %v1068_v55 = vmul.f32 %v4673_v53, %v4673_v53  ;;  %v4678_v56 = vpop.f32.mrb[5].mxu0  ;;  %v1211_v50 = vld [vmem:[%s5951_s10 + $0x50] sm:$0xff]  ;;  %v1213_v51 = vld [vmem:[%s5951_s10 + $0x60] sm:$0xff] }
 0x1ed   : > { %6004 = vst [vmem:[#allocation11_spill] sm:$0xff] %v4678_v56  ;;  %v1069_v57 = vmul.f32 %v4678_v56, %v4678_v56  ;;  %v4682_v58 = vpop.f32.mrb[6].mxu0 }
 0x1ee   : > { %6005 = vst [vmem:[#allocation12_spill] sm:$0xff] %v4682_v58  ;;  %v1083_v33 = vadd.f32 %v1082_v52, %v1068_v55  ;;  %v1043_v59 = vadd.f32 %v1042_v54, %v4678_v56  ;;  %v4685_v60 = vpop.f32.mrb[7].mxu0  ;;  %v1070_v31 = vmul.f32 %v4682_v58, %v4682_v58  ;;  %v1215_v52 = vld [vmem:[%s5951_s10 + $0x70] sm:$0xff]  ;;  %v1217_v54 = vld [vmem:[%s5951_s10 + $0x80] sm:$0xff] }
 0x1ef   : > { %6006 = vst [vmem:[#allocation13_spill] sm:$0xff] %v4685_v60  ;;  %v1071_v1 = vmul.f32 %v4685_v60, %v4685_v60  ;;  %v1219_v55 = vld [vmem:[%s5951_s10 + $0x90] sm:$0xff] }
 0x1f0   : > { %v1084_v61 = vadd.f32 %v1083_v33, %v1069_v57  ;;  %v1044_v62 = vadd.f32 %v1043_v59, %v4682_v58  ;;  %v1221_v57 = vld [vmem:[%s5951_s10 + $0xa0] sm:$0xff]  ;;  %v1223_v33 = vld [vmem:[%s5951_s10 + $0xb0] sm:$0xff] }
 0x1f1   : > { %v1225_v59 = vld [vmem:[%s5951_s10 + $0xc0] sm:$0xff] }
 0x1f2   : > { %v1085_v63 = vadd.f32 %v1084_v61, %v1070_v31  ;;  %v1045_v0 = vadd.f32 %v1044_v62, %v4685_v60  ;;  %v1227_v61 = vld [vmem:[%s5951_s10 + $0xd0] sm:$0xff]  ;;  %v1229_v62 = vld [vmem:[%s5951_s10 + $0xe0] sm:$0xff] }
 0x1f3   : > { %v4693_v2 = vpop.f32.mrb[8].mxu0  ;;  %v1231_v31 = vld [vmem:[%s5951_s10 + $0xf0] sm:$0xff] }
 0x1f4   : > { %6007 = vst [vmem:[#allocation14_spill] sm:$0xff] %v4693_v2  ;;  %v1086_v6 = vadd.f32 %v1085_v63, %v1071_v1  ;;  %v1046_v7 = vadd.f32 %v1045_v0, %v4693_v2  ;;  %v1072_v8 = vmul.f32 %v4693_v2, %v4693_v2  ;;  %v4698_v49 = vpop.f32.mrb[9].mxu0  ;;  %v2506_v63 = vld [vmem:[%s5953_s12] sm:$0xff]  ;;  %v2508_v0 = vld [vmem:[%s5953_s12 + $0x10] sm:$0xff] }
 0x1f5   : > { %6008 = vst [vmem:[#allocation15_spill] sm:$0xff] %v4698_v49  ;;  %v1073_v9 = vmul.f32 %v4698_v49, %v4698_v49  ;;  %v4702_v4 = vpop.f32.mrb[10].mxu0  ;;  %v2510_v1 = vld [vmem:[%s5953_s12 + $0x20] sm:$0xff] }
 0x1f6   : > { %6009 = vst [vmem:[#allocation16_spill] sm:$0xff] %v4702_v4  ;;  %v1087_v5 = vadd.f32 %v1086_v6, %v1072_v8  ;;  %v1047_v11 = vadd.f32 %v1046_v7, %v4698_v49  ;;  %v4705_v12 = vpop.f32.mrb[11].mxu0  ;;  %v1074_v15 = vmul.f32 %v4702_v4, %v4702_v4  ;;  %v2512_v6 = vld [vmem:[%s5953_s12 + $0x30] sm:$0xff] }
 0x1f7   : > { %6010 = vst [vmem:[#allocation17_spill] sm:$0xff] %v4705_v12  ;;  %v1075_v18 = vmul.f32 %v4705_v12, %v4705_v12 }
 0x1f8   : > { %v1088_v13 = vadd.f32 %v1087_v5, %v1073_v9  ;;  %v1048_v10 = vadd.f32 %v1047_v11, %v4702_v4 }
 0x1fa   : > { %v1089_v16 = vadd.f32 %v1088_v13, %v1074_v15  ;;  %v1049_v17 = vadd.f32 %v1048_v10, %v4705_v12 }
 0x1fb   : > { %v4713_v19 = vpop.f32.mrb[12].mxu0 }
 0x1fc   : > { %6011 = vst [vmem:[#allocation18_spill] sm:$0xff] %v4713_v19  ;;  %v1090_v28 = vadd.f32 %v1089_v16, %v1075_v18  ;;  %v1050_v14 = vadd.f32 %v1049_v17, %v4713_v19  ;;  %v1076_v20 = vmul.f32 %v4713_v19, %v4713_v19  ;;  %v4718_v21 = vpop.f32.mrb[13].mxu0 }
 0x1fd   : > { %6012 = vst [vmem:[#allocation19_spill] sm:$0xff] %v4718_v21  ;;  %v1077_v22 = vmul.f32 %v4718_v21, %v4718_v21  ;;  %v4722_v24 = vpop.f32.mrb[14].mxu0 }
 0x1fe   : > { %6013 = vst [vmem:[#allocation20_spill] sm:$0xff] %v4722_v24  ;;  %v4724_v25 = vpop.f32.mrb[15].mxu0  ;;  %v1051_v29 = vadd.f32 %v1050_v14, %v4718_v21  ;;  %v1091_v32 = vadd.f32 %v1090_v28, %v1076_v20  ;;  %v1078_v34 = vmul.f32 %v4722_v24, %v4722_v24 }
 0x1ff   : > { %6014 = vst [vmem:[#allocation21_spill] sm:$0xff] %v4724_v25  ;;  %v1079_v38 = vmul.f32 %v4724_v25, %v4724_v25 }
 0x200   : > { %v1052_v35 = vadd.f32 %v1051_v29, %v4722_v24  ;;  %v1092_v36 = vadd.f32 %v1091_v32, %v1077_v22 }
 0x202   : > { %v1053_v37 = vadd.f32 %v1052_v35, %v4724_v25  ;;  %v1093_v23 = vadd.f32 %v1092_v36, %v1078_v34 }
 0x204   : > { %1054 = vadd.xlane.f32.xlu1 %v1053_v37  ;;  %v1094_v40 = vadd.f32 %v1093_v23, %v1079_v38 }
 0x206   : > { %1095 = vadd.xlane.f32.xlu0 %v1094_v40 }
 0x21c   : > { %1411 = vperm.xlu0 %4074, %v1233_v42  }
 0x220   : > { %1256 = vperm.xlu0 %4074, %v1202_v43  }
 0x224   : > { %1261 = vperm.xlu0 %4074, %v1203_v45  }
 0x228   : > { %1271 = vperm.xlu0 %4074, %v1205_v47  }
 0x22c   : > { %1281 = vperm.xlu0 %4074, %v1207_v27  }
 0x230   : > { %1291 = vperm.xlu0 %4074, %v1209_v48  }
 0x234   : > { %1301 = vperm.xlu0 %4074, %v1211_v50  }
 0x238   : > { %1311 = vperm.xlu0 %4074, %v1213_v51  }
 0x23c   : > { %1321 = vperm.xlu0 %4074, %v1215_v52  }
 0x240   : > { %1331 = vperm.xlu0 %4074, %v1217_v54  }
 0x244   : > { %1341 = vperm.xlu0 %4074, %v1219_v55  }
 0x248   : > { %1351 = vperm.xlu0 %4074, %v1221_v57  }
 0x24c   : > { %1361 = vperm.xlu0 %4074, %v1223_v33  }
 0x250   : > { %1371 = vperm.xlu0 %4074, %v1225_v59  }
 0x254   : > { %1381 = vperm.xlu0 %4074, %v1227_v61  }
 0x258   : > { %1391 = vperm.xlu0 %4074, %v1229_v62  }
 0x25c   : > { %1401 = vperm.xlu0 %4074, %v1231_v31  }
 0x260   : > { %2516 = vperm.xlu0 %4074, %v2506_v63  }
 0x264   : > { %2526 = vperm.xlu0 %4074, %v2508_v0  }
 0x268   : > { %2536 = vperm.xlu0 %4074, %v2510_v1  }
 0x26c   : > { %2546 = vperm.xlu0 %4074, %v2512_v6  }
 0x291   : > { %v1055_v7 = vpop.xlane.xlu1 %1054 }
 0x292   : > { %v1056_v8 = vrot.slane %v1055_v7, 4 }
 0x293   : > { %v1096_v9 = vpop.xlane.xlu0 %1095 }
 0x294   : > { %v1057_v5 = vadd.f32 %v1056_v8, %v1055_v7  ;;  %v1097_v11 = vrot.slane %v1096_v9, 4 }
 0x296   : > { %v1058_v13 = vrot.slane %v1057_v5, 2  ;;  %v1098_v10 = vadd.f32 %v1097_v11, %v1096_v9 }
 0x298   : > { %v1099_v15 = vrot.slane %v1098_v10, 2  ;;  %v1059_v16 = vadd.f32 %v1058_v13, %v1057_v5 }
 0x29a   : > { %v1060_v17 = vrot.slane %v1059_v16, 1  ;;  %v1100_v18 = vadd.f32 %v1099_v15, %v1098_v10 }
 0x29c   : > { %v1061_v28 = vadd.f32 %v1060_v17, %v1059_v16  ;;  %v1101_v14 = vrot.slane %v1100_v18, 1 }
 0x29e   : > { %3989 = vpush %v1061_v28  ;;  %v1102_v20 = vadd.f32 %v1101_v14, %v1100_v18 }
 0x2a0   : > { %3991 = vpush %v1102_v20  ;;  %v4080_v20 = vld [vmem:[%s5950_s9] sm:$0xff]  }
 0x2cf   : > { %s3990_s4 = spop %3989 }
 0x2d0   : > { %s1063_s1 = smul.f32 6.1035156e-05, %s3990_s4 }
 0x2d1   : > { %s3992_s5 = spop %3991 }
 0x2d2   : > { %v1105_v22 = vstv %s1063_s1  ;;  %s1122_s23 = smul.f32 %s1063_s1, %s1063_s1  ;;  %s6041_s1 = sld [smem:[#allocation49_spill]] }
 0x2d3   : > { %s1104_s2 = smul.f32 6.1035156e-05, %s3992_s5  ;;  %v1107_v29 = vsub.f32 %v4657_v41, %v1105_v22  ;;  %v1109_v32 = vsub.f32 %v4667_v46, %v1105_v22  ;;  %v1106_v35 = vsub.f32 %v4653_v39, %v1105_v22  ;;  %v1108_v34 = vsub.f32 %v4663_v44, %v1105_v22 }
 0x2d4   : > { %v1111_v36 = vsub.f32 %v4678_v56, %v1105_v22  ;;  %v1113_v37 = vsub.f32 %v4685_v60, %v1105_v22  ;;  %v1110_v38 = vsub.f32 %v4673_v53, %v1105_v22  ;;  %v1112_v23 = vsub.f32 %v4682_v58, %v1105_v22 }
 0x2d5   : > { %s1123_s22 = ssub.f32 %s1104_s2, %s1122_s23  ;;  %v1115_v40 = vsub.f32 %v4698_v49, %v1105_v22  ;;  %v1117_v42 = vsub.f32 %v4705_v12, %v1105_v22  ;;  %v1114_v43 = vsub.f32 %v4693_v2, %v1105_v22  ;;  %v1116_v45 = vsub.f32 %v4702_v4, %v1105_v22  ;;  %s6040_s2 = sld [smem:[#allocation48_spill]] }
 0x2d6   : > { %v1119_v47 = vsub.f32 %v4718_v21, %v1105_v22  ;;  %v1121_v27 = vsub.f32 %v4724_v25, %v1105_v22  ;;  %v1118_v48 = vsub.f32 %v4713_v19, %v1105_v22  ;;  %v1120_v50 = vsub.f32 %v4722_v24, %v1105_v22  ;;  %v4081_v22 = vld [vmem:[%s5950_s9 + $0x8] sm:$0xff]  }
 0x2d7   : > { %s1124_s6 = sadd.f32 1e-05, %s1123_s22 }
 0x2d9   : > { %v1125_v51 = vstv %s1124_s6 }
 0x2da   : > { %4129 = vrsqrt.f32 %v1125_v51 }
 0x2e4   : > { %v4130_v52 = vpop.eup %4129 }
 0x2e5   : > { %3993 = vpush %v4130_v52 }
 0x316   : > { %s3994_s7 = spop %3993 }
 0x317   : > { %v1128_v54 = vstv %s3994_s7 }
 0x318   : > { %v1130_v55 = vmul.f32 %v1128_v54, %v1107_v29  ;;  %v1132_v57 = vmul.f32 %v1128_v54, %v1109_v32  ;;  %v1129_v33 = vmul.f32 %v1128_v54, %v1106_v35  ;;  %v1131_v59 = vmul.f32 %v1128_v54, %v1108_v34  ;;  %v4082_v29 = vld [vmem:[%s5950_s9 + $0x10] sm:$0xff]   ;;  %v4083_v32 = vld [vmem:[%s5950_s9 + $0x18] sm:$0xff]   ;;  %v4084_v35 = vld [vmem:[%s5950_s9 + $0x20] sm:$0xff]  }
 0x319   : > { %v1134_v61 = vmul.f32 %v1128_v54, %v1111_v36  ;;  %v1136_v62 = vmul.f32 %v1128_v54, %v1113_v37  ;;  %v1133_v31 = vmul.f32 %v1128_v54, %v1110_v38  ;;  %v1135_v63 = vmul.f32 %v1128_v54, %v1112_v23  ;;  %v4085_v34 = vld [vmem:[%s5950_s9 + $0x28] sm:$0xff]   ;;  %v4086_v36 = vld [vmem:[%s5950_s9 + $0x30] sm:$0xff]   ;;  %v4087_v37 = vld [vmem:[%s5950_s9 + $0x38] sm:$0xff]  }
 0x31a   : > { %v1146_v0 = vpack.c.bf16 %v1132_v57, %v1130_v55  ;;  %v1145_v1 = vpack.c.bf16 %v1131_v59, %v1129_v33  ;;  %v1138_v6 = vmul.f32 %v1128_v54, %v1115_v40  ;;  %v1140_v7 = vmul.f32 %v1128_v54, %v1117_v42  ;;  %v4088_v38 = vld [vmem:[%s5950_s9 + $0x40] sm:$0xff]   ;;  %v4089_v23 = vld [vmem:[%s5950_s9 + $0x48] sm:$0xff]   ;;  %v4090_v40 = vld [vmem:[%s5950_s9 + $0x50] sm:$0xff]  }
 0x31b   : > { %v1148_v8 = vpack.c.bf16 %v1136_v62, %v1134_v61  ;;  %v1147_v9 = vpack.c.bf16 %v1135_v63, %v1133_v31  ;;  %v1137_v5 = vmul.f32 %v1128_v54, %v1114_v43  ;;  %v1139_v11 = vmul.f32 %v1128_v54, %v1116_v45  ;;  %v4091_v42 = vld [vmem:[%s5950_s9 + $0x58] sm:$0xff]   ;;  %v4092_v43 = vld [vmem:[%s5950_s9 + $0x60] sm:$0xff]   ;;  %v4093_v45 = vld [vmem:[%s5950_s9 + $0x68] sm:$0xff]  }
 0x31c   : > { %1667 = vmatprep.subr.bf16.mxu1 %v1146_v0  ;;  %v1150_v13 = vpack.c.bf16 %v1140_v7, %v1138_v6  ;;  %v1142_v10 = vmul.f32 %v1128_v54, %v1119_v47  ;;  %v1144_v15 = vmul.f32 %v1128_v54, %v1121_v27  ;;  %v1141_v16 = vmul.f32 %v1128_v54, %v1118_v48  ;;  %v4094_v47 = vld [vmem:[%s5950_s9 + $0x70] sm:$0xff]   ;;  %v4095_v27 = vld [vmem:[%s5950_s9 + $0x78] sm:$0xff]   ;;  %v4096_v48 = vld [vmem:[%s5950_s9 + $0x80] sm:$0xff]  }
 0x31d   : > { %1668 = vmatpush1.bf16.msra.mxu1 %v1145_v1  ;;  %v1149_v17 = vpack.c.bf16 %v1139_v11, %v1137_v5  ;;  %v1143_v18 = vmul.f32 %v1128_v54, %v1120_v50 }
 0x31e   : > { %1669 = vmatprep.subr.bf16.mxu1 %v1148_v8  ;;  %v1152_v28 = vpack.c.bf16 %v1144_v15, %v1142_v10 }
 0x31f   : > { %v1151_v14 = vpack.c.bf16 %v1143_v18, %v1141_v16 }
 0x321   : > { %1670 = vmatpush1.bf16.msra.mxu1 %v1147_v9 }
 0x322   : > { %1671 = vmatprep.subr.bf16.mxu1 %v1150_v13 }
 0x325   : > { %1672 = vmatpush1.bf16.msra.mxu1 %v1149_v17 }
 0x326   : > { %1673 = vmatprep.subr.bf16.mxu1 %v1152_v28 }
 0x329   : > { %1674 = vmatpush1.bf16.msra.mxu1 %v1151_v14 }
 0x32c   : > { %3771 = vmatmul.mubr.msk.bf16.vlgmr.msra.gmra.mrb[0].mxu1 %vm1594_vm10, %v4080_v20 }
 0x32d   : > { %1709 = vmatprep.mubr.bf16.mxu1 %v5964_v3 }
 0x334   : > { %3772 = vmatmul.mubr.msk.bf16.gmra.mrb[4].mxu1 %vm1594_vm10, %v4081_v22 }
 0x335   : > { %1719 = vmatprep.mubr.bf16.mxu1 %v5964_v3 }
 0x33c   : > { %3773 = vmatmul.mubr.msk.bf16.gmra.mrb[8].mxu1 %vm1594_vm10, %v4082_v29 }
 0x33d   : > { %1729 = vmatprep.mubr.bf16.mxu1 %v5964_v3 }
 0x344   : > { %3774 = vmatmul.mubr.msk.bf16.gmra.mrb[12].mxu1 %vm1594_vm10, %v4083_v32 }
 0x345   : > { %1739 = vmatprep.mubr.bf16.mxu1 %v5964_v3 }
 0x34c   : > { %3775 = vmatmul.mubr.msk.bf16.gmra.mrb[16].mxu1 %vm1594_vm10, %v4084_v35 }
 0x34d   : > { %1749 = vmatprep.mubr.bf16.mxu1 %v5964_v3 }
 0x354   : > { %3776 = vmatmul.mubr.msk.bf16.gmra.mrb[20].mxu1 %vm1594_vm10, %v4085_v34 }
 0x355   : > { %1759 = vmatprep.mubr.bf16.mxu1 %v5964_v3 }
 0x35c   : > { %3777 = vmatmul.mubr.msk.bf16.gmra.mrb[24].mxu1 %vm1594_vm10, %v4086_v36 }
 0x35d   : > { %1769 = vmatprep.mubr.bf16.mxu1 %v5964_v3 }
 0x364   : > { %3778 = vmatmul.mubr.msk.bf16.gmra.mrb[28].mxu1 %vm1594_vm10, %v4087_v37 }
 0x365   : > { %1779 = vmatprep.mubr.bf16.mxu1 %v5964_v3 }
 0x36c   : > { %3779 = vmatmul.mubr.msk.bf16.gmra.mrb[32].mxu1 %vm1594_vm10, %v4088_v38 }
 0x36d   : > { %1789 = vmatprep.mubr.bf16.mxu1 %v5964_v3 }
 0x374   : > { %3780 = vmatmul.mubr.msk.bf16.gmra.mrb[36].mxu1 %vm1594_vm10, %v4089_v23 }
 0x375   : > { %1799 = vmatprep.mubr.bf16.mxu1 %v5964_v3 }
 0x37c   : > { %3781 = vmatmul.mubr.msk.bf16.gmra.mrb[40].mxu1 %vm1594_vm10, %v4090_v40 }
 0x37d   : > { %1809 = vmatprep.mubr.bf16.mxu1 %v5964_v3 }
 0x384   : > { %3782 = vmatmul.mubr.msk.bf16.gmra.mrb[44].mxu1 %vm1594_vm10, %v4091_v42 }
 0x385   : > { %1819 = vmatprep.mubr.bf16.mxu1 %v5964_v3 }
 0x38c   : > { %3783 = vmatmul.mubr.msk.bf16.gmra.mrb[48].mxu1 %vm1594_vm10, %v4092_v43 }
 0x38d   : > { %1829 = vmatprep.mubr.bf16.mxu1 %v5964_v3 }
 0x394   : > { %3784 = vmatmul.mubr.msk.bf16.gmra.mrb[52].mxu1 %vm1594_vm10, %v4093_v45 }
 0x395   : > { %1839 = vmatprep.mubr.bf16.mxu1 %v5964_v3 }
 0x39c   : > { %3785 = vmatmul.mubr.msk.bf16.gmra.mrb[56].mxu1 %vm1594_vm10, %v4094_v47 }
 0x39d   : > { %1849 = vmatprep.mubr.bf16.mxu1 %v5964_v3 }
 0x3a4   : > { %3786 = vmatmul.mubr.msk.bf16.gmra.mrb[60].mxu1 %vm1594_vm10, %v4095_v27 }
 0x3a5   : > { %1859 = vmatprep.mubr.bf16.mxu1 %v5964_v3 }
 0x3ac   : > { %3787 = vmatmul.mubr.msk.bf16.gmra.mrb[64].mxu1 %vm1594_vm10, %v4096_v48 }
 0x3ad   : > { %1867 = vmatprep.mubr.bf16.mxu1 %v5964_v3 }
 0x3ff   : > { %v4897_v50 = vpop.f32.mrb[0].mxu1 }
 0x400   : > { %v4899_v51 = vpop.f32.mrb[1].mxu1 }
 0x401   : > { %v4901_v52 = vpop.f32.mrb[2].mxu1 }
 0x402   : > { %v4903_v54 = vpop.f32.mrb[3].mxu1 }
 0x407   : > { %v4905_v55 = vpop.f32.mrb[4].mxu1 }
 0x408   : > { %v4907_v57 = vpop.f32.mrb[5].mxu1 }
 0x409   : > { %v4909_v33 = vpop.f32.mrb[6].mxu1 }
 0x40a   : > { %v4911_v59 = vpop.f32.mrb[7].mxu1 }
 0x40f   : > { %v4913_v61 = vpop.f32.mrb[8].mxu1 }
 0x410   : > { %v4915_v62 = vpop.f32.mrb[9].mxu1 }
 0x411   : > { %v4917_v31 = vpop.f32.mrb[10].mxu1 }
 0x412   : > { %v4919_v63 = vpop.f32.mrb[11].mxu1 }
 0x417   : > { %v4921_v0 = vpop.f32.mrb[12].mxu1 }
 0x418   : > { %v4923_v1 = vpop.f32.mrb[13].mxu1 }
 0x419   : > { %v4925_v6 = vpop.f32.mrb[14].mxu1 }
 0x41a   : > { %v4927_v7 = vpop.f32.mrb[15].mxu1 }
 0x41f   : > { %v4929_v8 = vpop.f32.mrb[16].mxu1 }
 0x420   : > { %v4931_v9 = vpop.f32.mrb[17].mxu1 }
 0x421   : > { %v4933_v5 = vpop.f32.mrb[18].mxu1 }
 0x422   : > { %v4935_v11 = vpop.f32.mrb[19].mxu1 }
 0x427   : > { %v4937_v13 = vpop.f32.mrb[20].mxu1 }
 0x428   : > { %v4939_v10 = vpop.f32.mrb[21].mxu1 }
 0x429   : > { %v4941_v15 = vpop.f32.mrb[22].mxu1 }
 0x42a   : > { %v4943_v16 = vpop.f32.mrb[23].mxu1 }
 0x42f   : > { %v4945_v17 = vpop.f32.mrb[24].mxu1 }
 0x430   : > { %v4947_v18 = vpop.f32.mrb[25].mxu1 }
 0x431   : > { %v4949_v28 = vpop.f32.mrb[26].mxu1 }
 0x432   : > { %v4951_v14 = vpop.f32.mrb[27].mxu1 }
 0x437   : > { %v4953_v20 = vpop.f32.mrb[28].mxu1 }
 0x438   : > { %v4955_v22 = vpop.f32.mrb[29].mxu1 }
 0x439   : > { %v4957_v29 = vpop.f32.mrb[30].mxu1 }
 0x43a   : > { %v4959_v32 = vpop.f32.mrb[31].mxu1 }
 0x43f   : > { %v4961_v35 = vpop.f32.mrb[32].mxu1 }
 0x440   : > { %v4963_v34 = vpop.f32.mrb[33].mxu1 }
 0x441   : > { %v4965_v36 = vpop.f32.mrb[34].mxu1 }
 0x442   : > { %v4967_v37 = vpop.f32.mrb[35].mxu1 }
 0x447   : > { %v4969_v38 = vpop.f32.mrb[36].mxu1 }
 0x448   : > { %v4971_v23 = vpop.f32.mrb[37].mxu1 }
 0x449   : > { %v4973_v40 = vpop.f32.mrb[38].mxu1 }
 0x44a   : > { %v4975_v42 = vpop.f32.mrb[39].mxu1 }
 0x44b   : > { %6015 = vst [vmem:[#allocation22_spill] sm:$0xff] %v4975_v42 }
 0x44f   : > { %v4977_v43 = vpop.f32.mrb[40].mxu1 }
 0x450   : > { %6016 = vst [vmem:[#allocation23_spill] sm:$0xff] %v4977_v43  ;;  %v4979_v45 = vpop.f32.mrb[41].mxu1 }
 0x451   : > { %6017 = vst [vmem:[#allocation24_spill] sm:$0xff] %v4979_v45  ;;  %v4981_v47 = vpop.f32.mrb[42].mxu1 }
 0x452   : > { %6018 = vst [vmem:[#allocation25_spill] sm:$0xff] %v4981_v47  ;;  %v4983_v27 = vpop.f32.mrb[43].mxu1 }
 0x453   : > { %6019 = vst [vmem:[#allocation26_spill] sm:$0xff] %v4983_v27 }
 0x457   : > { %v4985_v48 = vpop.f32.mrb[44].mxu1 }
 0x458   : > { %6020 = vst [vmem:[#allocation27_spill] sm:$0xff] %v4985_v48  ;;  %v4987_v3 = vpop.f32.mrb[45].mxu1 }
 0x459   : > { %6021 = vst [vmem:[#allocation28_spill] sm:$0xff] %v4987_v3  ;;  %v4989_v25 = vpop.f32.mrb[46].mxu1 }
 0x45a   : > { %6022 = vst [vmem:[#allocation29_spill] sm:$0xff] %v4989_v25  ;;  %v4991_v24 = vpop.f32.mrb[47].mxu1 }
 0x45b   : > { %6023 = vst [vmem:[#allocation30_spill] sm:$0xff] %v4991_v24 }
 0x45f   : > { %v4993_v21 = vpop.f32.mrb[48].mxu1 }
 0x460   : > { %6024 = vst [vmem:[#allocation31_spill] sm:$0xff] %v4993_v21  ;;  %v4995_v19 = vpop.f32.mrb[49].mxu1 }
 0x461   : > { %6025 = vst [vmem:[#allocation32_spill] sm:$0xff] %v4995_v19  ;;  %v4997_v12 = vpop.f32.mrb[50].mxu1 }
 0x462   : > { %6026 = vst [vmem:[#allocation33_spill] sm:$0xff] %v4997_v12  ;;  %v4999_v4 = vpop.f32.mrb[51].mxu1 }
 0x463   : > { %6027 = vst [vmem:[#allocation34_spill] sm:$0xff] %v4999_v4 }
 0x467   : > { %v5001_v49 = vpop.f32.mrb[52].mxu1 }
 0x468   : > { %6028 = vst [vmem:[#allocation35_spill] sm:$0xff] %v5001_v49  ;;  %v5003_v2 = vpop.f32.mrb[53].mxu1 }
 0x469   : > { %6029 = vst [vmem:[#allocation36_spill] sm:$0xff] %v5003_v2  ;;  %v5005_v60 = vpop.f32.mrb[54].mxu1  ;;  %v1412_v2 = vpop.permute.xlu0 %1411 }
 0x46a   : > { %6030 = vst [vmem:[#allocation37_spill] sm:$0xff] %v5005_v60  ;;  %v5007_v58 = vpop.f32.mrb[55].mxu1 }
 0x46b   : > { %6031 = vst [vmem:[#allocation38_spill] sm:$0xff] %v5007_v58 }
 0x46f   : > { %v5009_v56 = vpop.f32.mrb[56].mxu1 }
 0x470   : > { %6032 = vst [vmem:[#allocation39_spill] sm:$0xff] %v5009_v56  ;;  %v5011_v53 = vpop.f32.mrb[57].mxu1 }
 0x471   : > { %6033 = vst [vmem:[#allocation40_spill] sm:$0xff] %v5011_v53  ;;  %v5013_v46 = vpop.f32.mrb[58].mxu1 }
 0x472   : > { %6034 = vst [vmem:[#allocation41_spill] sm:$0xff] %v5013_v46  ;;  %v5015_v44 = vpop.f32.mrb[59].mxu1  ;;  %v5028_v46 = vld [vmem:[%s6040_s2] sm:$0xff] }
 0x473   : > { %6035 = vst [vmem:[#allocation42_spill] sm:$0xff] %v5015_v44  ;;  %vm1910_vm11 = vcmp.gt.f32.partialorder %v5028_v46, 0.5 }
 0x477   : > { %v5017_v41 = vpop.f32.mrb[60].mxu1 }
 0x478   : > { %6036 = vst [vmem:[#allocation43_spill] sm:$0xff] %v5017_v41  ;;  %v5019_v39 = vpop.f32.mrb[61].mxu1 }
 0x479   : > { %6037 = vst [vmem:[#allocation44_spill] sm:$0xff] %v5019_v39  ;;  %v5021_v4 = vpop.f32.mrb[62].mxu1 }
 0x47a   : > { %6038 = vst [vmem:[#allocation45_spill] sm:$0xff] %v5021_v4  ;;  %v5023_v49 = vpop.f32.mrb[63].mxu1 }
 0x47b   : > { %6039 = vst [vmem:[#allocation46_spill] sm:$0xff] %v5023_v49 }
 0x47f   : > { %v1861_v60 = vpop.f32.mrb[64].mxu1 }
 0x480   : > { %v1862_v12 = vadd.f32 %v1861_v60, %v1412_v2  ;;  %v1863_v58 = vpop.f32.mrb[65].mxu1 }
 0x481   : > { %v1864_v19 = vadd.f32 %v1863_v58, %v1412_v2  ;;  %v1865_v56 = vpop.f32.mrb[66].mxu1  ;;  %v4354_v2 = vmov 839922192  }
 0x482   : > { %v1914_v44 = vrot.slane %v1862_v12, %v4557_v30  ;;  %v1866_v41 = vpop.f32.mrb[67].mxu1  ;;  %v1934_v21 = vunpack.c.l.s4 %v4354_v2 }
 0x483   : > { %v1918_v39 = vrot.slane %v1864_v19, %v4557_v30 }
 0x484   : > { %v1935_v24 = vunpack.c.0.s8 %v1934_v21 }
 0x485   : > { %v1921_v4 = vcombine.low %v1914_v44, %v1918_v39 }
 0x486   : > { %v5036_v25 = vsub.s32 %v1935_v24, %v4550_v26 }
 0x487   : > { %v1923_v49 = vsel %vm1910_vm11, %v1921_v4, -inf }
 0x488   : > { %v1925_v53 = vcombine.high %v1923_v49, %v1923_v49  ;;  %v1927_v60 = vsel %vm926_vm8, %v1923_v49, -inf }
 0x48a   : > { %v1928_v58 = vsel %vm926_vm8, %v1925_v53, -inf }
 0x48b   : > { %v1929_v56 = vmax.f32 %v1927_v60, %v1928_v58 }
 0x48d   : > { %1930 = vmax.xlane.f32.xlu1 %v1929_v56 }
 0x51a   : > { %v1931_v41 = vpop.xlane.xlu1 %1930 }
 0x51b   : > { %v1939_v3 = vrot.slane %v1931_v41, %v5036_v25 }
 0x51d   : > { %v1941_v48 = vmul.f32 %v1939_v3, %v5028_v46 }
 0x51f   : > { %v1943_v39 = vcombine.high %v1941_v48, %v1941_v48  ;;  %v1945_v44 = vsel %vm926_vm8, %v1941_v48, 0.0 }
 0x520   : > { %v1946_v4 = vrot.slane %v1945_v44, 4 }
 0x521   : > { %v1952_v49 = vsel %vm926_vm8, %v1943_v39, 0.0 }
 0x522   : > { %v1947_v53 = vadd.f32 %v1946_v4, %v1945_v44  ;;  %v1953_v60 = vrot.slane %v1952_v49, 4 }
 0x524   : > { %v1948_v58 = vrot.slane %v1947_v53, 2  ;;  %v1954_v56 = vadd.f32 %v1953_v60, %v1952_v49  ;;  %v1024_v60 = vld [vmem:[%s6041_s1 + $0x88] sm:$0xff] }
 0x526   : > { %v1949_v2 = vadd.f32 %v1948_v58, %v1947_v53  ;;  %v1955_v21 = vrot.slane %v1954_v56, 2  ;;  %v1023_v53 = vld [vmem:[%s6041_s1 + $0x80] sm:$0xff]  ;;  %v1206_v58 = vld [vmem:[%s5951_s10 + $0x28] sm:$0xff] }
 0x528   : > { %v1950_v27 = vrot.slane %v1949_v2, 1  ;;  %v1956_v26 = vadd.f32 %v1955_v21, %v1954_v56  ;;  %v3957_v56 = vpack.c.bf16 %v1024_v60, %v1023_v53  ;;  %v1008_v21 = vld [vmem:[%s6041_s1 + $0x8] sm:$0xff]  ;;  %v1029_v60 = vld [vmem:[%s6041_s1 + $0xb0] sm:$0xff] }
 0x52a   : > { %v1951_v24 = vadd.f32 %v1950_v27, %v1949_v2  ;;  %v1957_v47 = vrot.slane %v1956_v26, 1  ;;  %v1007_v2 = vld [vmem:[%s6041_s1] sm:$0xff]  ;;  %3958 = vmatprep.subr.bf16.mxu0 %v3957_v56  ;;  %v1212_v56 = vld [vmem:[%s5951_s10 + $0x58] sm:$0xff] }
 0x52c   : > { %v1958_v45 = vadd.f32 %v1957_v47, %v1956_v26  ;;  %v1959_v41 = vsub.f32 %v1862_v12, %v1951_v24  ;;  %v3959_v26 = vpack.c.bf16 %v1008_v21, %v1007_v2  ;;  %v1025_v24 = vld [vmem:[%s6041_s1 + $0x90] sm:$0xff] }
 0x52d   : > { %v1013_v21 = vld [vmem:[%s6041_s1 + $0x30] sm:$0xff] }
 0x52e   : > { %v1960_v43 = vsub.f32 %v1864_v19, %v1958_v45  ;;  %v1961_v3 = vmul.f32 1.442695, %v1959_v41  ;;  %v1204_v45 = vld [vmem:[%s5951_s10 + $0x18] sm:$0xff]  ;;  %3960 = vmatpush3.bf16.msra.mxu0 %v3959_v26 }
 0x52f   : > { %v1026_v41 = vld [vmem:[%s6041_s1 + $0x98] sm:$0xff] }
 0x530   : > { %4131 = vpow2.f32 %v1961_v3  ;;  %v1963_v42 = vmul.f32 1.442695, %v1960_v43  ;;  %v1208_v3 = vld [vmem:[%s5951_s10 + $0x38] sm:$0xff] }
 0x531   : > { %v1014_v26 = vld [vmem:[%s6041_s1 + $0x38] sm:$0xff] }
 0x532   : > { %4133 = vpow2.f32 %v1963_v42  ;;  %v1201_v42 = vld [vmem:[%s5951_s10] sm:$0xff] }
 0x53a   : > { %v5042_v48 = vpop.eup %4131 }
 0x53b   : > { %v1968_v44 = vrot.slane %v5042_v48, %v4557_v30 }
 0x53c   : > { %v5044_v39 = vpop.eup %4133 }
 0x53d   : > { %v1972_v4 = vrot.slane %v5044_v39, %v4557_v30 }
 0x53f   : > { %v1975_v49 = vcombine.low %v1968_v44, %v1972_v4  ;;  %v3961_v44 = vpack.c.bf16 %v1026_v41, %v1025_v24  ;;  %v1009_v4 = vld [vmem:[%s6041_s1 + $0x10] sm:$0xff]  ;;  %v3971_v24 = vpack.c.bf16 %v1014_v26, %v1013_v21  ;;  %v1031_v41 = vld [vmem:[%s6041_s1 + $0xc0] sm:$0xff] }
 0x540   : > { %v1019_v26 = vld [vmem:[%s6041_s1 + $0x60] sm:$0xff] }
 0x541   : > { %v1977_v27 = vmul.f32 %v1975_v49, %v5028_v46  ;;  %v1010_v49 = vld [vmem:[%s6041_s1 + $0x18] sm:$0xff]  ;;  %3962 = vmatprep.subr.bf16.mxu0 %v3961_v44  ;;  %v1214_v44 = vld [vmem:[%s5951_s10 + $0x68] sm:$0xff] }
 0x543   : > { %v1979_v47 = vcombine.high %v1977_v27, %v1977_v27  ;;  %v1981_v12 = vsel %vm926_vm8, %v1977_v27, 0.0  ;;  %v3963_v27 = vpack.c.bf16 %v1010_v49, %v1009_v4  ;;  %v1015_v49 = vld [vmem:[%s6041_s1 + $0x40] sm:$0xff] }
 0x545   : > { %v1982_v19 = vsel %vm926_vm8, %v1979_v47, 0.0  ;;  %3964 = vmatpush3.bf16.msra.mxu0 %v3963_v27  ;;  %v1027_v47 = vld [vmem:[%s6041_s1 + $0xa0] sm:$0xff]  ;;  %v1016_v27 = vld [vmem:[%s6041_s1 + $0x48] sm:$0xff] }
 0x546   : > { %v1983_v43 = vadd.f32 %v1982_v19, %v1981_v12  ;;  %v1028_v12 = vld [vmem:[%s6041_s1 + $0xa8] sm:$0xff] }
 0x547   : > { %v1210_v19 = vld [vmem:[%s5951_s10 + $0x48] sm:$0xff] }
 0x548   : > { %1984 = vadd.xlane.f32.xlu1 %v1983_v43  ;;  %v3965_v43 = vpack.c.bf16 %v1028_v12, %v1027_v47  ;;  %v3975_v47 = vpack.c.bf16 %v1016_v27, %v1015_v49  ;;  %v1033_v12 = vld [vmem:[%s6041_s1 + $0xd0] sm:$0xff] }
 0x549   : > { %v1021_v27 = vld [vmem:[%s6041_s1 + $0x70] sm:$0xff] }
 0x54a   : > { %3966 = vmatprep.subr.bf16.mxu0 %v3965_v43  ;;  %v1216_v43 = vld [vmem:[%s5951_s10 + $0x78] sm:$0xff] }
 0x559   : > { %1251 = vperm.xlu1 %4075, %v1201_v42   ;;  %v1011_v42 = vld [vmem:[%s6041_s1 + $0x20] sm:$0xff] }
 0x55d   : > { %1266 = vperm.xlu1 %4075, %v1204_v45   ;;  %v1012_v45 = vld [vmem:[%s6041_s1 + $0x28] sm:$0xff] }
 0x55e   : > { %v3967_v53 = vpack.c.bf16 %v1012_v45, %v1011_v42  ;;  %v1017_v45 = vld [vmem:[%s6041_s1 + $0x50] sm:$0xff] }
 0x560   : > { %3968 = vmatpush3.bf16.msra.mxu0 %v3967_v53  ;;  %v1018_v53 = vld [vmem:[%s6041_s1 + $0x58] sm:$0xff] }
 0x561   : > { %1276 = vperm.xlu1 %4075, %v1206_v58   ;;  %v1030_v58 = vld [vmem:[%s6041_s1 + $0xb8] sm:$0xff] }
 0x562   : > { %v3969_v2 = vpack.c.bf16 %v1030_v58, %v1029_v60  ;;  %v3979_v60 = vpack.c.bf16 %v1018_v53, %v1017_v45  ;;  %v1035_v58 = vld [vmem:[%s6041_s1 + $0xe0] sm:$0xff]  ;;  %v1228_v45 = vld [vmem:[%s5951_s10 + $0xd8] sm:$0xff]  ;;  %v1230_v53 = vld [vmem:[%s5951_s10 + $0xe8] sm:$0xff] }
 0x564   : > { %3970 = vmatprep.subr.bf16.mxu0 %v3969_v2  ;;  %v1218_v2 = vld [vmem:[%s5951_s10 + $0x88] sm:$0xff] }
 0x565   : > { %1286 = vperm.xlu1 %4075, %v1208_v3   ;;  %3972 = vmatpush3.bf16.msra.mxu0 %v3971_v24  ;;  %v1032_v3 = vld [vmem:[%s6041_s1 + $0xc8] sm:$0xff] }
 0x566   : > { %v3973_v4 = vpack.c.bf16 %v1032_v3, %v1031_v41  ;;  %v1020_v24 = vld [vmem:[%s6041_s1 + $0x68] sm:$0xff]  ;;  %v1037_v3 = vld [vmem:[%s6041_s1 + $0xf0] sm:$0xff] }
 0x567   : > { %v3983_v41 = vpack.c.bf16 %v1020_v24, %v1019_v26 }
 0x568   : > { %3974 = vmatprep.subr.bf16.mxu0 %v3973_v4  ;;  %v1220_v4 = vld [vmem:[%s5951_s10 + $0x98] sm:$0xff] }
 0x569   : > { %1296 = vperm.xlu1 %4075, %v1210_v19   ;;  %3976 = vmatpush3.bf16.msra.mxu0 %v3975_v47  ;;  %v1034_v19 = vld [vmem:[%s6041_s1 + $0xd8] sm:$0xff] }
 0x56a   : > { %v3977_v42 = vpack.c.bf16 %v1034_v19, %v1033_v12  ;;  %v1022_v47 = vld [vmem:[%s6041_s1 + $0x78] sm:$0xff]  ;;  %v1222_v19 = vld [vmem:[%s5951_s10 + $0xa8] sm:$0xff] }
 0x56b   : > { %v3987_v12 = vpack.c.bf16 %v1022_v47, %v1021_v27 }
 0x56c   : > { %3978 = vmatprep.subr.bf16.mxu0 %v3977_v42  ;;  %v1226_v42 = vld [vmem:[%s5951_s10 + $0xc8] sm:$0xff] }
 0x56d   : > { %1306 = vperm.xlu1 %4075, %v1212_v56   ;;  %3980 = vmatpush3.bf16.msra.mxu0 %v3979_v60  ;;  %v1036_v56 = vld [vmem:[%s6041_s1 + $0xe8] sm:$0xff]  ;;  %v1232_v60 = vld [vmem:[%s5951_s10 + $0xf8] sm:$0xff] }
 0x56e   : > { %v3981_v21 = vpack.c.bf16 %v1036_v56, %v1035_v58  ;;  %v2507_v58 = vld [vmem:[%s5953_s12 + $0x8] sm:$0xff]  ;;  %v2509_v56 = vld [vmem:[%s5953_s12 + $0x18] sm:$0xff] }
 0x570   : > { %3982 = vmatprep.subr.bf16.mxu0 %v3981_v21  ;;  %v2513_v21 = vld [vmem:[%s5953_s12 + $0x38] sm:$0xff] }
 0x571   : > { %1316 = vperm.xlu1 %4075, %v1214_v44   ;;  %3984 = vmatpush3.bf16.msra.mxu0 %v3983_v41  ;;  %v1038_v44 = vld [vmem:[%s6041_s1 + $0xf8] sm:$0xff] }
 0x572   : > { %v3985_v49 = vpack.c.bf16 %v1038_v44, %v1037_v3 }
 0x574   : > { %3986 = vmatprep.subr.bf16.mxu0 %v3985_v49 }
 0x575   : > { %1326 = vperm.xlu1 %4075, %v1216_v43   ;;  %3988 = vmatpush3.bf16.msra.mxu0 %v3987_v12  ;;  %v1224_v43 = vld [vmem:[%s5951_s10 + $0xb8] sm:$0xff] }
 0x579   : > { %1336 = vperm.xlu1 %4075, %v1218_v2   ;;  %v2511_v2 = vld [vmem:[%s5953_s12 + $0x28] sm:$0xff] }
 0x57d   : > { %1346 = vperm.xlu1 %4075, %v1220_v4  }
 0x581   : > { %1356 = vperm.xlu1 %4075, %v1222_v19  }
 0x585   : > { %1366 = vperm.xlu1 %4075, %v1224_v43  }
 0x589   : > { %1376 = vperm.xlu1 %4075, %v1226_v42  }
 0x58d   : > { %1386 = vperm.xlu1 %4075, %v1228_v45  }
 0x591   : > { %1396 = vperm.xlu1 %4075, %v1230_v53  }
 0x595   : > { %1406 = vperm.xlu1 %4075, %v1232_v60  }
 0x599   : > { %2521 = vperm.xlu1 %4075, %v2507_v58  }
 0x59d   : > { %2531 = vperm.xlu1 %4075, %v2509_v56  }
 0x5a1   : > { %2541 = vperm.xlu1 %4075, %v2511_v2  }
 0x5a5   : > { %2551 = vperm.xlu1 %4075, %v2513_v21  }
 0x5d5   : > { %v1985_v26 = vpop.xlane.xlu1 %1984 }
 0x5d6   : > { %v1993_v24 = vrot.slane %v1985_v26, %v5036_v25 }
 0x5d8   : > { %v1995_v41 = vmul.f32 %v1993_v24, %v5028_v46 }
 0x5d9   : > { %v1252_v26 = vpop.permute.xlu1 %1251 }
 0x5da   : > { %v1997_v3 = vcombine.high %v1995_v41, %v1995_v41  ;;  %v1999_v44 = vsel %vm926_vm8, %v1995_v41, 0.0  ;;  %v1257_v41 = vpop.permute.xlu0 %1256 }
 0x5db   : > { %v2000_v4 = vrot.slane %v1999_v44, 4 }
 0x5dc   : > { %v2006_v49 = vsel %vm926_vm8, %v1997_v3, 0.0 }
 0x5dd   : > { %v2001_v27 = vadd.f32 %v2000_v4, %v1999_v44  ;;  %v2007_v47 = vrot.slane %v2006_v49, 4  ;;  %v1704_v4 = vadd.f32 %v4899_v51, %v1252_v26 }
 0x5df   : > { %v2002_v12 = vrot.slane %v2001_v27, 2  ;;  %v2008_v19 = vadd.f32 %v2007_v47, %v2006_v49  ;;  %v1702_v49 = vadd.f32 %v4897_v50, %v1252_v26 }
 0x5e1   : > { %v2003_v43 = vadd.f32 %v2002_v12, %v2001_v27  ;;  %v2009_v42 = vrot.slane %v2008_v19, 2  ;;  %v1708_v27 = vadd.f32 %v4903_v54, %v1257_v41  ;;  %v1262_v12 = vpop.permute.xlu0 %1261 }
 0x5e2   : > { %v1712_v54 = vadd.f32 %v4905_v55, %v1262_v12 }
 0x5e3   : > { %v2004_v45 = vrot.slane %v2003_v43, 1  ;;  %v2010_v53 = vadd.f32 %v2009_v42, %v2008_v19  ;;  %v1706_v19 = vadd.f32 %v4901_v52, %v1257_v41 }
 0x5e5   : > { %v2005_v60 = vadd.f32 %v2004_v45, %v2003_v43  ;;  %v2011_v58 = vrot.slane %v2010_v53, 1  ;;  %v1267_v43 = vpop.permute.xlu1 %1266  ;;  %v1272_v52 = vpop.permute.xlu0 %1271 }
 0x5e6   : > { %v1718_v42 = vadd.f32 %v4911_v59, %v1267_v43 }
 0x5e7   : > { %v2012_v56 = vadd.f32 %v2011_v58, %v2010_v53  ;;  %4135 = vrcp.f32 %v2005_v60  ;;  %v1716_v60 = vadd.f32 %v4909_v33, %v1267_v43 }
 0x5e9   : > { %4137 = vrcp.f32 %v2012_v56  ;;  %v1277_v56 = vpop.permute.xlu1 %1276  ;;  %v1282_v33 = vpop.permute.xlu0 %1281 }
 0x5ea   : > { %v1728_v59 = vadd.f32 %v4919_v63, %v1277_v56  ;;  %v1726_v26 = vadd.f32 %v4917_v31, %v1277_v56 }
 0x5ed   : > { %v1287_v41 = vpop.permute.xlu1 %1286  ;;  %v1292_v31 = vpop.permute.xlu0 %1291 }
 0x5ee   : > { %v1738_v63 = vadd.f32 %v4927_v7, %v1287_v41 }
 0x5f1   : > { %v4136_v25 = vpop.eup %4135 }
 0x5f2   : > { %v2015_v2 = vmul.f32 %v4136_v25, %v5042_v48  ;;  %v1722_v25 = vadd.f32 %v4913_v61, %v1272_v52 }
 0x5f3   : > { %v4138_v21 = vpop.eup %4137 }
 0x5f4   : > { %v2016_v24 = vmul.f32 %v4138_v21, %v5044_v39  ;;  %v5216_v3 = vrot.slane %v2015_v2, %v4557_v30 }
 0x5f6   : > { %v5219_v44 = vrot.slane %v2016_v24, %v4557_v30  ;;  %v2025_v48 = vmul.f32 %v5216_v3, %v1702_v49  ;;  %v1714_v30 = vadd.f32 %v4907_v57, %v1262_v12  ;;  %v2027_v51 = vmul.f32 %v5216_v3, %v1706_v19 }
 0x5f7   : > { %v2029_v45 = vmul.f32 %v5216_v3, %v1712_v54  ;;  %v1724_v57 = vadd.f32 %v4915_v62, %v1272_v52  ;;  %v2031_v58 = vmul.f32 %v5216_v3, %v1716_v60  ;;  %v2033_v2 = vmul.f32 %v5216_v3, %v1722_v25 }
 0x5f8   : > { %v2026_v47 = vmul.f32 %v5219_v44, %v1704_v4  ;;  %v2028_v39 = vmul.f32 %v5219_v44, %v1708_v27  ;;  %v2030_v50 = vmul.f32 %v5219_v44, %v1714_v30  ;;  %v2032_v53 = vmul.f32 %v5219_v44, %v1718_v42 }
 0x5f9   : > { %v2034_v55 = vmul.f32 %v5219_v44, %v1724_v57  ;;  %v2036_v21 = vmul.f32 %v5219_v44, %v1728_v59  ;;  %v1734_v62 = vadd.f32 %v4923_v1, %v1282_v33  ;;  %v2035_v24 = vmul.f32 %v5216_v3, %v1726_v26 }
 0x5fa   : > { %2121 = vmatprep.mubr.f32.mxu0 %v2026_v47  ;;  %v1732_v4 = vadd.f32 %v4921_v0, %v1282_v33  ;;  %v2040_v27 = vmul.f32 %v5219_v44, %v1738_v63  ;;  %v1736_v47 = vadd.f32 %v4925_v6, %v1287_v41  ;;  %v1744_v1 = vadd.f32 %v4931_v9, %v1292_v31  ;;  %v1302_v6 = vpop.permute.xlu0 %1301 }
 0x5fb   : > { %2122 = vmatmul.mubr.f32.vlgmr.msra.gmra.mrb[16].mxu0 %v2025_v48  ;;  %v2038_v61 = vmul.f32 %v5219_v44, %v1734_v62  ;;  %v1742_v12 = vadd.f32 %v4929_v8, %v1292_v31  ;;  %v1754_v9 = vadd.f32 %v4939_v10, %v1302_v6  ;;  %v1752_v54 = vadd.f32 %v4937_v13, %v1302_v6 }
 0x5fc   : > { %2126 = vmatprep.mubr.f32.mxu0 %v2028_v39  ;;  %v2037_v49 = vmul.f32 %v5216_v3, %v1732_v4  ;;  %v2039_v48 = vmul.f32 %v5216_v3, %v1736_v47  ;;  %v1297_v39 = vpop.permute.xlu1 %1296  ;;  %v2042_v0 = vmul.f32 %v5219_v44, %v1744_v1  ;;  %v4355_v26 = vmov 0.0  }
 0x5fd   : > { %v1748_v7 = vadd.f32 %v4935_v11, %v1297_v39  ;;  %v2041_v19 = vmul.f32 %v5216_v3, %v1742_v12  ;;  %v1746_v43 = vadd.f32 %v4933_v5, %v1297_v39  ;;  %v2046_v8 = vmul.f32 %v5219_v44, %v1754_v9 }
 0x5fe   : > { %v2045_v42 = vmul.f32 %v5216_v3, %v1752_v54  ;;  %v1312_v5 = vpop.permute.xlu0 %1311 }
 0x5ff   : > { %2127 = vmatmul.mubr.f32.gmra.mrb[18].mxu0 %v2027_v51  ;;  %v2044_v30 = vmul.f32 %v5219_v44, %v1748_v7  ;;  %v2043_v51 = vmul.f32 %v5216_v3, %v1746_v43  ;;  %v1764_v10 = vadd.f32 %v4947_v18, %v1312_v5  ;;  %v1762_v57 = vadd.f32 %v4945_v17, %v1312_v5 }
 0x600   : > { %2131 = vmatprep.mubr.f32.mxu0 %v2030_v50  ;;  %v1307_v50 = vpop.permute.xlu1 %1306 }
 0x601   : > { %v1758_v11 = vadd.f32 %v4943_v16, %v1307_v50  ;;  %v2050_v13 = vmul.f32 %v5219_v44, %v1764_v10 }
 0x603   : > { %2132 = vmatmul.mubr.f32.gmra.mrb[20].mxu0 %v2029_v45  ;;  %v2048_v45 = vmul.f32 %v5219_v44, %v1758_v11 }
 0x604   : > { %2136 = vmatprep.mubr.f32.mxu0 %v2032_v53  ;;  %v1756_v53 = vadd.f32 %v4941_v15, %v1307_v50  ;;  %v1317_v60 = vpop.permute.xlu1 %1316  ;;  %v1322_v15 = vpop.permute.xlu0 %1321 }
 0x605   : > { %v1768_v16 = vadd.f32 %v4951_v14, %v1317_v60  ;;  %v1774_v25 = vadd.f32 %v4955_v22, %v1322_v15  ;;  %v1772_v14 = vadd.f32 %v4953_v20, %v1322_v15 }
 0x606   : > { %v2047_v52 = vmul.f32 %v5216_v3, %v1756_v53 }
 0x607   : > { %2137 = vmatmul.mubr.f32.gmra.mrb[22].mxu0 %v2031_v58  ;;  %v2049_v58 = vmul.f32 %v5216_v3, %v1762_v57  ;;  %v2052_v56 = vmul.f32 %v5219_v44, %v1768_v16  ;;  %v2053_v33 = vmul.f32 %v5216_v3, %v1772_v14 }
 0x608   : > { %2141 = vmatprep.mubr.f32.mxu0 %v2034_v55  ;;  %v1766_v55 = vadd.f32 %v4949_v28, %v1317_v60  ;;  %v1327_v18 = vpop.permute.xlu1 %1326 }
 0x609   : > { %v1778_v17 = vadd.f32 %v4959_v32, %v1327_v18  ;;  %v2203_v32 = vcombine.high %v5028_v46, %v5028_v46 }
 0x60a   : > { %v2051_v59 = vmul.f32 %v5216_v3, %v1766_v55 }
 0x60b   : > { %2142 = vmatmul.mubr.f32.gmra.mrb[24].mxu0 %v2033_v2  ;;  %v2054_v2 = vmul.f32 %v5219_v44, %v1774_v25  ;;  %v2056_v28 = vmul.f32 %v5219_v44, %v1778_v17  ;;  %3795 = vmatprep.subr.msk.mxu0 %vm926_vm8, %v2203_v32  ;;  %v6042_v17 = vmov 0  }
 0x60c   : > { %2146 = vmatprep.mubr.f32.mxu0 %v2036_v21  ;;  %v1776_v21 = vadd.f32 %v4957_v29, %v1327_v18  ;;  %3796 = vmatpush1.msk.msra.mxu0 %vm926_vm8, %v5028_v46 }
 0x60e   : > { %v2055_v22 = vmul.f32 %v5216_v3, %v1776_v21 }
 0x60f   : > { %2147 = vmatmul.mubr.f32.gmra.mrb[26].mxu0 %v2035_v24 }
 0x610   : > { %2151 = vmatprep.mubr.f32.mxu0 %v2038_v61 }
 0x613   : > { %2152 = vmatmul.mubr.f32.gmra.mrb[28].mxu0 %v2037_v49 }
 0x614   : > { %2156 = vmatprep.mubr.f32.mxu0 %v2040_v27 }
 0x617   : > { %2157 = vmatmul.mubr.f32.gmra.mrb[30].mxu0 %v2039_v48 }
 0x618   : > { %2161 = vmatprep.mubr.f32.mxu0 %v2042_v0 }
 0x61b   : > { %2162 = vmatmul.mubr.f32.gmra.mrb[32].mxu0 %v2041_v19 }
 0x61c   : > { %2166 = vmatprep.mubr.f32.mxu0 %v2044_v30 }
 0x61f   : > { %2167 = vmatmul.mubr.f32.gmra.mrb[34].mxu0 %v2043_v51 }
 0x620   : > { %2171 = vmatprep.mubr.f32.mxu0 %v2046_v8 }
 0x623   : > { %2172 = vmatmul.mubr.f32.gmra.mrb[36].mxu0 %v2045_v42 }
 0x624   : > { %2176 = vmatprep.mubr.f32.mxu0 %v2048_v45 }
 0x627   : > { %2177 = vmatmul.mubr.f32.gmra.mrb[38].mxu0 %v2047_v52 }
 0x628   : > { %2181 = vmatprep.mubr.f32.mxu0 %v2050_v13 }
 0x62b   : > { %2182 = vmatmul.mubr.f32.gmra.mrb[40].mxu0 %v2049_v58 }
 0x62c   : > { %2186 = vmatprep.mubr.f32.mxu0 %v2052_v56 }
 0x62f   : > { %2187 = vmatmul.mubr.f32.gmra.mrb[42].mxu0 %v2051_v59 }
 0x630   : > { %2191 = vmatprep.mubr.f32.mxu0 %v2054_v2  ;;  %v1332_v2 = vpop.permute.xlu0 %1331 }
 0x631   : > { %v1782_v14 = vadd.f32 %v4961_v35, %v1332_v2  ;;  %v1784_v21 = vadd.f32 %v4963_v34, %v1332_v2 }
 0x633   : > { %2192 = vmatmul.mubr.f32.gmra.mrb[44].mxu0 %v2053_v33  ;;  %v1337_v33 = vpop.permute.xlu1 %1336  ;;  %v2419_v32 = vmax.f32 %v1784_v21, 0.0 }
 0x634   : > { %2196 = vmatprep.mubr.f32.mxu0 %v2056_v28  ;;  %v2418_v28 = vmax.f32 %v1782_v14, 0.0 }
 0x637   : > { %2197 = vmatmul.mubr.f32.gmra.mrb[46].mxu0 %v2055_v22  ;;  %v1786_v22 = vadd.f32 %v4965_v36, %v1337_v33 }
 0x638   : > { %2321 = vmatprep.mubr.f32.mxu0 %v4355_v26 }
 0x6ce   : > { %v3909_v20 = vpop.f32.mrb[16].mxu0 }
 0x6cf   : > { %v3910_v29 = vpop.f32.mrb[17].mxu0 }
 0x6d0   : > { %v3911_v44 = vadd.f32 %v3910_v29, %v3909_v20  ;;  %v1788_v20 = vadd.f32 %v4967_v37, %v1337_v33 }
 0x6d2   : > { %v3912_v62 = vpop.f32.mrb[18].mxu0  ;;  %3797 = vmatmul.mubr.msk.f32.vlgmr.msra.gmra.mrb[48].mxu0 %vm2204_vm12, %v3911_v44  ;;  %v2421_v35 = vmax.f32 %v1788_v20, 0.0  ;;  %v6050_v20 = vld [vmem:[#allocation29_spill] sm:$0xff] }
 0x6d3   : > { %v3913_v3 = vpop.f32.mrb[19].mxu0  ;;  %2327 = vmatprep.mubr.f32.mxu0 %v4355_v26 }
 0x6d4   : > { %v3914_v24 = vadd.f32 %v3913_v3, %v3912_v62  ;;  %v1342_v62 = vpop.permute.xlu0 %1341 }
 0x6d6   : > { %v3915_v41 = vpop.f32.mrb[20].mxu0  ;;  %3798 = vmatmul.mubr.msk.f32.gmra.mrb[50].mxu0 %vm2204_vm12, %v3914_v24  ;;  %v1792_v24 = vadd.f32 %v4969_v38, %v1342_v62 }
 0x6d7   : > { %v3916_v61 = vpop.f32.mrb[21].mxu0  ;;  %2333 = vmatprep.mubr.f32.mxu0 %v4355_v26 }
 0x6d8   : > { %v3917_v4 = vadd.f32 %v3916_v61, %v3915_v41  ;;  %v2420_v41 = vmax.f32 %v1786_v22, 0.0  ;;  %v1794_v61 = vadd.f32 %v4971_v23, %v1342_v62  ;;  %v2422_v36 = vmax.f32 %v1792_v24, 0.0  ;;  %v6044_v23 = vld [vmem:[#allocation23_spill] sm:$0xff]  ;;  %v6051_v62 = vld [vmem:[#allocation30_spill] sm:$0xff] }
 0x6da   : > { %v3918_v63 = vpop.f32.mrb[22].mxu0  ;;  %3799 = vmatmul.mubr.msk.f32.gmra.mrb[52].mxu0 %vm2204_vm12, %v3917_v4  ;;  %v1347_v4 = vpop.permute.xlu1 %1346 }
 0x6db   : > { %v3919_v46 = vpop.f32.mrb[23].mxu0  ;;  %2339 = vmatprep.mubr.f32.mxu0 %v4355_v26 }
 0x6dc   : > { %v3920_v49 = vadd.f32 %v3919_v46, %v3918_v63 }
 0x6de   : > { %v3921_v27 = vpop.f32.mrb[24].mxu0  ;;  %3800 = vmatmul.mubr.msk.f32.gmra.mrb[54].mxu0 %vm2204_vm12, %v3920_v49 }
 0x6df   : > { %v3922_v31 = vpop.f32.mrb[25].mxu0  ;;  %2345 = vmatprep.mubr.f32.mxu0 %v4355_v26 }
 0x6e0   : > { %v3923_v47 = vadd.f32 %v3922_v31, %v3921_v27  ;;  %v1796_v27 = vadd.f32 %v4973_v40, %v1347_v4  ;;  %v2423_v31 = vmax.f32 %v1794_v61, 0.0 }
 0x6e2   : > { %v3924_v1 = vpop.f32.mrb[26].mxu0  ;;  %3801 = vmatmul.mubr.msk.f32.gmra.mrb[56].mxu0 %vm2204_vm12, %v3923_v47  ;;  %v6043_v47 = vld [vmem:[#allocation22_spill] sm:$0xff] }
 0x6e3   : > { %v3925_v48 = vpop.f32.mrb[27].mxu0  ;;  %2351 = vmatprep.mubr.f32.mxu0 %v4355_v26 }
 0x6e4   : > { %v3926_v39 = vadd.f32 %v3925_v48, %v3924_v1  ;;  %v1798_v1 = vadd.f32 %v6043_v47, %v1347_v4 }
 0x6e6   : > { %v3927_v0 = vpop.f32.mrb[28].mxu0  ;;  %3802 = vmatmul.mubr.msk.f32.gmra.mrb[58].mxu0 %vm2204_vm12, %v3926_v39 }
 0x6e7   : > { %v3928_v12 = vpop.f32.mrb[29].mxu0  ;;  %2357 = vmatprep.mubr.f32.mxu0 %v4355_v26 }
 0x6e8   : > { %v3929_v7 = vadd.f32 %v3928_v12, %v3927_v0  ;;  %v1352_v12 = vpop.permute.xlu0 %1351 }
 0x6ea   : > { %v3930_v19 = vpop.f32.mrb[30].mxu0  ;;  %3803 = vmatmul.mubr.msk.f32.gmra.mrb[60].mxu0 %vm2204_vm12, %v3929_v7 }
 0x6eb   : > { %v3931_v30 = vpop.f32.mrb[31].mxu0  ;;  %2363 = vmatprep.mubr.f32.mxu0 %v4355_v26 }
 0x6ec   : > { %v3932_v6 = vadd.f32 %v3931_v30, %v3930_v19  ;;  %v1802_v19 = vadd.f32 %v6044_v23, %v1352_v12  ;;  %v2424_v30 = vmax.f32 %v1796_v27, 0.0 }
 0x6ee   : > { %v3933_v43 = vpop.f32.mrb[32].mxu0  ;;  %3804 = vmatmul.mubr.msk.f32.gmra.mrb[62].mxu0 %vm2204_vm12, %v3932_v6  ;;  %v6045_v6 = vld [vmem:[#allocation24_spill] sm:$0xff] }
 0x6ef   : > { %v3934_v9 = vpop.f32.mrb[33].mxu0  ;;  %2369 = vmatprep.mubr.f32.mxu0 %v4355_v26 }
 0x6f0   : > { %v3935_v51 = vadd.f32 %v3934_v9, %v3933_v43  ;;  %v1804_v43 = vadd.f32 %v6045_v6, %v1352_v12  ;;  %v2425_v9 = vmax.f32 %v1798_v1, 0.0 }
 0x6f2   : > { %v3936_v50 = vpop.f32.mrb[34].mxu0  ;;  %3805 = vmatmul.mubr.msk.f32.gmra.mrb[64].mxu0 %vm2204_vm12, %v3935_v51  ;;  %v1357_v51 = vpop.permute.xlu1 %1356 }
 0x6f3   : > { %v3937_v8 = vpop.f32.mrb[35].mxu0  ;;  %2375 = vmatprep.mubr.f32.mxu0 %v4355_v26 }
 0x6f4   : > { %v3938_v54 = vadd.f32 %v3937_v8, %v3936_v50 }
 0x6f6   : > { %v3939_v11 = vpop.f32.mrb[36].mxu0  ;;  %3806 = vmatmul.mubr.msk.f32.gmra.mrb[66].mxu0 %vm2204_vm12, %v3938_v54  ;;  %v1367_v14 = vpop.permute.xlu1 %1366 }
 0x6f7   : > { %v3940_v42 = vpop.f32.mrb[37].mxu0  ;;  %2381 = vmatprep.mubr.f32.mxu0 %v4355_v26 }
 0x6f8   : > { %v3941_v45 = vadd.f32 %v3940_v42, %v3939_v11  ;;  %v2426_v11 = vmax.f32 %v1802_v19, 0.0  ;;  %v6046_v42 = vld [vmem:[#allocation25_spill] sm:$0xff]  ;;  %v6055_v19 = vld [vmem:[#allocation34_spill] sm:$0xff] }
 0x6fa   : > { %v3942_v5 = vpop.f32.mrb[38].mxu0  ;;  %3807 = vmatmul.mubr.msk.f32.gmra.mrb[68].mxu0 %vm2204_vm12, %v3941_v45  ;;  %v1806_v45 = vadd.f32 %v6046_v42, %v1357_v51  ;;  %v6057_v42 = vld [vmem:[#allocation36_spill] sm:$0xff] }
 0x6fb   : > { %v3943_v53 = vpop.f32.mrb[39].mxu0  ;;  %2387 = vmatprep.mubr.f32.mxu0 %v4355_v26 }
 0x6fc   : > { %v3944_v10 = vadd.f32 %v3943_v53, %v3942_v5  ;;  %v2427_v53 = vmax.f32 %v1804_v43, 0.0 }
 0x6fe   : > { %v3945_v52 = vpop.f32.mrb[40].mxu0  ;;  %3808 = vmatmul.mubr.msk.f32.gmra.mrb[70].mxu0 %vm2204_vm12, %v3944_v10  ;;  %v6047_v10 = vld [vmem:[#allocation26_spill] sm:$0xff] }
 0x6ff   : > { %v3946_v60 = vpop.f32.mrb[41].mxu0  ;;  %2393 = vmatprep.mubr.f32.mxu0 %v4355_v26 }
 0x700   : > { %v3947_v13 = vadd.f32 %v3946_v60, %v3945_v52  ;;  %v1808_v52 = vadd.f32 %v6047_v10, %v1357_v51 }
 0x702   : > { %v3948_v57 = vpop.f32.mrb[42].mxu0  ;;  %3809 = vmatmul.mubr.msk.f32.gmra.mrb[72].mxu0 %vm2204_vm12, %v3947_v13  ;;  %v2429_v2 = vmax.f32 %v1808_v52, 0.0 }
 0x703   : > { %v3949_v16 = vpop.f32.mrb[43].mxu0  ;;  %2399 = vmatprep.mubr.f32.mxu0 %v4355_v26 }
 0x704   : > { %v3950_v58 = vadd.f32 %v3949_v16, %v3948_v57 }
 0x706   : > { %v3951_v56 = vpop.f32.mrb[44].mxu0  ;;  %3810 = vmatmul.mubr.msk.f32.gmra.mrb[74].mxu0 %vm2204_vm12, %v3950_v58  ;;  %v1362_v58 = vpop.permute.xlu0 %1361 }
 0x707   : > { %v3952_v15 = vpop.f32.mrb[45].mxu0  ;;  %2405 = vmatprep.mubr.f32.mxu0 %v4355_v26 }
 0x708   : > { %v3953_v55 = vadd.f32 %v3952_v15, %v3951_v56  ;;  %v6048_v15 = vld [vmem:[#allocation27_spill] sm:$0xff] }
 0x70a   : > { %v3954_v18 = vpop.f32.mrb[46].mxu0  ;;  %3811 = vmatmul.mubr.msk.f32.gmra.mrb[76].mxu0 %vm2204_vm12, %v3953_v55  ;;  %v1812_v55 = vadd.f32 %v6048_v15, %v1362_v58  ;;  %v1372_v4 = vpop.permute.xlu0 %1371 }
 0x70b   : > { %v3955_v25 = vpop.f32.mrb[47].mxu0  ;;  %2411 = vmatprep.mubr.f32.mxu0 %v4355_v26 }
 0x70c   : > { %v3956_v59 = vadd.f32 %v3955_v25, %v3954_v18  ;;  %v2428_v18 = vmax.f32 %v1806_v45, 0.0  ;;  %v6049_v25 = vld [vmem:[#allocation28_spill] sm:$0xff] }
 0x70e   : > { %3812 = vmatmul.mubr.msk.f32.gmra.mrb[78].mxu0 %vm2204_vm12, %v3956_v59  ;;  %v1814_v59 = vadd.f32 %v6049_v25, %v1362_v58 }
 0x70f   : > { %2610 = vmatprep.mubr.bf16.mxu0 %v6042_v17 }
 0x7a5   : > { %v2323_v29 = vpop.f32.mrb[48].mxu0 }
 0x7a6   : > { %v2450_v44 = vmul.f32 %v2418_v28, %v2323_v29  ;;  %v2325_v26 = vpop.f32.mrb[49].mxu0  ;;  %v1816_v29 = vadd.f32 %v6050_v20, %v1367_v14  ;;  %v6061_v20 = vld [vmem:[#allocation40_spill] sm:$0xff] }
 0x7a7   : > { %v2451_v3 = vmul.f32 %v2419_v32, %v2325_v26  ;;  %v2430_v32 = vmax.f32 %v1812_v55, 0.0  ;;  %v2431_v26 = vmax.f32 %v1814_v59, 0.0  ;;  %v6059_v55 = vld [vmem:[#allocation38_spill] sm:$0xff] }
 0x7a9   : > { %v2329_v34 = vpop.f32.mrb[50].mxu0 }
 0x7aa   : > { %v2452_v63 = vmul.f32 %v2420_v41, %v2329_v34  ;;  %v2331_v46 = vpop.f32.mrb[51].mxu0 }
 0x7ab   : > { %v2453_v49 = vmul.f32 %v2421_v35, %v2331_v46 }
 0x7ac   : > { %v2490_v37 = vpack.c.bf16 %v2452_v63, %v2450_v44  ;;  %v6052_v63 = vld [vmem:[#allocation31_spill] sm:$0xff] }
 0x7ad   : > { %v2491_v48 = vpack.c.bf16 %v2453_v49, %v2451_v3  ;;  %v2335_v39 = vpop.f32.mrb[52].mxu0  ;;  %v1818_v3 = vadd.f32 %v6051_v62, %v1367_v14  ;;  %v1822_v46 = vadd.f32 %v6052_v63, %v1372_v4  ;;  %v2432_v49 = vmax.f32 %v1816_v29, 0.0 }
 0x7ae   : > { %v2454_v0 = vmul.f32 %v2422_v36, %v2335_v39  ;;  %v2337_v38 = vpop.f32.mrb[53].mxu0  ;;  %v6053_v36 = vld [vmem:[#allocation32_spill] sm:$0xff] }
 0x7af   : > { %v2455_v7 = vmul.f32 %v2423_v31, %v2337_v38  ;;  %2578 = vmatprep.subr.bf16.mxu0 %v2491_v48  ;;  %v1824_v27 = vadd.f32 %v6053_v36, %v1372_v4  ;;  %v1377_v31 = vpop.permute.xlu1 %1376  ;;  %v6054_v38 = vld [vmem:[#allocation33_spill] sm:$0xff] }
 0x7b0   : > { %2579 = vmatpush1.bf16.msra.mxu0 %v2490_v37  ;;  %v2433_v37 = vmax.f32 %v1818_v3, 0.0  ;;  %v1826_v12 = vadd.f32 %v6054_v38, %v1377_v31  ;;  %v6065_v38 = vld [vmem:[#allocation44_spill] sm:$0xff] }
 0x7b1   : > { %v2341_v40 = vpop.f32.mrb[54].mxu0  ;;  %v2435_v23 = vmax.f32 %v1824_v27, 0.0 }
 0x7b2   : > { %v2456_v50 = vmul.f32 %v2424_v30, %v2341_v40  ;;  %v2343_v8 = vpop.f32.mrb[55].mxu0  ;;  %v1828_v30 = vadd.f32 %v6055_v19, %v1377_v31  ;;  %v1382_v40 = vpop.permute.xlu0 %1381 }
 0x7b3   : > { %v2457_v54 = vmul.f32 %v2425_v9, %v2343_v8  ;;  %v6056_v8 = vld [vmem:[#allocation35_spill] sm:$0xff]  ;;  %v1834_v45 = vadd.f32 %v6057_v42, %v1382_v40 }
 0x7b4   : > { %v2492_v5 = vpack.c.bf16 %v2456_v50, %v2454_v0  ;;  %v2434_v0 = vmax.f32 %v1822_v46, 0.0  ;;  %v6063_v46 = vld [vmem:[#allocation42_spill] sm:$0xff] }
 0x7b5   : > { %v2493_v60 = vpack.c.bf16 %v2457_v54, %v2455_v7  ;;  %v2347_v13 = vpop.f32.mrb[56].mxu0  ;;  %v1832_v54 = vadd.f32 %v6056_v8, %v1382_v40  ;;  %v2439_v15 = vmax.f32 %v1834_v45, 0.0 }
 0x7b6   : > { %v2458_v57 = vmul.f32 %v2426_v11, %v2347_v13  ;;  %v2349_v16 = vpop.f32.mrb[57].mxu0  ;;  %v2436_v11 = vmax.f32 %v1826_v12, 0.0 }
 0x7b7   : > { %v2459_v56 = vmul.f32 %v2427_v53, %v2349_v16  ;;  %2580 = vmatprep.subr.bf16.mxu0 %v2493_v60  ;;  %v1387_v53 = vpop.permute.xlu1 %1386  ;;  %v6058_v16 = vld [vmem:[#allocation37_spill] sm:$0xff] }
 0x7b8   : > { %2581 = vmatpush1.bf16.msra.mxu0 %v2492_v5  ;;  %v2437_v5 = vmax.f32 %v1828_v30, 0.0  ;;  %v1836_v58 = vadd.f32 %v6058_v16, %v1387_v53 }
 0x7b9   : > { %v2353_v21 = vpop.f32.mrb[58].mxu0 }
 0x7ba   : > { %v2460_v33 = vmul.f32 %v2428_v18, %v2353_v21  ;;  %v2355_v28 = vpop.f32.mrb[59].mxu0  ;;  %v1838_v18 = vadd.f32 %v6059_v55, %v1387_v53  ;;  %v1392_v21 = vpop.permute.xlu0 %1391  ;;  %v4098_v55 = vld [vmem:[%s5952_s11] sm:$0xff]  }
 0x7bb   : > { %v2461_v22 = vmul.f32 %v2429_v2, %v2355_v28  ;;  %v6060_v28 = vld [vmem:[#allocation39_spill] sm:$0xff]  ;;  %v1844_v29 = vadd.f32 %v6061_v20, %v1392_v21  ;;  %v6068_v20 = vld [vmem:[#allocation6_spill] sm:$0xff] }
 0x7bc   : > { %v2494_v44 = vpack.c.bf16 %v2460_v33, %v2458_v57  ;;  %v2438_v57 = vmax.f32 %v1832_v54, 0.0  ;;  %v6067_v54 = vld [vmem:[#allocation46_spill] sm:$0xff] }
 0x7bd   : > { %v2495_v24 = vpack.c.bf16 %v2461_v22, %v2459_v56  ;;  %v2359_v41 = vpop.f32.mrb[60].mxu0  ;;  %v1842_v22 = vadd.f32 %v6060_v28, %v1392_v21  ;;  %v2443_v63 = vmax.f32 %v1844_v29, 0.0 }
 0x7be   : > { %v2462_v61 = vmul.f32 %v2430_v32, %v2359_v41  ;;  %v2361_v35 = vpop.f32.mrb[61].mxu0  ;;  %v2440_v32 = vmax.f32 %v1836_v58, 0.0 }
 0x7bf   : > { %v2463_v34 = vmul.f32 %v2431_v26, %v2361_v35  ;;  %2582 = vmatprep.subr.bf16.mxu0 %v2495_v24  ;;  %v1397_v26 = vpop.permute.xlu1 %1396  ;;  %v6062_v35 = vld [vmem:[#allocation41_spill] sm:$0xff] }
 0x7c0   : > { %2583 = vmatpush1.bf16.msra.mxu0 %v2494_v44  ;;  %v2441_v44 = vmax.f32 %v1838_v18, 0.0  ;;  %v1846_v4 = vadd.f32 %v6062_v35, %v1397_v26  ;;  %v4099_v18 = vld [vmem:[%s5952_s11 + $0x8] sm:$0xff]  }
 0x7c1   : > { %v2365_v47 = vpop.f32.mrb[62].mxu0 }
 0x7c2   : > { %v2464_v1 = vmul.f32 %v2432_v49, %v2365_v47  ;;  %v2367_v48 = vpop.f32.mrb[63].mxu0  ;;  %v1848_v49 = vadd.f32 %v6063_v46, %v1397_v26  ;;  %v1402_v47 = vpop.permute.xlu0 %1401 }
 0x7c3   : > { %v2465_v39 = vmul.f32 %v2433_v37, %v2367_v48  ;;  %v6064_v48 = vld [vmem:[#allocation43_spill] sm:$0xff]  ;;  %v1854_v12 = vadd.f32 %v6065_v38, %v1402_v47 }
 0x7c4   : > { %v2496_v7 = vpack.c.bf16 %v2464_v1, %v2462_v61  ;;  %v2442_v61 = vmax.f32 %v1842_v22, 0.0 }
 0x7c5   : > { %v2497_v6 = vpack.c.bf16 %v2465_v39, %v2463_v34  ;;  %v2371_v43 = vpop.f32.mrb[64].mxu0  ;;  %v1852_v39 = vadd.f32 %v6064_v48, %v1402_v47  ;;  %v2447_v8 = vmax.f32 %v1854_v12, 0.0 }
 0x7c6   : > { %v2466_v9 = vmul.f32 %v2434_v0, %v2371_v43  ;;  %v2373_v51 = vpop.f32.mrb[65].mxu0  ;;  %v2444_v0 = vmax.f32 %v1846_v4, 0.0 }
 0x7c7   : > { %v2467_v50 = vmul.f32 %v2435_v23, %v2373_v51  ;;  %2584 = vmatprep.subr.bf16.mxu0 %v2497_v6  ;;  %v1407_v23 = vpop.permute.xlu1 %1406  ;;  %v6066_v51 = vld [vmem:[#allocation45_spill] sm:$0xff] }
 0x7c8   : > { %2585 = vmatpush1.bf16.msra.mxu0 %v2496_v7  ;;  %v2445_v7 = vmax.f32 %v1848_v49, 0.0  ;;  %v1856_v40 = vadd.f32 %v6066_v51, %v1407_v23 }
 0x7c9   : > { %v2377_v10 = vpop.f32.mrb[66].mxu0 }
 0x7ca   : > { %v2468_v52 = vmul.f32 %v2436_v11, %v2377_v10  ;;  %v2379_v60 = vpop.f32.mrb[67].mxu0  ;;  %v1858_v11 = vadd.f32 %v6067_v54, %v1407_v23  ;;  %v6072_v23 = vld [vmem:[#allocation10_spill] sm:$0xff]  ;;  %v6074_v54 = vld [vmem:[#allocation12_spill] sm:$0xff] }
 0x7cb   : > { %v2469_v13 = vmul.f32 %v2437_v5, %v2379_v60  ;;  %v2522_v28 = vpop.permute.xlu1 %2521 }
 0x7cc   : > { %v2498_v56 = vpack.c.bf16 %v2468_v52, %v2466_v9  ;;  %v2446_v9 = vmax.f32 %v1852_v39, 0.0  ;;  %v2448_v52 = vmax.f32 %v1856_v40, 0.0  ;;  %v2449_v60 = vmax.f32 %v1858_v11, 0.0 }
 0x7cd   : > { %v2499_v25 = vpack.c.bf16 %v2469_v13, %v2467_v50  ;;  %v2383_v59 = vpop.f32.mrb[68].mxu0 }
 0x7ce   : > { %v2470_v2 = vmul.f32 %v2438_v57, %v2383_v59  ;;  %v2385_v14 = vpop.f32.mrb[69].mxu0  ;;  %v4101_v59 = vld [vmem:[%s5952_s11 + $0x18] sm:$0xff]  }
 0x7cf   : > { %v2471_v33 = vmul.f32 %v2439_v15, %v2385_v14  ;;  %2586 = vmatprep.subr.bf16.mxu0 %v2499_v25  ;;  %v4100_v25 = vld [vmem:[%s5952_s11 + $0x10] sm:$0xff]   ;;  %v2532_v48 = vpop.permute.xlu1 %2531 }
 0x7d0   : > { %2587 = vmatpush1.bf16.msra.mxu0 %v2498_v56 }
 0x7d1   : > { %v2389_v62 = vpop.f32.mrb[70].mxu0 }
 0x7d2   : > { %v2472_v3 = vmul.f32 %v2440_v32, %v2389_v62  ;;  %v2391_v24 = vpop.f32.mrb[71].mxu0  ;;  %v6069_v62 = vld [vmem:[#allocation7_spill] sm:$0xff] }
 0x7d3   : > { %v2473_v41 = vmul.f32 %v2441_v44, %v2391_v24 }
 0x7d4   : > { %v2500_v34 = vpack.c.bf16 %v2472_v3, %v2470_v2  ;;  %v2517_v2 = vpop.permute.xlu0 %2516 }
 0x7d5   : > { %v2501_v36 = vpack.c.bf16 %v2473_v41, %v2471_v33  ;;  %v2395_v27 = vpop.f32.mrb[72].mxu0 }
 0x7d6   : > { %v2474_v37 = vmul.f32 %v2442_v61, %v2395_v27  ;;  %v2397_v31 = vpop.f32.mrb[73].mxu0  ;;  %v6070_v61 = vld [vmem:[#allocation8_spill] sm:$0xff] }
 0x7d7   : > { %v2475_v1 = vmul.f32 %v2443_v63, %v2397_v31  ;;  %2588 = vmatprep.subr.bf16.mxu0 %v2501_v36  ;;  %v6071_v63 = vld [vmem:[#allocation9_spill] sm:$0xff] }
 0x7d8   : > { %2589 = vmatpush1.bf16.msra.mxu0 %v2500_v34  ;;  %v2527_v36 = vpop.permute.xlu0 %2526 }
 0x7d9   : > { %v2401_v19 = vpop.f32.mrb[74].mxu0 }
 0x7da   : > { %v2476_v30 = vmul.f32 %v2444_v0, %v2401_v19  ;;  %v2403_v6 = vpop.f32.mrb[75].mxu0 }
 0x7db   : > { %v2477_v43 = vmul.f32 %v2445_v7, %v2403_v6 }
 0x7dc   : > { %v2502_v50 = vpack.c.bf16 %v2476_v30, %v2474_v37 }
 0x7dd   : > { %v2503_v42 = vpack.c.bf16 %v2477_v43, %v2475_v1  ;;  %v2407_v45 = vpop.f32.mrb[76].mxu0 }
 0x7de   : > { %v2478_v5 = vmul.f32 %v2446_v9, %v2407_v45  ;;  %v2409_v53 = vpop.f32.mrb[77].mxu0  ;;  %v6073_v9 = vld [vmem:[#allocation11_spill] sm:$0xff]  ;;  %v6075_v45 = vld [vmem:[#allocation13_spill] sm:$0xff] }
 0x7df   : > { %v2479_v10 = vmul.f32 %v2447_v8, %v2409_v53  ;;  %2590 = vmatprep.subr.bf16.mxu0 %v2503_v42 }
 0x7e0   : > { %2591 = vmatpush1.bf16.msra.mxu0 %v2502_v50 }
 0x7e1   : > { %v2413_v13 = vpop.f32.mrb[78].mxu0 }
 0x7e2   : > { %v2480_v57 = vmul.f32 %v2448_v52, %v2413_v13  ;;  %v2415_v16 = vpop.f32.mrb[79].mxu0  ;;  %v2537_v52 = vpop.permute.xlu0 %2536 }
 0x7e3   : > { %v2481_v58 = vmul.f32 %v2449_v60, %v2415_v16 }
 0x7e4   : > { %v2504_v56 = vpack.c.bf16 %v2480_v57, %v2478_v5 }
 0x7e5   : > { %v2505_v15 = vpack.c.bf16 %v2481_v58, %v2479_v10 }
 0x7e7   : > { %2592 = vmatprep.subr.bf16.mxu0 %v2505_v15  ;;  %v2542_v15 = vpop.permute.xlu1 %2541 }
 0x7e8   : > { %2593 = vmatpush1.bf16.msra.mxu0 %v2504_v56 }
 0x7eb   : > { %2611 = vmatmul.mubr.bf16.vlgmr.msra.gmra.mrb[80].mxu0 %v4098_v55 }
 0x7ec   : > { %2620 = vmatprep.mubr.bf16.mxu0 %v6042_v17 }
 0x7f3   : > { %2621 = vmatmul.mubr.bf16.gmra.mrb[84].mxu0 %v4099_v18 }
 0x7f4   : > { %2630 = vmatprep.mubr.bf16.mxu0 %v6042_v17 }
 0x7fb   : > { %2631 = vmatmul.mubr.bf16.gmra.mrb[88].mxu0 %v4100_v25 }
 0x7fc   : > { %2640 = vmatprep.mubr.bf16.mxu0 %v6042_v17 }
 0x803   : > { %2641 = vmatmul.mubr.bf16.gmra.mrb[92].mxu0 %v4101_v59 }
 0x804   : > { %2989 = vmatprep.mubr.bf16.mxu0 %v6042_v17 }
 0x8be   : > { %v2612_v14 = vpop.f32.mrb[80].mxu0 }
 0x8bf   : > { %v2613_v21 = vadd.f32 %v2612_v14, %v2517_v2  ;;  %v2614_v33 = vpop.f32.mrb[81].mxu0  ;;  %v6076_v14 = vld [vmem:[#allocation14_spill] sm:$0xff] }
 0x8c0   : > { %v2615_v22 = vadd.f32 %v2614_v33, %v2517_v2  ;;  %v2616_v32 = vpop.f32.mrb[82].mxu0 }
 0x8c1   : > { %v5372_v29 = vadd.f32 %v2613_v21, %v6068_v20  ;;  %v2617_v44 = vadd.f32 %v2616_v32, %v2522_v28  ;;  %v2618_v26 = vpop.f32.mrb[83].mxu0 }
 0x8c2   : > { %v5375_v3 = vadd.f32 %v2615_v22, %v6069_v62  ;;  %v2619_v24 = vadd.f32 %v2618_v26, %v2522_v28  ;;  %v6077_v22 = vld [vmem:[#allocation15_spill] sm:$0xff] }
 0x8c3   : > { %v2692_v41 = vmul.f32 %v5372_v29, %v5372_v29  ;;  %v5380_v35 = vadd.f32 %v2617_v44, %v6070_v61 }
 0x8c4   : > { %v2667_v4 = vadd.f32 %v5375_v3, %v5372_v29  ;;  %v2693_v34 = vmul.f32 %v5375_v3, %v5375_v3  ;;  %v5387_v46 = vadd.f32 %v2619_v24, %v6071_v63  ;;  %v6078_v24 = vld [vmem:[#allocation16_spill] sm:$0xff] }
 0x8c5   : > { %v2694_v49 = vmul.f32 %v5380_v35, %v5380_v35 }
 0x8c6   : > { %v2708_v27 = vadd.f32 %v2693_v34, %v2692_v41  ;;  %v2668_v37 = vadd.f32 %v2667_v4, %v5380_v35  ;;  %v2622_v31 = vpop.f32.mrb[84].mxu0  ;;  %v2695_v38 = vmul.f32 %v5387_v46, %v5387_v46  ;;  %v6079_v4 = vld [vmem:[#allocation17_spill] sm:$0xff] }
 0x8c7   : > { %v2623_v47 = vadd.f32 %v2622_v31, %v2527_v36  ;;  %v2624_v1 = vpop.f32.mrb[85].mxu0 }
 0x8c8   : > { %v2709_v39 = vadd.f32 %v2708_v27, %v2694_v49  ;;  %v2669_v0 = vadd.f32 %v2668_v37, %v5387_v46  ;;  %v2625_v12 = vadd.f32 %v2624_v1, %v2527_v36  ;;  %v2626_v7 = vpop.f32.mrb[86].mxu0  ;;  %v2547_v36 = vpop.permute.xlu0 %2546 }
 0x8c9   : > { %v5396_v19 = vadd.f32 %v2623_v47, %v6072_v23  ;;  %v2627_v30 = vadd.f32 %v2626_v7, %v2532_v48  ;;  %v2628_v6 = vpop.f32.mrb[87].mxu0  ;;  %v6080_v7 = vld [vmem:[#allocation18_spill] sm:$0xff] }
 0x8ca   : > { %v2710_v43 = vadd.f32 %v2709_v39, %v2695_v38  ;;  %v5399_v51 = vadd.f32 %v2625_v12, %v6073_v9  ;;  %v2629_v40 = vadd.f32 %v2628_v6, %v2532_v48  ;;  %v2552_v39 = vpop.permute.xlu1 %2551 }
 0x8cb   : > { %v2670_v50 = vadd.f32 %v2669_v0, %v5396_v19  ;;  %v2696_v8 = vmul.f32 %v5396_v19, %v5396_v19  ;;  %v5405_v11 = vadd.f32 %v2627_v30, %v6074_v54  ;;  %v6082_v54 = vld [vmem:[#allocation20_spill] sm:$0xff] }
 0x8cc   : > { %v2697_v42 = vmul.f32 %v5399_v51, %v5399_v51  ;;  %v5410_v5 = vadd.f32 %v2629_v40, %v6075_v45  ;;  %v6081_v40 = vld [vmem:[#allocation19_spill] sm:$0xff] }
 0x8cd   : > { %v2711_v53 = vadd.f32 %v2710_v43, %v2696_v8  ;;  %v2671_v10 = vadd.f32 %v2670_v50, %v5399_v51  ;;  %v2698_v16 = vmul.f32 %v5405_v11, %v5405_v11 }
 0x8ce   : > { %v2632_v60 = vpop.f32.mrb[88].mxu0  ;;  %v2699_v55 = vmul.f32 %v5410_v5, %v5410_v5 }
 0x8cf   : > { %v2712_v13 = vadd.f32 %v2711_v53, %v2697_v42  ;;  %v2672_v57 = vadd.f32 %v2671_v10, %v5405_v11  ;;  %v2633_v58 = vadd.f32 %v2632_v60, %v2537_v52  ;;  %v2634_v56 = vpop.f32.mrb[89].mxu0 }
 0x8d0   : > { %v2635_v18 = vadd.f32 %v2634_v56, %v2537_v52  ;;  %v2636_v25 = vpop.f32.mrb[90].mxu0  ;;  %v6083_v52 = vld [vmem:[#allocation21_spill] sm:$0xff] }
 0x8d1   : > { %v2713_v59 = vadd.f32 %v2712_v13, %v2698_v16  ;;  %v2673_v2 = vadd.f32 %v2672_v57, %v5410_v5  ;;  %v5420_v21 = vadd.f32 %v2633_v58, %v6076_v14  ;;  %v2637_v33 = vadd.f32 %v2636_v25, %v2542_v15  ;;  %v2638_v28 = vpop.f32.mrb[91].mxu0  ;;  %v2797_v14 = vld [vmem:[%s5955_s14] sm:$0xff] }
 0x8d2   : > { %v5423_v32 = vadd.f32 %v2635_v18, %v6077_v22  ;;  %v2639_v20 = vadd.f32 %v2638_v28, %v2542_v15  ;;  %v2799_v28 = vld [vmem:[%s5955_s14 + $0x10] sm:$0xff]  ;;  %v2802_v22 = vld [vmem:[%s5955_s14 + $0x28] sm:$0xff] }
 0x8d3   : > { %v2714_v44 = vadd.f32 %v2713_v59, %v2699_v55  ;;  %v2674_v26 = vadd.f32 %v2673_v2, %v5420_v21  ;;  %v2700_v62 = vmul.f32 %v5420_v21, %v5420_v21  ;;  %v5429_v41 = vadd.f32 %v2637_v33, %v6078_v24  ;;  %v2798_v2 = vld [vmem:[%s5955_s14 + $0x8] sm:$0xff]  ;;  %v2800_v33 = vld [vmem:[%s5955_s14 + $0x18] sm:$0xff]  ;;  %v2805_v24 = vld [vmem:[%s5955_s14 + $0x40] sm:$0xff] }
 0x8d4   : > { %v2701_v61 = vmul.f32 %v5423_v32, %v5423_v32  ;;  %v5434_v34 = vadd.f32 %v2639_v20, %v6079_v4  ;;  %v2801_v20 = vld [vmem:[%s5955_s14 + $0x20] sm:$0xff]  ;;  %v2807_v4 = vld [vmem:[%s5955_s14 + $0x50] sm:$0xff] }
 0x8d5   : > { %v2715_v63 = vadd.f32 %v2714_v44, %v2700_v62  ;;  %v2675_v49 = vadd.f32 %v2674_v26, %v5423_v32  ;;  %v2702_v47 = vmul.f32 %v5429_v41, %v5429_v41  ;;  %v2804_v44 = vld [vmem:[%s5955_s14 + $0x38] sm:$0xff]  ;;  %v2803_v26 = vld [vmem:[%s5955_s14 + $0x30] sm:$0xff]  ;;  %v2806_v62 = vld [vmem:[%s5955_s14 + $0x48] sm:$0xff] }
 0x8d6   : > { %v2642_v27 = vpop.f32.mrb[92].mxu0  ;;  %v2703_v0 = vmul.f32 %v5434_v34, %v5434_v34 }
 0x8d7   : > { %v2716_v37 = vadd.f32 %v2715_v63, %v2701_v61  ;;  %v2676_v31 = vadd.f32 %v2675_v49, %v5429_v41  ;;  %v2643_v1 = vadd.f32 %v2642_v27, %v2547_v36  ;;  %v2644_v48 = vpop.f32.mrb[93].mxu0  ;;  %v2808_v61 = vld [vmem:[%s5955_s14 + $0x58] sm:$0xff]  ;;  %v2810_v63 = vld [vmem:[%s5955_s14 + $0x68] sm:$0xff]  ;;  %v2809_v49 = vld [vmem:[%s5955_s14 + $0x60] sm:$0xff] }
 0x8d8   : > { %v2645_v38 = vadd.f32 %v2644_v48, %v2547_v36  ;;  %v2646_v12 = vpop.f32.mrb[94].mxu0  ;;  %v2812_v36 = vld [vmem:[%s5955_s14 + $0x78] sm:$0xff]  ;;  %v2811_v27 = vld [vmem:[%s5955_s14 + $0x70] sm:$0xff]  ;;  %v3323_v48 = vld [vmem:[%s5957_s16 + $0x28] sm:$0xff] }
 0x8d9   : > { %v5443_v23 = vadd.f32 %v2643_v1, %v6080_v7  ;;  %v2647_v30 = vadd.f32 %v2646_v12, %v2552_v39  ;;  %v2648_v6 = vpop.f32.mrb[95].mxu0  ;;  %v2677_v43 = vadd.f32 %v2676_v31, %v5434_v34  ;;  %v2717_v9 = vadd.f32 %v2716_v37, %v2702_v47  ;;  %v3319_v37 = vld [vmem:[%s5957_s16 + $0x8] sm:$0xff]  ;;  %v3318_v31 = vld [vmem:[%s5957_s16] sm:$0xff]  ;;  %v3321_v47 = vld [vmem:[%s5957_s16 + $0x18] sm:$0xff] }
 0x8da   : > { %v5447_v50 = vadd.f32 %v2645_v38, %v6081_v40  ;;  %v2649_v8 = vadd.f32 %v2648_v6, %v2552_v39  ;;  %v3320_v1 = vld [vmem:[%s5957_s16 + $0x10] sm:$0xff]  ;;  %v3322_v39 = vld [vmem:[%s5957_s16 + $0x20] sm:$0xff] }
 0x8db   : > { %v5450_v42 = vadd.f32 %v2647_v30, %v6082_v54  ;;  %v2678_v45 = vadd.f32 %v2677_v43, %v5443_v23  ;;  %v2704_v53 = vmul.f32 %v5443_v23, %v5443_v23  ;;  %v2718_v10 = vadd.f32 %v2717_v9, %v2703_v0  ;;  %v3325_v0 = vld [vmem:[%s5957_s16 + $0x38] sm:$0xff]  ;;  %v3324_v38 = vld [vmem:[%s5957_s16 + $0x30] sm:$0xff] }
 0x8dc   : > { %v5456_v60 = vadd.f32 %v2649_v8, %v6083_v52  ;;  %v2705_v13 = vmul.f32 %v5447_v50, %v5447_v50 }
 0x8dd   : > { %v2679_v57 = vadd.f32 %v2678_v45, %v5447_v50  ;;  %v2719_v16 = vadd.f32 %v2718_v10, %v2704_v53  ;;  %v2706_v56 = vmul.f32 %v5450_v42, %v5450_v42 }
 0x8de   : > { %v2707_v18 = vmul.f32 %v5456_v60, %v5456_v60 }
 0x8df   : > { %v2680_v58 = vadd.f32 %v2679_v57, %v5450_v42  ;;  %v2720_v15 = vadd.f32 %v2719_v16, %v2705_v13 }
 0x8e1   : > { %v2681_v55 = vadd.f32 %v2680_v58, %v5456_v60  ;;  %v2721_v25 = vadd.f32 %v2720_v15, %v2706_v56 }
 0x8e3   : > { %2682 = vadd.xlane.f32.xlu0 %v2681_v55  ;;  %v2722_v59 = vadd.f32 %v2721_v25, %v2707_v18 }
 0x8e5   : > { %2723 = vadd.xlane.f32.xlu1 %v2722_v59 }
 0x8f6   : > { %2820 = vperm.xlu1 %4075, %v2798_v2  }
 0x8f9   : > { %2815 = vperm.xlu0 %4074, %v2797_v14  }
 0x8fa   : > { %2830 = vperm.xlu1 %4075, %v2800_v33  }
 0x8fd   : > { %2825 = vperm.xlu0 %4074, %v2799_v28  }
 0x8fe   : > { %2840 = vperm.xlu1 %4075, %v2802_v22  }
 0x901   : > { %2835 = vperm.xlu0 %4074, %v2801_v20  }
 0x902   : > { %2850 = vperm.xlu1 %4075, %v2804_v44  }
 0x905   : > { %2845 = vperm.xlu0 %4074, %v2803_v26  }
 0x906   : > { %2860 = vperm.xlu1 %4075, %v2806_v62  }
 0x909   : > { %2855 = vperm.xlu0 %4074, %v2805_v24  }
 0x90a   : > { %2870 = vperm.xlu1 %4075, %v2808_v61  }
 0x90d   : > { %2865 = vperm.xlu0 %4074, %v2807_v4  }
 0x90e   : > { %2880 = vperm.xlu1 %4075, %v2810_v63  }
 0x911   : > { %2875 = vperm.xlu0 %4074, %v2809_v49  }
 0x912   : > { %2890 = vperm.xlu1 %4075, %v2812_v36  }
 0x915   : > { %2885 = vperm.xlu0 %4074, %v2811_v27  }
 0x916   : > { %3333 = vperm.xlu1 %4075, %v3319_v37  }
 0x919   : > { %3328 = vperm.xlu0 %4074, %v3318_v31  }
 0x91a   : > { %3343 = vperm.xlu1 %4075, %v3321_v47  }
 0x91d   : > { %3338 = vperm.xlu0 %4074, %v3320_v1  }
 0x91e   : > { %3353 = vperm.xlu1 %4075, %v3323_v48  }
 0x921   : > { %3348 = vperm.xlu0 %4074, %v3322_v39  }
 0x922   : > { %3363 = vperm.xlu1 %4075, %v3325_v0  }
 0x925   : > { %3358 = vperm.xlu0 %4074, %v3324_v38  }
 0x970   : > { %v2683_v12 = vpop.xlane.xlu0 %2682 }
 0x971   : > { %v2684_v7 = vrot.slane %v2683_v12, 4 }
 0x972   : > { %v2724_v30 = vpop.xlane.xlu1 %2723 }
 0x973   : > { %v2685_v6 = vadd.f32 %v2684_v7, %v2683_v12  ;;  %v2725_v43 = vrot.slane %v2724_v30, 4 }
 0x975   : > { %v2686_v9 = vrot.slane %v2685_v6, 2  ;;  %v2726_v40 = vadd.f32 %v2725_v43, %v2724_v30 }
 0x977   : > { %v2727_v8 = vrot.slane %v2726_v40, 2  ;;  %v2687_v54 = vadd.f32 %v2686_v9, %v2685_v6 }
 0x979   : > { %v2688_v45 = vrot.slane %v2687_v54, 1  ;;  %v2728_v53 = vadd.f32 %v2727_v8, %v2726_v40 }
 0x97b   : > { %v2689_v10 = vadd.f32 %v2688_v45, %v2687_v54  ;;  %v2729_v52 = vrot.slane %v2728_v53, 1 }
 0x97d   : > { %3995 = vpush %v2689_v10  ;;  %v2730_v13 = vadd.f32 %v2729_v52, %v2728_v53  ;;  %v4102_v10 = vld [vmem:[%s5954_s13] sm:$0xff]   ;;  %v4103_v52 = vld [vmem:[%s5954_s13 + $0x8] sm:$0xff]  }
 0x97f   : > { %3997 = vpush %v2730_v13  ;;  %v4104_v13 = vld [vmem:[%s5954_s13 + $0x10] sm:$0xff]  }
 0x9ae   : > { %s3996_s22 = spop %3995 }
 0x9af   : > { %s2691_s6 = smul.f32 6.1035156e-05, %s3996_s22 }
 0x9b0   : > { %s3998_s7 = spop %3997 }
 0x9b1   : > { %s2750_s26 = smul.f32 %s2691_s6, %s2691_s6  ;;  %v2733_v58 = vstv %s2691_s6 }
 0x9b2   : > { %s2732_s27 = smul.f32 6.1035156e-05, %s3998_s7  ;;  %v2735_v56 = vsub.f32 %v5375_v3, %v2733_v58  ;;  %v2737_v15 = vsub.f32 %v5387_v46, %v2733_v58  ;;  %v2734_v55 = vsub.f32 %v5372_v29, %v2733_v58  ;;  %v2736_v18 = vsub.f32 %v5380_v35, %v2733_v58 }
 0x9b3   : > { %v2739_v59 = vsub.f32 %v5399_v51, %v2733_v58  ;;  %v2741_v2 = vsub.f32 %v5410_v5, %v2733_v58  ;;  %v2738_v26 = vsub.f32 %v5396_v19, %v2733_v58  ;;  %v2740_v62 = vsub.f32 %v5405_v11, %v2733_v58 }
 0x9b4   : > { %s2751_s4 = ssub.f32 %s2732_s27, %s2750_s26  ;;  %v2743_v4 = vsub.f32 %v5423_v32, %v2733_v58  ;;  %v2745_v63 = vsub.f32 %v5434_v34, %v2733_v58  ;;  %v2742_v47 = vsub.f32 %v5420_v21, %v2733_v58  ;;  %v2744_v1 = vsub.f32 %v5429_v41, %v2733_v58 }
 0x9b5   : > { %v2747_v48 = vsub.f32 %v5447_v50, %v2733_v58  ;;  %v2749_v39 = vsub.f32 %v5456_v60, %v2733_v58  ;;  %v2746_v43 = vsub.f32 %v5443_v23, %v2733_v58  ;;  %v2748_v9 = vsub.f32 %v5450_v42, %v2733_v58  ;;  %v4107_v58 = vld [vmem:[%s5954_s13 + $0x28] sm:$0xff]  }
 0x9b6   : > { %s2752_s5 = sadd.f32 1e-05, %s2751_s4 }
 0x9b8   : > { %v2753_v57 = vstv %s2752_s5 }
 0x9b9   : > { %4139 = vrsqrt.f32 %v2753_v57  ;;  %v4105_v57 = vld [vmem:[%s5954_s13 + $0x18] sm:$0xff]  }
 0x9c3   : > { %v4140_v16 = vpop.eup %4139 }
 0x9c4   : > { %3999 = vpush %v4140_v16  ;;  %v4106_v16 = vld [vmem:[%s5954_s13 + $0x20] sm:$0xff]  }
 0x9f5   : > { %s4000_s8 = spop %3999 }
 0x9f6   : > { %v2756_v25 = vstv %s4000_s8 }
 0x9f7   : > { %v2758_v14 = vmul.f32 %v2756_v25, %v2735_v56  ;;  %v2760_v33 = vmul.f32 %v2756_v25, %v2737_v15  ;;  %v2757_v28 = vmul.f32 %v2756_v25, %v2734_v55  ;;  %v2759_v22 = vmul.f32 %v2756_v25, %v2736_v18  ;;  %v4108_v56 = vld [vmem:[%s5954_s13 + $0x30] sm:$0xff]   ;;  %v4109_v15 = vld [vmem:[%s5954_s13 + $0x38] sm:$0xff]   ;;  %v4110_v55 = vld [vmem:[%s5950_s9 + $0x88] sm:$0xff]  }
 0x9f8   : > { %v2762_v20 = vmul.f32 %v2756_v25, %v2739_v59  ;;  %v2764_v44 = vmul.f32 %v2756_v25, %v2741_v2  ;;  %v2761_v49 = vmul.f32 %v2756_v25, %v2738_v26  ;;  %v2763_v36 = vmul.f32 %v2756_v25, %v2740_v62  ;;  %3788 = vmatmul.mubr.msk.bf16.gmra.mrb[68].mxu1 %vm1594_vm10, %v4110_v55  ;;  %v4111_v18 = vld [vmem:[%s5950_s9 + $0x90] sm:$0xff]   ;;  %v4113_v59 = vld [vmem:[%s5950_s9 + $0xa0] sm:$0xff]   ;;  %v4114_v2 = vld [vmem:[%s5950_s9 + $0xa8] sm:$0xff]   ;;  %v2821_v26 = vpop.permute.xlu1 %2820 }
 0x9f9   : > { %v2774_v24 = vpack.c.bf16 %v2760_v33, %v2758_v14  ;;  %v2773_v61 = vpack.c.bf16 %v2759_v22, %v2757_v28  ;;  %v2766_v37 = vmul.f32 %v2756_v25, %v2743_v4  ;;  %v2768_v31 = vmul.f32 %v2756_v25, %v2745_v63  ;;  %1873 = vmatprep.mubr.bf16.mxu1 %v6042_v17  ;;  %v4115_v14 = vld [vmem:[%s5950_s9 + $0xb0] sm:$0xff]   ;;  %v4116_v33 = vld [vmem:[%s5950_s9 + $0xb8] sm:$0xff]   ;;  %v2816_v28 = vpop.permute.xlu0 %2815 }
 0x9fa   : > { %v2776_v27 = vpack.c.bf16 %v2764_v44, %v2762_v20  ;;  %v2775_v0 = vpack.c.bf16 %v2763_v36, %v2761_v49  ;;  %v2765_v38 = vmul.f32 %v2756_v25, %v2742_v47  ;;  %v2767_v12 = vmul.f32 %v2756_v25, %v2744_v1 }
 0x9fb   : > { %2957 = vmatprep.subr.bf16.mxu0 %v2774_v24  ;;  %v2778_v7 = vpack.c.bf16 %v2768_v31, %v2766_v37  ;;  %v2770_v30 = vmul.f32 %v2756_v25, %v2747_v48  ;;  %v2772_v6 = vmul.f32 %v2756_v25, %v2749_v39  ;;  %v2769_v8 = vmul.f32 %v2756_v25, %v2746_v43 }
 0x9fc   : > { %2958 = vmatpush1.bf16.msra.mxu0 %v2773_v61  ;;  %v2777_v40 = vpack.c.bf16 %v2767_v12, %v2765_v38  ;;  %v2771_v54 = vmul.f32 %v2756_v25, %v2748_v9  ;;  %v4112_v25 = vld [vmem:[%s5950_s9 + $0x98] sm:$0xff]   ;;  %v2831_v39 = vpop.permute.xlu1 %2830 }
 0x9fd   : > { %2959 = vmatprep.subr.bf16.mxu0 %v2776_v27  ;;  %v2780_v45 = vpack.c.bf16 %v2772_v6, %v2770_v30  ;;  %v2826_v31 = vpop.permute.xlu0 %2825 }
 0x9fe   : > { %v2779_v53 = vpack.c.bf16 %v2771_v54, %v2769_v8 }
 0xa00   : > { %2960 = vmatpush1.bf16.msra.mxu0 %v2775_v0  ;;  %3789 = vmatmul.mubr.msk.bf16.gmra.mrb[72].mxu1 %vm1594_vm10, %v4111_v18 }
 0xa01   : > { %2961 = vmatprep.subr.bf16.mxu0 %v2778_v7  ;;  %1879 = vmatprep.mubr.bf16.mxu1 %v6042_v17 }
 0xa04   : > { %2962 = vmatpush1.bf16.msra.mxu0 %v2777_v40 }
 0xa05   : > { %2963 = vmatprep.subr.bf16.mxu0 %v2780_v45  ;;  %v2836_v45 = vpop.permute.xlu0 %2835 }
 0xa08   : > { %2964 = vmatpush1.bf16.msra.mxu0 %v2779_v53  ;;  %3790 = vmatmul.mubr.msk.bf16.gmra.mrb[76].mxu1 %vm1594_vm10, %v4112_v25 }
 0xa09   : > { %1885 = vmatprep.mubr.bf16.mxu1 %v6042_v17 }
 0xa0b   : > { %3825 = vmatmul.mubr.msk.bf16.vlgmr.msra.gmra.mrb[96].mxu0 %vm1594_vm10, %v4102_v10 }
 0xa0c   : > { %2999 = vmatprep.mubr.bf16.mxu0 %v6042_v17 }
 0xa10   : > { %3791 = vmatmul.mubr.msk.bf16.gmra.mrb[80].mxu1 %vm1594_vm10, %v4113_v59 }
 0xa11   : > { %1891 = vmatprep.mubr.bf16.mxu1 %v6042_v17 }
 0xa13   : > { %3826 = vmatmul.mubr.msk.bf16.gmra.mrb[100].mxu0 %vm1594_vm10, %v4103_v52 }
 0xa14   : > { %3009 = vmatprep.mubr.bf16.mxu0 %v6042_v17 }
 0xa18   : > { %3792 = vmatmul.mubr.msk.bf16.gmra.mrb[84].mxu1 %vm1594_vm10, %v4114_v2 }
 0xa19   : > { %1897 = vmatprep.mubr.bf16.mxu1 %v6042_v17 }
 0xa1b   : > { %3827 = vmatmul.mubr.msk.bf16.gmra.mrb[104].mxu0 %vm1594_vm10, %v4104_v13 }
 0xa1c   : > { %3019 = vmatprep.mubr.bf16.mxu0 %v6042_v17 }
 0xa20   : > { %3793 = vmatmul.mubr.msk.bf16.gmra.mrb[88].mxu1 %vm1594_vm10, %v4115_v14 }
 0xa21   : > { %1903 = vmatprep.mubr.bf16.mxu1 %v6042_v17 }
 0xa23   : > { %3828 = vmatmul.mubr.msk.bf16.gmra.mrb[108].mxu0 %vm1594_vm10, %v4105_v57 }
 0xa24   : > { %3029 = vmatprep.mubr.bf16.mxu0 %v6042_v17 }
 0xa28   : > { %3794 = vmatmul.mubr.msk.bf16.gmra.mrb[92].mxu1 %vm1594_vm10, %v4116_v33 }
 0xa29   : > { %3422 = vmatprep.mubr.bf16.mxu1 %v6042_v17 }
 0xa2b   : > { %3829 = vmatmul.mubr.msk.bf16.gmra.mrb[112].mxu0 %vm1594_vm10, %v4106_v16 }
 0xa2c   : > { %3039 = vmatprep.mubr.bf16.mxu0 %v6042_v17 }
 0xa33   : > { %3830 = vmatmul.mubr.msk.bf16.gmra.mrb[116].mxu0 %vm1594_vm10, %v4107_v58 }
 0xa34   : > { %3049 = vmatprep.mubr.bf16.mxu0 %v6042_v17 }
 0xa3b   : > { %3831 = vmatmul.mubr.msk.bf16.gmra.mrb[120].mxu0 %vm1594_vm10, %v4108_v56  ;;  %v2841_v56 = vpop.permute.xlu1 %2840 }
 0xa3c   : > { %3059 = vmatprep.mubr.bf16.mxu0 %v6042_v17 }
 0xa43   : > { %3832 = vmatmul.mubr.msk.bf16.gmra.mrb[124].mxu0 %vm1594_vm10, %v4109_v15 }
 0xade   : > { %v2991_v22 = vpop.f32.mrb[96].mxu0 }
 0xadf   : > { %v5629_v20 = vadd.f32 %v2991_v22, %v2816_v28  ;;  %v2993_v44 = vpop.f32.mrb[97].mxu0 }
 0xae0   : > { %v5631_v62 = vadd.f32 %v2993_v44, %v2816_v28  ;;  %v2995_v24 = vpop.f32.mrb[98].mxu0 }
 0xae1   : > { %v3833_v61 = vmul.f32 -1.442695, %v5629_v20  ;;  %v5634_v4 = vadd.f32 %v2995_v24, %v2821_v26  ;;  %v2997_v63 = vpop.f32.mrb[99].mxu0 }
 0xae2   : > { %v3834_v49 = vmul.f32 -1.442695, %v5631_v62  ;;  %v5637_v36 = vadd.f32 %v2997_v63, %v2821_v26 }
 0xae3   : > { %4141 = vpow2.f32 %v3833_v61  ;;  %v3835_v27 = vmul.f32 -1.442695, %v5634_v4  ;;  %v2846_v61 = vpop.permute.xlu0 %2845 }
 0xae4   : > { %4143 = vpow2.f32 %v3834_v49  ;;  %v3836_v37 = vmul.f32 -1.442695, %v5637_v36 }
 0xae5   : > { %4145 = vpow2.f32 %v3835_v27 }
 0xae6   : > { %4147 = vpow2.f32 %v3836_v37  ;;  %v3001_v47 = vpop.f32.mrb[100].mxu0 }
 0xae7   : > { %v5641_v1 = vadd.f32 %v3001_v47, %v2826_v31  ;;  %v3003_v48 = vpop.f32.mrb[101].mxu0 }
 0xae8   : > { %v5643_v0 = vadd.f32 %v3003_v48, %v2826_v31  ;;  %v3005_v38 = vpop.f32.mrb[102].mxu0 }
 0xae9   : > { %v3837_v12 = vmul.f32 -1.442695, %v5641_v1  ;;  %v5646_v7 = vadd.f32 %v3005_v38, %v2831_v39  ;;  %v3007_v30 = vpop.f32.mrb[103].mxu0 }
 0xaea   : > { %v3838_v6 = vmul.f32 -1.442695, %v5643_v0  ;;  %v5649_v43 = vadd.f32 %v3007_v30, %v2831_v39  ;;  %v2851_v39 = vpop.permute.xlu1 %2850 }
 0xaeb   : > { %4149 = vpow2.f32 %v3837_v12  ;;  %v3839_v9 = vmul.f32 -1.442695, %v5646_v7 }
 0xaec   : > { %4151 = vpow2.f32 %v3838_v6  ;;  %v3840_v40 = vmul.f32 -1.442695, %v5649_v43 }
 0xaed   : > { %v4142_v8 = vpop.eup %4141  ;;  %4153 = vpow2.f32 %v3839_v9 }
 0xaee   : > { %v4144_v54 = vpop.eup %4143  ;;  %v3166_v53 = vadd.f32 1.0, %v4142_v8  ;;  %4155 = vpow2.f32 %v3840_v40  ;;  %v3011_v10 = vpop.f32.mrb[104].mxu0 }
 0xaef   : > { %v4146_v52 = vpop.eup %4145  ;;  %v3167_v13 = vadd.f32 1.0, %v4144_v54  ;;  %v5653_v57 = vadd.f32 %v3011_v10, %v2836_v45  ;;  %v3013_v16 = vpop.f32.mrb[105].mxu0 }
 0xaf0   : > { %v4148_v58 = vpop.eup %4147  ;;  %4157 = vrcp.f32 %v3166_v53  ;;  %v3168_v15 = vadd.f32 1.0, %v4146_v52  ;;  %v5655_v55 = vadd.f32 %v3013_v16, %v2836_v45  ;;  %v3015_v18 = vpop.f32.mrb[106].mxu0 }
 0xaf1   : > { %4159 = vrcp.f32 %v3167_v13  ;;  %v3169_v25 = vadd.f32 1.0, %v4148_v58  ;;  %v3841_v59 = vmul.f32 -1.442695, %v5653_v57  ;;  %v5658_v2 = vadd.f32 %v3015_v18, %v2841_v56  ;;  %v3017_v14 = vpop.f32.mrb[107].mxu0 }
 0xaf2   : > { %4161 = vrcp.f32 %v3168_v15  ;;  %v3842_v33 = vmul.f32 -1.442695, %v5655_v55  ;;  %v5661_v28 = vadd.f32 %v3017_v14, %v2841_v56 }
 0xaf3   : > { %4163 = vrcp.f32 %v3169_v25  ;;  %v3843_v22 = vmul.f32 -1.442695, %v5658_v2  ;;  %v2856_v25 = vpop.permute.xlu0 %2855 }
 0xaf4   : > { %4165 = vpow2.f32 %v3841_v59  ;;  %v3844_v44 = vmul.f32 -1.442695, %v5661_v28 }
 0xaf5   : > { %v4150_v26 = vpop.eup %4149  ;;  %4167 = vpow2.f32 %v3842_v33 }
 0xaf6   : > { %v4152_v24 = vpop.eup %4151  ;;  %v3170_v63 = vadd.f32 1.0, %v4150_v26  ;;  %4169 = vpow2.f32 %v3843_v22  ;;  %v3021_v49 = vpop.f32.mrb[108].mxu0 }
 0xaf7   : > { %v4154_v27 = vpop.eup %4153  ;;  %v3171_v37 = vadd.f32 1.0, %v4152_v24  ;;  %4171 = vpow2.f32 %v3844_v44  ;;  %v5665_v31 = vadd.f32 %v3021_v49, %v2846_v61  ;;  %v3023_v47 = vpop.f32.mrb[109].mxu0 }
 0xaf8   : > { %v4156_v48 = vpop.eup %4155  ;;  %4173 = vrcp.f32 %v3170_v63  ;;  %v3172_v38 = vadd.f32 1.0, %v4154_v27  ;;  %v5667_v12 = vadd.f32 %v3023_v47, %v2846_v61  ;;  %v3025_v30 = vpop.f32.mrb[110].mxu0 }
 0xaf9   : > { %4175 = vrcp.f32 %v3171_v37  ;;  %v3173_v6 = vadd.f32 1.0, %v4156_v48  ;;  %v3845_v9 = vmul.f32 -1.442695, %v5665_v31  ;;  %v5670_v40 = vadd.f32 %v3025_v30, %v2851_v39  ;;  %v3027_v8 = vpop.f32.mrb[111].mxu0 }
 0xafa   : > { %v4158_v54 = vpop.eup %4157  ;;  %4177 = vrcp.f32 %v3172_v38  ;;  %v3846_v45 = vmul.f32 -1.442695, %v5667_v12  ;;  %v5673_v53 = vadd.f32 %v3027_v8, %v2851_v39 }
 0xafb   : > { %v4160_v10 = vpop.eup %4159  ;;  %4179 = vrcp.f32 %v3173_v6  ;;  %v3847_v52 = vmul.f32 -1.442695, %v5670_v40  ;;  %v3262_v56 = vmul.f32 %v4158_v54, %v5629_v20  ;;  %v2861_v20 = vpop.permute.xlu1 %2860 }
 0xafc   : > { %v4162_v13 = vpop.eup %4161  ;;  %4181 = vpow2.f32 %v3845_v9  ;;  %v3848_v16 = vmul.f32 -1.442695, %v5673_v53  ;;  %v3263_v59 = vmul.f32 %v4160_v10, %v5631_v62 }
 0xafd   : > { %v4164_v58 = vpop.eup %4163  ;;  %v3264_v15 = vmul.f32 %v4162_v13, %v5634_v4  ;;  %4183 = vpow2.f32 %v3846_v45 }
 0xafe   : > { %v4166_v18 = vpop.eup %4165  ;;  %v3265_v14 = vmul.f32 %v4164_v58, %v5637_v36  ;;  %4185 = vpow2.f32 %v3847_v52  ;;  %v3031_v33 = vpop.f32.mrb[112].mxu0 }
 0xaff   : > { %v4168_v22 = vpop.eup %4167  ;;  %v3302_v44 = vpack.c.bf16 %v3264_v15, %v3262_v56  ;;  %v3174_v26 = vadd.f32 1.0, %v4166_v18  ;;  %4187 = vpow2.f32 %v3848_v16  ;;  %v5681_v24 = vadd.f32 %v3031_v33, %v2856_v25  ;;  %v3033_v61 = vpop.f32.mrb[113].mxu0 }
 0xb00   : > { %v4170_v63 = vpop.eup %4169  ;;  %v3175_v49 = vadd.f32 1.0, %v4168_v22  ;;  %v5683_v4 = vadd.f32 %v3033_v61, %v2856_v25  ;;  %v3035_v27 = vpop.f32.mrb[114].mxu0  ;;  %v3303_v37 = vpack.c.bf16 %v3265_v14, %v3263_v59 }
 0xb01   : > { %v4172_v47 = vpop.eup %4171  ;;  %4189 = vrcp.f32 %v3174_v26  ;;  %v3176_v62 = vadd.f32 1.0, %v4170_v63  ;;  %v3849_v36 = vmul.f32 -1.442695, %v5681_v24  ;;  %v5686_v48 = vadd.f32 %v3035_v27, %v2861_v20  ;;  %v3037_v39 = vpop.f32.mrb[115].mxu0 }
 0xb02   : > { %v4174_v38 = vpop.eup %4173  ;;  %4191 = vrcp.f32 %v3175_v49  ;;  %v3177_v30 = vadd.f32 1.0, %v4172_v47  ;;  %v3850_v6 = vmul.f32 -1.442695, %v5683_v4  ;;  %v5689_v9 = vadd.f32 %v3037_v39, %v2861_v20  ;;  %3390 = vmatprep.subr.bf16.mxu1 %v3303_v37  ;;  %v2866_v56 = vpop.permute.xlu0 %2865 }
 0xb03   : > { %v4176_v8 = vpop.eup %4175  ;;  %4193 = vrcp.f32 %v3176_v62  ;;  %v3851_v54 = vmul.f32 -1.442695, %v5686_v48  ;;  %3391 = vmatpush1.bf16.msra.mxu1 %v3302_v44  ;;  %v3266_v13 = vmul.f32 %v4174_v38, %v5641_v1  ;;  %v2871_v1 = vpop.permute.xlu1 %2870 }
 0xb04   : > { %v4178_v45 = vpop.eup %4177  ;;  %4195 = vrcp.f32 %v3177_v30  ;;  %v3852_v10 = vmul.f32 -1.442695, %v5689_v9  ;;  %v3267_v15 = vmul.f32 %v4176_v8, %v5643_v0 }
 0xb05   : > { %v4180_v52 = vpop.eup %4179  ;;  %v3268_v16 = vmul.f32 %v4178_v45, %v5646_v7  ;;  %4197 = vpow2.f32 %v3849_v36 }
 0xb06   : > { %v4182_v58 = vpop.eup %4181  ;;  %v3269_v18 = vmul.f32 %v4180_v52, %v5649_v43  ;;  %4199 = vpow2.f32 %v3850_v6  ;;  %v3041_v25 = vpop.f32.mrb[116].mxu0 }
 0xb07   : > { %v4184_v59 = vpop.eup %4183  ;;  %v3304_v14 = vpack.c.bf16 %v3268_v16, %v3266_v13  ;;  %v3178_v33 = vadd.f32 1.0, %v4182_v58  ;;  %4201 = vpow2.f32 %v3851_v54  ;;  %v5697_v22 = vadd.f32 %v3041_v25, %v2866_v56  ;;  %v3043_v44 = vpop.f32.mrb[117].mxu0 }
 0xb08   : > { %v4186_v26 = vpop.eup %4185  ;;  %v3179_v61 = vadd.f32 1.0, %v4184_v59  ;;  %4203 = vpow2.f32 %v3852_v10  ;;  %v5699_v7 = vadd.f32 %v3043_v44, %v2866_v56  ;;  %v3045_v63 = vpop.f32.mrb[118].mxu0  ;;  %v3305_v20 = vpack.c.bf16 %v3269_v18, %v3267_v15 }
 0xb09   : > { %v4188_v0 = vpop.eup %4187  ;;  %4205 = vrcp.f32 %v3178_v33  ;;  %v3180_v43 = vadd.f32 1.0, %v4186_v26  ;;  %v3853_v49 = vmul.f32 -1.442695, %v5697_v22  ;;  %v5702_v27 = vadd.f32 %v3045_v63, %v2871_v1  ;;  %v3047_v37 = vpop.f32.mrb[119].mxu0 }
 0xb0a   : > { %4207 = vrcp.f32 %v3179_v61  ;;  %v3181_v47 = vadd.f32 1.0, %v4188_v0  ;;  %v3854_v62 = vmul.f32 -1.442695, %v5699_v7  ;;  %v5705_v36 = vadd.f32 %v3047_v37, %v2871_v1  ;;  %3392 = vmatprep.subr.bf16.mxu1 %v3305_v20  ;;  %v2876_v45 = vpop.permute.xlu0 %2875  ;;  %v2881_v59 = vpop.permute.xlu1 %2880 }
 0xb0b   : > { %v4190_v39 = vpop.eup %4189  ;;  %4209 = vrcp.f32 %v3180_v43  ;;  %v3855_v38 = vmul.f32 -1.442695, %v5702_v27  ;;  %3393 = vmatpush1.bf16.msra.mxu1 %v3304_v14 }
 0xb0c   : > { %v4192_v30 = vpop.eup %4191  ;;  %4211 = vrcp.f32 %v3181_v47  ;;  %v3856_v6 = vmul.f32 -1.442695, %v5705_v36  ;;  %v3270_v10 = vmul.f32 %v4190_v39, %v5653_v57 }
 0xb0d   : > { %v4194_v8 = vpop.eup %4193  ;;  %4213 = vpow2.f32 %v3853_v49  ;;  %v3271_v58 = vmul.f32 %v4192_v30, %v5655_v55 }
 0xb0e   : > { %v4196_v54 = vpop.eup %4195  ;;  %v3272_v52 = vmul.f32 %v4194_v8, %v5658_v2  ;;  %4215 = vpow2.f32 %v3854_v62  ;;  %v3051_v13 = vpop.f32.mrb[120].mxu0 }
 0xb0f   : > { %v4198_v16 = vpop.eup %4197  ;;  %v3273_v56 = vmul.f32 %v4196_v54, %v5661_v28  ;;  %4217 = vpow2.f32 %v3855_v38  ;;  %v5713_v15 = vadd.f32 %v3051_v13, %v2876_v45  ;;  %v3053_v18 = vpop.f32.mrb[121].mxu0 }
 0xb10   : > { %v4200_v25 = vpop.eup %4199  ;;  %v3306_v14 = vpack.c.bf16 %v3272_v52, %v3270_v10  ;;  %v3182_v33 = vadd.f32 1.0, %v4198_v16  ;;  %4219 = vpow2.f32 %v3856_v6  ;;  %v5715_v44 = vadd.f32 %v3053_v18, %v2876_v45  ;;  %v3055_v57 = vpop.f32.mrb[122].mxu0 }
 0xb11   : > { %v4202_v2 = vpop.eup %4201  ;;  %v3183_v26 = vadd.f32 1.0, %v4200_v25  ;;  %v5717_v1 = vadd.f32 %v3055_v57, %v2881_v59  ;;  %v3057_v61 = vpop.f32.mrb[123].mxu0  ;;  %v3307_v55 = vpack.c.bf16 %v3273_v56, %v3271_v58  ;;  %v3857_v20 = vmul.f32 -1.442695, %v5713_v15 }
 0xb12   : > { %v4204_v63 = vpop.eup %4203  ;;  %4221 = vrcp.f32 %v3182_v33  ;;  %v3184_v28 = vadd.f32 1.0, %v4202_v2  ;;  %v5720_v0 = vadd.f32 %v3057_v61, %v2881_v59  ;;  %v3858_v37 = vmul.f32 -1.442695, %v5715_v44  ;;  %v2886_v6 = vpop.permute.xlu0 %2885 }
 0xb13   : > { %v4206_v43 = vpop.eup %4205  ;;  %4223 = vrcp.f32 %v3183_v26  ;;  %v3185_v49 = vadd.f32 1.0, %v4204_v63  ;;  %3394 = vmatprep.subr.bf16.mxu1 %v3307_v55  ;;  %v3859_v62 = vmul.f32 -1.442695, %v5717_v1  ;;  %v2891_v56 = vpop.permute.xlu1 %2890 }
 0xb14   : > { %v4208_v47 = vpop.eup %4207  ;;  %4225 = vrcp.f32 %v3184_v28  ;;  %3395 = vmatpush1.bf16.msra.mxu1 %v3306_v14  ;;  %v3860_v38 = vmul.f32 -1.442695, %v5720_v0  ;;  %v3274_v8 = vmul.f32 %v4206_v43, %v5665_v31 }
 0xb15   : > { %v4210_v39 = vpop.eup %4209  ;;  %4227 = vrcp.f32 %v3185_v49 }
 0xb16   : > { %v4212_v30 = vpop.eup %4211  ;;  %v3276_v54 = vmul.f32 %v4210_v39, %v5670_v40  ;;  %4229 = vpow2.f32 %v3857_v20  ;;  %v3061_v45 = vpop.f32.mrb[124].mxu0  ;;  %v3275_v40 = vmul.f32 %v4208_v47, %v5667_v12 }
 0xb17   : > { %v4214_v10 = vpop.eup %4213  ;;  %v3277_v52 = vmul.f32 %v4212_v30, %v5673_v53  ;;  %4231 = vpow2.f32 %v3858_v37  ;;  %v5728_v13 = vadd.f32 %v3061_v45, %v2886_v6  ;;  %v3063_v16 = vpop.f32.mrb[125].mxu0 }
 0xb18   : > { %v4216_v58 = vpop.eup %4215  ;;  %v3308_v18 = vpack.c.bf16 %v3276_v54, %v3274_v8  ;;  %v3186_v25 = vadd.f32 1.0, %v4214_v10  ;;  %4233 = vpow2.f32 %v3859_v62  ;;  %v5730_v59 = vadd.f32 %v3063_v16, %v2886_v6  ;;  %v3065_v14 = vpop.f32.mrb[126].mxu0 }
 0xb19   : > { %v4218_v31 = vpop.eup %4217  ;;  %v3187_v33 = vadd.f32 1.0, %v4216_v58  ;;  %4235 = vpow2.f32 %v3860_v38  ;;  %v5733_v57 = vadd.f32 %v3065_v14, %v2891_v56  ;;  %v3067_v53 = vpop.f32.mrb[127].mxu0  ;;  %v3861_v61 = vmul.f32 -1.442695, %v5728_v13 }
 0xb1a   : > { %v4220_v2 = vpop.eup %4219  ;;  %4237 = vrcp.f32 %v3186_v25  ;;  %v3188_v26 = vadd.f32 1.0, %v4218_v31  ;;  %v5736_v55 = vadd.f32 %v3067_v53, %v2891_v56  ;;  %v3862_v28 = vmul.f32 -1.442695, %v5730_v59 }
 0xb1b   : > { %4239 = vrcp.f32 %v3187_v33  ;;  %v3189_v63 = vadd.f32 1.0, %v4220_v2  ;;  %v3309_v20 = vpack.c.bf16 %v3277_v52, %v3275_v40  ;;  %v3863_v12 = vmul.f32 -1.442695, %v5733_v57 }
 0xb1c   : > { %v4222_v43 = vpop.eup %4221  ;;  %4241 = vrcp.f32 %v3188_v26  ;;  %v3864_v37 = vmul.f32 -1.442695, %v5736_v55 }
 0xb1d   : > { %v4224_v49 = vpop.eup %4223  ;;  %4243 = vrcp.f32 %v3189_v63  ;;  %3396 = vmatprep.subr.bf16.mxu1 %v3309_v20  ;;  %v3278_v39 = vmul.f32 %v4222_v43, %v5681_v24 }
 0xb1e   : > { %v4226_v47 = vpop.eup %4225  ;;  %4245 = vpow2.f32 %v3861_v61  ;;  %3397 = vmatpush1.bf16.msra.mxu1 %v3308_v18  ;;  %v3279_v6 = vmul.f32 %v4224_v49, %v5683_v4 }
 0xb1f   : > { %v4228_v62 = vpop.eup %4227  ;;  %v3280_v38 = vmul.f32 %v4226_v47, %v5686_v48  ;;  %4247 = vpow2.f32 %v3862_v28 }
 0xb20   : > { %v4230_v30 = vpop.eup %4229  ;;  %v3281_v8 = vmul.f32 %v4228_v62, %v5689_v9  ;;  %4249 = vpow2.f32 %v3863_v12 }
 0xb21   : > { %v4232_v54 = vpop.eup %4231  ;;  %v3310_v45 = vpack.c.bf16 %v3280_v38, %v3278_v39  ;;  %v3190_v10 = vadd.f32 1.0, %v4230_v30  ;;  %4251 = vpow2.f32 %v3864_v37 }
 0xb22   : > { %v4234_v52 = vpop.eup %4233  ;;  %v3191_v16 = vadd.f32 1.0, %v4232_v54  ;;  %v3311_v58 = vpack.c.bf16 %v3281_v8, %v3279_v6 }
 0xb23   : > { %v4236_v56 = vpop.eup %4235  ;;  %4253 = vrcp.f32 %v3190_v10  ;;  %v3192_v18 = vadd.f32 1.0, %v4234_v52 }
 0xb24   : > { %v4238_v24 = vpop.eup %4237  ;;  %4255 = vrcp.f32 %v3191_v16  ;;  %v3193_v48 = vadd.f32 1.0, %v4236_v56  ;;  %3398 = vmatprep.subr.bf16.mxu1 %v3311_v58 }
 0xb25   : > { %v4240_v25 = vpop.eup %4239  ;;  %4257 = vrcp.f32 %v3192_v18  ;;  %3399 = vmatpush1.bf16.msra.mxu1 %v3310_v45  ;;  %v3282_v14 = vmul.f32 %v4238_v24, %v5697_v22 }
 0xb26   : > { %v4242_v4 = vpop.eup %4241  ;;  %4259 = vrcp.f32 %v3193_v48  ;;  %v3283_v33 = vmul.f32 %v4240_v25, %v5699_v7 }
 0xb27   : > { %v4244_v9 = vpop.eup %4243  ;;  %v3284_v31 = vmul.f32 %v4242_v4, %v5702_v27 }
 0xb28   : > { %v4246_v40 = vpop.eup %4245  ;;  %v3285_v53 = vmul.f32 %v4244_v9, %v5705_v36 }
 0xb29   : > { %v4248_v2 = vpop.eup %4247  ;;  %v3312_v26 = vpack.c.bf16 %v3284_v31, %v3282_v14  ;;  %v3194_v61 = vadd.f32 1.0, %v4246_v40 }
 0xb2a   : > { %v4250_v63 = vpop.eup %4249  ;;  %v3195_v28 = vadd.f32 1.0, %v4248_v2  ;;  %v3313_v20 = vpack.c.bf16 %v3285_v53, %v3283_v33 }
 0xb2b   : > { %v4252_v43 = vpop.eup %4251  ;;  %4261 = vrcp.f32 %v3194_v61  ;;  %v3196_v12 = vadd.f32 1.0, %v4250_v63 }
 0xb2c   : > { %4263 = vrcp.f32 %v3195_v28  ;;  %v3197_v49 = vadd.f32 1.0, %v4252_v43  ;;  %3400 = vmatprep.subr.bf16.mxu1 %v3313_v20 }
 0xb2d   : > { %v4254_v22 = vpop.eup %4253  ;;  %4265 = vrcp.f32 %v3196_v12  ;;  %3401 = vmatpush1.bf16.msra.mxu1 %v3312_v26 }
 0xb2e   : > { %v4256_v27 = vpop.eup %4255  ;;  %4267 = vrcp.f32 %v3197_v49  ;;  %v3286_v36 = vmul.f32 %v4254_v22, %v5713_v15 }
 0xb2f   : > { %v4258_v7 = vpop.eup %4257  ;;  %v3287_v62 = vmul.f32 %v4256_v27, %v5715_v44 }
 0xb30   : > { %v4260_v37 = vpop.eup %4259  ;;  %v3288_v47 = vmul.f32 %v4258_v7, %v5717_v1 }
 0xb31   : > { %v3289_v39 = vmul.f32 %v4260_v37, %v5720_v0  ;;  %v4117_v0 = vld [vmem:[%s5956_s15] sm:$0xff]  }
 0xb32   : > { %v3314_v38 = vpack.c.bf16 %v3288_v47, %v3286_v36  ;;  %v3329_v36 = vpop.permute.xlu0 %3328 }
 0xb33   : > { %v3315_v30 = vpack.c.bf16 %v3289_v39, %v3287_v62 }
 0xb35   : > { %v4262_v6 = vpop.eup %4261  ;;  %3402 = vmatprep.subr.bf16.mxu1 %v3315_v30 }
 0xb36   : > { %v4264_v8 = vpop.eup %4263  ;;  %3403 = vmatpush1.bf16.msra.mxu1 %v3314_v38  ;;  %v3290_v10 = vmul.f32 %v4262_v6, %v5728_v13  ;;  %v4118_v13 = vld [vmem:[%s5956_s15 + $0x8] sm:$0xff]   ;;  %v3334_v38 = vpop.permute.xlu1 %3333 }
 0xb37   : > { %v4266_v54 = vpop.eup %4265  ;;  %v3291_v15 = vmul.f32 %v4264_v8, %v5730_v59  ;;  %v4119_v59 = vld [vmem:[%s5956_s15 + $0x10] sm:$0xff]  }
 0xb38   : > { %v4268_v45 = vpop.eup %4267  ;;  %v3292_v52 = vmul.f32 %v4266_v54, %v5733_v57  ;;  %v4120_v57 = vld [vmem:[%s5956_s15 + $0x18] sm:$0xff]  }
 0xb39   : > { %v3293_v1 = vmul.f32 %v4268_v45, %v5736_v55  ;;  %v1869_v55 = vpop.f32.mrb[68].mxu1 }
 0xb3a   : > { %v3316_v16 = vpack.c.bf16 %v3292_v52, %v3290_v10  ;;  %v1870_v58 = vpop.f32.mrb[69].mxu1 }
 0xb3b   : > { %v3317_v44 = vpack.c.bf16 %v3293_v1, %v3291_v15  ;;  %v1871_v56 = vpop.f32.mrb[70].mxu1  ;;  %v3344_v58 = vpop.permute.xlu1 %3343 }
 0xb3c   : > { %v1872_v18 = vpop.f32.mrb[71].mxu1 }
 0xb3d   : > { %3404 = vmatprep.subr.bf16.mxu1 %v3317_v44  ;;  %v1875_v24 = vpop.f32.mrb[72].mxu1 }
 0xb3e   : > { %3405 = vmatpush1.bf16.msra.mxu1 %v3316_v16  ;;  %v1876_v48 = vpop.f32.mrb[73].mxu1 }
 0xb3f   : > { %v1877_v25 = vpop.f32.mrb[74].mxu1 }
 0xb40   : > { %v1878_v4 = vpop.f32.mrb[75].mxu1 }
 0xb41   : > { %3423 = vmatmul.mubr.bf16.vlgmr.msra.gmra.mrb[96].mxu1 %v4117_v0  ;;  %v1881_v9 = vpop.f32.mrb[76].mxu1  ;;  %v3339_v0 = vpop.permute.xlu0 %3338 }
 0xb42   : > { %3432 = vmatprep.mubr.bf16.mxu1 %v6042_v17  ;;  %v1882_v14 = vpop.f32.mrb[77].mxu1 }
 0xb43   : > { %v1883_v31 = vpop.f32.mrb[78].mxu1 }
 0xb44   : > { %v1884_v40 = vpop.f32.mrb[79].mxu1 }
 0xb45   : > { %v1887_v33 = vpop.f32.mrb[80].mxu1 }
 0xb46   : > { %v1888_v53 = vpop.f32.mrb[81].mxu1 }
 0xb47   : > { %v1889_v2 = vpop.f32.mrb[82].mxu1 }
 0xb48   : > { %v1890_v26 = vpop.f32.mrb[83].mxu1 }
 0xb49   : > { %3433 = vmatmul.mubr.bf16.gmra.mrb[100].mxu1 %v4118_v13  ;;  %v1893_v61 = vpop.f32.mrb[84].mxu1 }
 0xb4a   : > { %3442 = vmatprep.mubr.bf16.mxu1 %v6042_v17  ;;  %v1894_v63 = vpop.f32.mrb[85].mxu1 }
 0xb4b   : > { %v1895_v28 = vpop.f32.mrb[86].mxu1 }
 0xb51   : > { %3443 = vmatmul.mubr.bf16.gmra.mrb[104].mxu1 %v4119_v59 }
 0xb52   : > { %3452 = vmatprep.mubr.bf16.mxu1 %v6042_v17 }
 0xb59   : > { %3453 = vmatmul.mubr.bf16.gmra.mrb[108].mxu1 %v4120_v57 }
 0xb5a   : > { %3635 = vmatprep.mubr.bf16.mxu1 %v6042_v17  ;;  %v1896_v17 = vpop.f32.mrb[87].mxu1 }
 0xb5b   : > { %v1899_v20 = vpop.f32.mrb[88].mxu1 }
 0xb5c   : > { %v1900_v43 = vpop.f32.mrb[89].mxu1 }
 0xb5d   : > { %v1901_v12 = vpop.f32.mrb[90].mxu1 }
 0xb5e   : > { %v1902_v49 = vpop.f32.mrb[91].mxu1 }
 0xb5f   : > { %v1905_v22 = vpop.f32.mrb[92].mxu1  ;;  %v3354_v49 = vpop.permute.xlu1 %3353 }
 0xb60   : > { %v1906_v27 = vpop.f32.mrb[93].mxu1 }
 0xb61   : > { %v1907_v7 = vpop.f32.mrb[94].mxu1 }
 0xb62   : > { %v1908_v37 = vpop.f32.mrb[95].mxu1 }
 0xc14   : > { %v3424_v47 = vpop.f32.mrb[96].mxu1 }
 0xc15   : > { %v3425_v62 = vadd.f32 %v3424_v47, %v3329_v36  ;;  %v3426_v39 = vpop.f32.mrb[97].mxu1 }
 0xc16   : > { %v3427_v30 = vadd.f32 %v3426_v39, %v3329_v36  ;;  %v3428_v6 = vpop.f32.mrb[98].mxu1 }
 0xc17   : > { %v5774_v8 = vadd.f32 %v3425_v62, %v5372_v29  ;;  %v3429_v54 = vadd.f32 %v3428_v6, %v3334_v38  ;;  %v3430_v45 = vpop.f32.mrb[99].mxu1 }
 0xc18   : > { %v5777_v10 = vadd.f32 %v3427_v30, %v5375_v3  ;;  %v3431_v52 = vadd.f32 %v3430_v45, %v3334_v38 }
 0xc19   : > { %v3504_v15 = vmul.f32 %v5774_v8, %v5774_v8  ;;  %v5782_v1 = vadd.f32 %v3429_v54, %v5380_v35 }
 0xc1a   : > { %v3479_v16 = vadd.f32 %v5777_v10, %v5774_v8  ;;  %v3505_v44 = vmul.f32 %v5777_v10, %v5777_v10  ;;  %v5789_v29 = vadd.f32 %v3431_v52, %v5387_v46 }
 0xc1b   : > { %v3506_v3 = vmul.f32 %v5782_v1, %v5782_v1 }
 0xc1c   : > { %v3520_v13 = vadd.f32 %v3505_v44, %v3504_v15  ;;  %v3480_v59 = vadd.f32 %v3479_v16, %v5782_v1  ;;  %v3434_v57 = vpop.f32.mrb[100].mxu1  ;;  %v3507_v24 = vmul.f32 %v5789_v29, %v5789_v29 }
 0xc1d   : > { %v3435_v55 = vadd.f32 %v3434_v57, %v3339_v0  ;;  %v3436_v35 = vpop.f32.mrb[101].mxu1  ;;  %v3364_v57 = vpop.permute.xlu1 %3363 }
 0xc1e   : > { %v3521_v56 = vadd.f32 %v3520_v13, %v3506_v3  ;;  %v3481_v18 = vadd.f32 %v3480_v59, %v5789_v29  ;;  %v3437_v48 = vadd.f32 %v3436_v35, %v3339_v0  ;;  %v3438_v46 = vpop.f32.mrb[102].mxu1 }
 0xc1f   : > { %v5798_v25 = vadd.f32 %v3435_v55, %v5396_v19  ;;  %v3439_v4 = vadd.f32 %v3438_v46, %v3344_v58  ;;  %v3440_v9 = vpop.f32.mrb[103].mxu1 }
 0xc20   : > { %v3522_v14 = vadd.f32 %v3521_v56, %v3507_v24  ;;  %v5801_v31 = vadd.f32 %v3437_v48, %v5399_v51  ;;  %v3441_v40 = vadd.f32 %v3440_v9, %v3344_v58  ;;  %v3349_v51 = vpop.permute.xlu0 %3348 }
 0xc21   : > { %v3482_v33 = vadd.f32 %v3481_v18, %v5798_v25  ;;  %v3508_v53 = vmul.f32 %v5798_v25, %v5798_v25  ;;  %v5807_v2 = vadd.f32 %v3439_v4, %v5405_v11 }
 0xc22   : > { %v3509_v26 = vmul.f32 %v5801_v31, %v5801_v31  ;;  %v5812_v19 = vadd.f32 %v3441_v40, %v5410_v5 }
 0xc23   : > { %v3523_v61 = vadd.f32 %v3522_v14, %v3508_v53  ;;  %v3483_v63 = vadd.f32 %v3482_v33, %v5801_v31  ;;  %v3510_v43 = vmul.f32 %v5807_v2, %v5807_v2 }
 0xc24   : > { %v3444_v28 = vpop.f32.mrb[104].mxu1  ;;  %v3511_v22 = vmul.f32 %v5812_v19, %v5812_v19  ;;  %v3359_v16 = vpop.permute.xlu0 %3358 }
 0xc25   : > { %v3524_v17 = vadd.f32 %v3523_v61, %v3509_v26  ;;  %v3484_v20 = vadd.f32 %v3483_v63, %v5807_v2  ;;  %v3445_v12 = vadd.f32 %v3444_v28, %v3349_v51  ;;  %v3446_v11 = vpop.f32.mrb[105].mxu1 }
 0xc26   : > { %v3447_v27 = vadd.f32 %v3446_v11, %v3349_v51  ;;  %v3448_v5 = vpop.f32.mrb[106].mxu1 }
 0xc27   : > { %v3525_v7 = vadd.f32 %v3524_v17, %v3510_v43  ;;  %v3485_v37 = vadd.f32 %v3484_v20, %v5812_v19  ;;  %v5822_v36 = vadd.f32 %v3445_v12, %v5420_v21  ;;  %v3449_v47 = vadd.f32 %v3448_v5, %v3354_v49  ;;  %v3450_v62 = vpop.f32.mrb[107].mxu1 }
 0xc28   : > { %v5825_v39 = vadd.f32 %v3447_v27, %v5423_v32  ;;  %v3451_v38 = vadd.f32 %v3450_v62, %v3354_v49 }
 0xc29   : > { %v3526_v30 = vadd.f32 %v3525_v7, %v3511_v22  ;;  %v3486_v6 = vadd.f32 %v3485_v37, %v5822_v36  ;;  %v3512_v54 = vmul.f32 %v5822_v36, %v5822_v36  ;;  %v5831_v45 = vadd.f32 %v3449_v47, %v5429_v41 }
 0xc2a   : > { %v3513_v52 = vmul.f32 %v5825_v39, %v5825_v39  ;;  %v5836_v21 = vadd.f32 %v3451_v38, %v5434_v34 }
 0xc2b   : > { %v3527_v15 = vadd.f32 %v3526_v30, %v3512_v54  ;;  %v3487_v32 = vadd.f32 %v3486_v6, %v5825_v39  ;;  %v3514_v13 = vmul.f32 %v5831_v45, %v5831_v45 }
 0xc2c   : > { %v3454_v44 = vpop.f32.mrb[108].mxu1  ;;  %v3515_v55 = vmul.f32 %v5836_v21, %v5836_v21 }
 0xc2d   : > { %v3528_v3 = vadd.f32 %v3527_v15, %v3513_v52  ;;  %v3488_v0 = vadd.f32 %v3487_v32, %v5831_v45  ;;  %v3455_v59 = vadd.f32 %v3454_v44, %v3359_v16  ;;  %v3456_v41 = vpop.f32.mrb[109].mxu1 }
 0xc2e   : > { %v3457_v35 = vadd.f32 %v3456_v41, %v3359_v16  ;;  %v3458_v34 = vpop.f32.mrb[110].mxu1 }
 0xc2f   : > { %v3529_v58 = vadd.f32 %v3528_v3, %v3514_v13  ;;  %v3489_v56 = vadd.f32 %v3488_v0, %v5836_v21  ;;  %v5846_v18 = vadd.f32 %v3455_v59, %v5443_v23  ;;  %v3459_v24 = vadd.f32 %v3458_v34, %v3364_v57  ;;  %v3460_v48 = vpop.f32.mrb[111].mxu1 }
 0xc30   : > { %v5849_v46 = vadd.f32 %v3457_v35, %v5447_v50  ;;  %v3461_v4 = vadd.f32 %v3460_v48, %v3364_v57 }
 0xc31   : > { %v3530_v9 = vadd.f32 %v3529_v58, %v3515_v55  ;;  %v3490_v14 = vadd.f32 %v3489_v56, %v5846_v18  ;;  %v3516_v40 = vmul.f32 %v5846_v18, %v5846_v18  ;;  %v5855_v33 = vadd.f32 %v3459_v24, %v5450_v42 }
 0xc32   : > { %v3517_v53 = vmul.f32 %v5849_v46, %v5849_v46  ;;  %v5860_v26 = vadd.f32 %v3461_v4, %v5456_v60  ;;  %v3594_v60 = vld [vmem:[%s5959_s18] sm:$0xff] }
 0xc33   : > { %v3531_v23 = vadd.f32 %v3530_v9, %v3516_v40  ;;  %v3491_v50 = vadd.f32 %v3490_v14, %v5849_v46  ;;  %v3518_v61 = vmul.f32 %v5855_v33, %v5855_v33 }
 0xc34   : > { %v3519_v42 = vmul.f32 %v5860_v26, %v5860_v26 }
 0xc35   : > { %v3492_v63 = vadd.f32 %v3491_v50, %v5855_v33  ;;  %v3532_v51 = vadd.f32 %v3531_v23, %v3517_v53 }
 0xc37   : > { %v3493_v28 = vadd.f32 %v3492_v63, %v5860_v26  ;;  %v3533_v17 = vadd.f32 %v3532_v51, %v3518_v61 }
 0xc39   : > { %3494 = vadd.xlane.f32.xlu0 %v3493_v28  ;;  %v3534_v20 = vadd.f32 %v3533_v17, %v3519_v42  ;;  %v3585_v42 = vld [vmem:[%s5958_s17] sm:$0xf] }
 0xc3b   : > { %3535 = vadd.xlane.f32.xlu1 %v3534_v20 }
 0xc4f   : > { %3597 = vperm.xlu0 %4074, %v3594_v60  }
 0xcc6   : > { %v3495_v43 = vpop.xlane.xlu0 %3494 }
 0xcc7   : > { %v3496_v12 = vrot.slane %v3495_v43, 4 }
 0xcc8   : > { %v3536_v11 = vpop.xlane.xlu1 %3535 }
 0xcc9   : > { %v3497_v49 = vadd.f32 %v3496_v12, %v3495_v43  ;;  %v3537_v22 = vrot.slane %v3536_v11, 4  ;;  %v4271_v12 = vld [vmem:[%s4515_s25] sm:$0xff] }
 0xccb   : > { %v3498_v27 = vrot.slane %v3497_v49, 2  ;;  %v3538_v5 = vadd.f32 %v3537_v22, %v3536_v11  ;;  %v4272_v22 = vld [vmem:[%s4515_s25 + $0x8] sm:$0xff]  ;;  %s4356_s25 = smov [#allocation2]  }
 0xccc   : > { %s4277_s8 = sshll.u32 %s4356_s25, 4  ;;  %s4278_s8 = int_to_ptr.vmem [resolvable:$false] %s4277_s8 }
 0xccd   : > { %v3539_v7 = vrot.slane %v3538_v5, 2  ;;  %v3499_v37 = vadd.f32 %v3498_v27, %v3497_v49 }
 0xccf   : > { %v3540_v47 = vadd.f32 %v3539_v7, %v3538_v5  ;;  %v3500_v62 = vrot.slane %v3499_v37, 1 }
 0xcd1   : > { %v3501_v38 = vadd.f32 %v3500_v62, %v3499_v37  ;;  %v3541_v30 = vrot.slane %v3540_v47, 1 }
 0xcd3   : > { %4001 = vpush %v3501_v38  ;;  %v3542_v6 = vadd.f32 %v3541_v30, %v3540_v47 }
 0xcd5   : > { %4003 = vpush %v3542_v6 }
 0xd04   : > { %s4002_s23 = spop %4001 }
 0xd05   : > { %s3503_s2 = smul.f32 6.1035156e-05, %s4002_s23  ;;  %s593_s23 = sand.u32 1, %s4327_s0  }
 0xd06   : > { %s4004_s22 = spop %4003 }
 0xd07   : > { %s3562_s6 = smul.f32 %s3503_s2, %s3503_s2  ;;  %v3545_v15 = vstv %s3503_s2  ;;  %s3726_s2 = sshll.u32 %s593_s23, 4 }
 0xd08   : > { %s3544_s7 = smul.f32 6.1035156e-05, %s4004_s22  ;;  %v3547_v32 = vsub.f32 %v5777_v10, %v3545_v15  ;;  %v3549_v16 = vsub.f32 %v5789_v29, %v3545_v15  ;;  %v3546_v44 = vsub.f32 %v5774_v8, %v3545_v15  ;;  %v3548_v3 = vsub.f32 %v5782_v1, %v3545_v15  ;;  %s3876_s22 = sshll.u32 %s4478_s20, 8 }
 0xd09   : > { %v3551_v13 = vsub.f32 %v5801_v31, %v3545_v15  ;;  %v3553_v59 = vsub.f32 %v5812_v19, %v3545_v15  ;;  %v3550_v56 = vsub.f32 %v5798_v25, %v3545_v15  ;;  %v3552_v10 = vsub.f32 %v5807_v2, %v3545_v15  ;;  %s3649_s20 = scalar_lea.sflag [#allocation3], %s593_s23 }
 0xd0a   : > { %s3563_s26 = ssub.f32 %s3544_s7, %s3562_s6  ;;  %v3555_v8 = vsub.f32 %v5825_v39, %v3545_v15  ;;  %v3557_v1 = vsub.f32 %v5836_v21, %v3545_v15  ;;  %v3554_v14 = vsub.f32 %v5822_v36, %v3545_v15  ;;  %v3556_v40 = vsub.f32 %v5831_v45, %v3545_v15  ;;  %s595_s6 = scalar_lea.vmem [#allocation2], %s3726_s2 }
 0xd0b   : > { %v3559_v25 = vsub.f32 %v5849_v46, %v3545_v15  ;;  %v3561_v2 = vsub.f32 %v5860_v26, %v3545_v15  ;;  %v3558_v63 = vsub.f32 %v5846_v18, %v3545_v15  ;;  %v3560_v51 = vsub.f32 %v5855_v33, %v3545_v15  ;;  %v3598_v18 = vpop.permute.xlu0 %3597  ;;  %s3663_s7 = sshll.u32 %s595_s6, 4  ;;  %s4279_s2 = scalar_lea.vmem %s4278_s8, 512  ;;  %s5901_s7 = int_to_ptr.vmem [resolvable:$true] %s3663_s7 }
 0xd0c   : > { %s3564_s27 = sadd.f32 1e-05, %s3563_s26  ;;  %s4273_s5 = scalar_lea.vmem %s5901_s7, 256 }
 0xd0d   : > { %p4274_p11 = scmp.ne.s32.totalorder %s5901_s7, %s4273_s5  ;;  %p4280_p0 = scmp.lt.s32.totalorder %s5901_s7, %s4278_s8 }
 0xd0e   : > { %v3565_v54 = vstv %s3564_s27  ;;  %p4281_p1 = scmp.lt.s32.totalorder %s4279_s2, %s4273_s5 }
 0xd0f   : > { %4269 = vrsqrt.f32 %v3565_v54  ;;  %p4275_p12 = pnand %p4274_p11, %p4495_p5 }
 0xd10   : > { %p4282_p2 = por %p4281_p1, %p4280_p0 }
 0xd11   : > { %p4276_p13 = pneg %p4275_p12 }
 0xd13   : > { %p4283_p3 = pnand %p4282_p2, %p4276_p13 }
 0xd19   : > { %v4270_v52 = vpop.eup %4269 }
 0xd1a   : > { %4005 = vpush %v4270_v52 }
 0xd4b   : > { %s4006_s4 = spop %4005 }
 0xd4c   : > { %v3568_v0 = vstv %s4006_s4  ;;  %s5899_s4 = scalar_lea.hbm %s5960_s19, %s3876_s22 }
 0xd4d   : > { %v3570_v41 = vmul.f32 %v3568_v0, %v3547_v32  ;;  %v3572_v57 = vmul.f32 %v3568_v0, %v3549_v16  ;;  %v3569_v55 = vmul.f32 %v3568_v0, %v3546_v44  ;;  %v3571_v35 = vmul.f32 %v3568_v0, %v3548_v3 }
 0xd4e   : > { %v3574_v34 = vmul.f32 %v3568_v0, %v3551_v13  ;;  %v3576_v58 = vmul.f32 %v3568_v0, %v3553_v59  ;;  %v3573_v48 = vmul.f32 %v3568_v0, %v3550_v56  ;;  %v3575_v31 = vmul.f32 %v3568_v0, %v3552_v10 }
 0xd4f   : > { %v3587_v29 = vpack.c.bf16 %v3572_v57, %v3570_v41  ;;  %v3586_v24 = vpack.c.bf16 %v3571_v35, %v3569_v55  ;;  %v3578_v4 = vmul.f32 %v3568_v0, %v3555_v8  ;;  %v3580_v9 = vmul.f32 %v3568_v0, %v3557_v1 }
 0xd50   : > { %v3589_v19 = vpack.c.bf16 %v3576_v58, %v3574_v34  ;;  %v3588_v53 = vpack.c.bf16 %v3575_v31, %v3573_v48  ;;  %v3577_v39 = vmul.f32 %v3568_v0, %v3554_v14  ;;  %v3579_v23 = vmul.f32 %v3568_v0, %v3556_v40 }
 0xd51   : > { %3603 = vmatprep.subr.bf16.mxu1 %v3587_v29  ;;  %v3591_v21 = vpack.c.bf16 %v3580_v9, %v3578_v4  ;;  %v3582_v50 = vmul.f32 %v3568_v0, %v3559_v25  ;;  %v3584_v61 = vmul.f32 %v3568_v0, %v3561_v2  ;;  %v3581_v45 = vmul.f32 %v3568_v0, %v3558_v63 }
 0xd52   : > { %3604 = vmatpush1.bf16.msra.mxu1 %v3586_v24  ;;  %v3590_v36 = vpack.c.bf16 %v3579_v23, %v3577_v39  ;;  %v3583_v28 = vmul.f32 %v3568_v0, %v3560_v51 }
 0xd53   : > { %3605 = vmatprep.subr.bf16.mxu1 %v3589_v19  ;;  %v3593_v46 = vpack.c.bf16 %v3584_v61, %v3582_v50 }
 0xd54   : > { %v3592_v26 = vpack.c.bf16 %v3583_v28, %v3581_v45 }
 0xd56   : > { %3606 = vmatpush1.bf16.msra.mxu1 %v3588_v53 }
 0xd57   : > { %3607 = vmatprep.subr.bf16.mxu1 %v3591_v21 }
 0xd5a   : > { %3608 = vmatpush1.bf16.msra.mxu1 %v3590_v36 }
 0xd5b   : > { %3609 = vmatprep.subr.bf16.mxu1 %v3593_v46 }
 0xd5e   : > { %3610 = vmatpush1.bf16.msra.mxu1 %v3592_v26 }
 0xd61   : > { %3869 = vmatmul.mubr.msk.bf16.vlgmr.msra.gmra.mrb[112].mxu1 %vm1594_vm10, %v3585_v42 }
 0xe34   : > { %v3637_v33 = vpop.f32.mrb[112].mxu1 }
 0xe35   : > { %v3638_v17 = vadd.f32 %v3637_v33, %v3598_v18  ;;  %v3639_v20 = vpop.f32.mrb[113].mxu1 }
 0xe36   : > { %v3640_v60 = vadd.f32 %v3639_v20, %v3598_v18  ;;  %v3641_v43 = vpop.f32.mrb[114].mxu1 }
 0xe37   : > { %v3644_v11 = vadd.f32 %v4271_v12, %v3638_v17  ;;  %v3642_v49 = vpop.f32.mrb[115].mxu1 }
 0xe38   : > { %v3645_v27 = vadd.f32 %v4272_v22, %v3640_v60 }
 0xe39   : > { %3646 = vst [vmem:[%s595_s6] sm:$0xff] %v3644_v11 }
 0xe3a   : > { %3647 = vst [vmem:[%s595_s6 + $0x8] sm:$0xff] %v3645_v27 }
 0xe3b   : > { %4286 = shalt.err (!%p4283_p3)
}
 0xe3c   : > { %s4287_s23 = scalar_lea.hbm %s5899_s4, 256  ;;  %s4291_s26 = scalar_lea.hbm %s5960_s19, 512 }
 0xe3d   : > { %p4288_p4 = scmp.ne.s32.totalorder %s5899_s4, %s4287_s23  ;;  %p4292_p9 = scmp.lt.u32.totalorder %s5899_s4, %s5960_s19 }
 0xe3e   : > { %p4293_p10 = scmp.lt.u32.totalorder %s4291_s26, %s4287_s23  ;;  %p4295_p12 = scmp.lt.u32.totalorder %s4287_s23, %s5899_s4 }
 0xe3f   : > { %p4289_p7 = pnand %p4288_p4, %p4495_p5 }
 0xe40   : > { %p4294_p11 = por %p4293_p10, %p4292_p9 }
 0xe41   : > { %p4290_p8 = pneg %p4289_p7 }
 0xe42   : > { %p4296_p13 = por %p4295_p12, %p4294_p11 }
 0xe44   : > { %p4297_p0 = pnand %p4296_p13, %p4290_p8 }
 0xe46   : > { %4300 = shalt.err (!%p4297_p0)
}
 0xe47   : > { %4007 = dma.vmem_to_hbm [thread:$0]  (%p4495_p5), %s5901_s7, 256, %s5899_s4, %s3649_s20  }
 0xe48 PF: > { %p4013_p1 = scmp.ge.s32.totalorder %s4335_s30, 2  ;;  %s3675_s5 = sand.u32 1, %s4323_s28  }
 0xe49   : > { %s3676_s8 = scalar_lea.sflag [#allocation3], %s3675_s5 }
 0xe4a   : > { %p4010_p2 = pnand %p4013_p1, %p4499_p6 }
 0xe4c   : > { %4318 = dma.done.wait (!%p4010_p2), %s3676_s8, 256  }
 0xe4d   : > { %4320 = vsyncadd (!%p4010_p2), %s3676_s8, 4294967040  ;;  %s6084_s2 = sld [smem:[#allocation5_spill]]  ;;  %p29_p3 = scmp.ge.s32.totalorder %s4482_s21, 4  }
 0xe4e   : > { %s6085_s28 = smov %s4327_s0  ;;  %s6086_s0 = smov %s4331_s29 }
 0xe4f   : > { %s6088_s30 = smov %s4482_s21  ;;  %31 = sbr.rel (!%p29_p3) target bundleno = 12 (0xc), region = 138 }
 0xe53   : > { %s6087_s29 = smov %s6084_s2 }
 0xe56   :  { %3681 = vsyncpa [#allocation3], 1 }
 0xe57   :  { %3683 = vsyncpa [#allocation3 + $0x1], 1 }

</bundles_post_ra>
